<compile_context>
chip_gen: v7x
topology: tpu7x:2x2x1
jax: 0.10.0
libtpu: 0.0.40
codegen_flags: <defaults>
</compile_context>

<pallas_src>
import functools

import jax
import jax.numpy as jnp
from jax import lax
from jax.experimental import pallas as pl
from jax.experimental.pallas import tpu as pltpu

_LANE = 128


# --------------------------------------------------------------------------- #
# Kernels
# --------------------------------------------------------------------------- #
def _conv_stage_kernel(xc_ref, xt_ref, xb_ref, w_ref, b_ref,
                       out_ref, ssum_ref, ssq_ref,
                       ext_ref, slab_ref):
    """conv3x3 + bias for one (batch, H-tile) block + per-lane GN partial sums.

    xc_ref:   (1, TH, W, Cin)  f32 input rows of this tile
    xt_ref:   (1, 1,  W, Cin)  row just above the tile (clamped; masked at t==0)
    xb_ref:   (1, 1,  W, Cin)  row just below the tile (clamped; masked at last t)
    w_ref:    (9*Cin, CP)      bf16 weights, tap-major [(kh,kw) x Cin, CP]
    b_ref:    (1, CP)          f32 bias (zero on padded channels)
    out_ref:  (1, TH, W, CP)   bf16 conv+bias output (pre-GroupNorm), lane-dense
    ssum_ref: (1, 1, 1, CP)    f32 per-lane sum partial
    ssq_ref:  (1, 1, 1, CP)    f32 per-lane sum-of-squares partial
    ext_ref:  (TH+2, W, Cin)   f32 VMEM scratch (halo-extended tile)
    slab_ref: (TH*W, 9*Cin)    bf16 VMEM scratch (im2col slab)
    """
    t = pl.program_id(1)
    n_t = pl.num_programs(1)
    _, TH, W, CP = out_ref.shape
    Cin = xc_ref.shape[3]

    # ---- assemble the halo-extended tile in VMEM scratch (no concatenates) ----
    ext_ref[1:TH + 1] = xc_ref[0]
    ext_ref[0:1] = jnp.where(t > 0, xt_ref[0], 0.0)
    ext_ref[TH + 1:TH + 2] = jnp.where(t < n_t - 1, xb_ref[0], 0.0)
    ext = ext_ref[...]                                          # (TH+2, W, Cin) f32

    # ---- kw = 0 / 2 column shifts via XLU roll + border mask ----
    col = lax.broadcasted_iota(jnp.int32, ext.shape, 1)
    left = jnp.where(col == 0, 0.0, pltpu.roll(ext, 1, 1))       # uses in[:, j-1]
    right = jnp.where(col == W - 1, 0.0, pltpu.roll(ext, W - 1, 1))  # uses in[:, j+1]
    shifted = (left, ext, right)                                 # kw = 0, 1, 2

    # ---- im2col: 9 static-slice stores into a bf16 slab, one MXU matmul ----
    for kh in range(3):
        for kw in range(3):
            c0 = (kh * 3 + kw) * Cin
            tap = shifted[kw][kh:kh + TH].reshape(TH * W, Cin)
            slab_ref[:, c0:c0 + Cin] = tap.astype(jnp.bfloat16)

    acc = jnp.dot(slab_ref[...], w_ref[...],
                  preferred_element_type=jnp.float32)            # (TH*W, CP) f32
    acc = acc + b_ref[...]

    # bf16 intermediate store (halves the HBM round-trip of the hot tensor).
    out_ref[...] = acc.reshape(1, TH, W, CP).astype(out_ref.dtype)

    # GroupNorm(1) per-lane partials: row reduction only, no cross-lane reduce.
    # Padded channels are exactly zero (zero weight columns / bias).
    ssum_ref[...] = jnp.sum(acc, axis=0).reshape(1, 1, 1, CP)
    ssq_ref[...] = jnp.sum(acc * acc, axis=0).reshape(1, 1, 1, CP)


def _gn_relu_kernel(y_ref, scale_ref, shift_ref, o_ref):
    """Fused GroupNorm normalize + affine + ReLU on a flat lane-dense block."""
    y = y_ref[...].astype(jnp.float32)                           # bf16 -> f32
    o_ref[...] = jnp.maximum(y * scale_ref[...] + shift_ref[...], 0.0
                             ).astype(o_ref.dtype)


# --------------------------------------------------------------------------- #
# Wrappers
# --------------------------------------------------------------------------- #
def _largest_divisor_leq(n, target):
    t = max(1, min(int(target), n))
    while n % t:
        t -= 1
    return t


def _auto_tile_h(H, W, cin, cp, budget_bytes):
    # Rough per-row VMEM bytes: double-buffered f32 input + bf16 output tiles,
    # halo-extended f32 scratch, bf16 im2col slab, f32 accumulator.
    per_row = W * (2 * 4 * cin + 2 * 2 * cp + 4 * cin + 2 * 9 * cin + 4 * cp)
    return _largest_divisor_leq(H, budget_bytes // max(per_row, 1))


def _pack_stage_params(w, b, gamma, beta, cin_total):
    """Pad output channels to a lane-dense multiple of 128 and input channels to
    the actual (possibly already padded) channel count of the stage input."""
    kh, kw, cin, cout = w.shape
    cp = ((cout + _LANE - 1) // _LANE) * _LANE
    w_p = jnp.zeros((kh, kw, cin_total, cp), jnp.float32)
    w_p = w_p.at[:, :, :cin, :cout].set(w.astype(jnp.float32))
    w_flat = w_p.reshape(kh * kw * cin_total, cp).astype(jnp.bfloat16)
    b_p = jnp.zeros((1, cp), jnp.float32).at[0, :cout].set(b)
    g_p = jnp.zeros((cp,), jnp.float32).at[:cout].set(gamma)
    beta_p = jnp.zeros((cp,), jnp.float32).at[:cout].set(beta)
    return w_flat, b_p, g_p, beta_p


def conv3x3_gn_relu(x_nhwc, w, b, gamma, beta, *, tile_h=None,
                    vmem_budget_bytes=6 << 20,
                    vmem_limit_bytes=48 * 1024 * 1024):
    """One stage: conv3x3 (stride 1, pad 1) + GroupNorm(1, Cout) + ReLU.

    x_nhwc: (B, H, W, Cin) f32 (Cin may already be lane-padded; extra channels
            must be zero).  Returns (B, H, W, CP) f32, CP = Cout rounded up to
            128, padded channels exactly 0.
    """
    B, H, W, cin_total = x_nhwc.shape
    out_c = w.shape[-1]
    w_flat, b_p, g_p, beta_p = _pack_stage_params(w, b, gamma, beta, cin_total)
    K, CP = w_flat.shape

    if tile_h is None:
        TH = _auto_tile_h(H, W, cin_total, CP, vmem_budget_bytes)
    else:
        TH = _largest_divisor_leq(H, tile_h)
    nT = H // TH

    cparams = pltpu.CompilerParams(
        dimension_semantics=("parallel", "parallel"),
        vmem_limit_bytes=vmem_limit_bytes)

    conv_out, s_sum, s_sq = pl.pallas_call(
        _conv_stage_kernel,
        out_shape=(
            jax.ShapeDtypeStruct((B, H, W, CP), jnp.bfloat16),   # bf16 intermediate
            jax.ShapeDtypeStruct((B, nT, 1, CP), jnp.float32),
            jax.ShapeDtypeStruct((B, nT, 1, CP), jnp.float32)),
        grid_spec=pltpu.PrefetchScalarGridSpec(
            num_scalar_prefetch=0,
            grid=(B, nT),
            in_specs=[
                # core rows of the tile
                pl.BlockSpec((1, TH, W, cin_total), lambda bi, ti: (bi, ti, 0, 0)),
                # halo rows above / below (clamped at sample borders; masked in-kernel)
                pl.BlockSpec((1, 1, W, cin_total),
                             lambda bi, ti: (bi, jnp.maximum(ti * TH - 1, 0), 0, 0)),
                pl.BlockSpec((1, 1, W, cin_total),
                             lambda bi, ti: (bi, jnp.minimum((ti + 1) * TH, H - 1), 0, 0)),
                pl.BlockSpec((K, CP), lambda bi, ti: (0, 0)),
                pl.BlockSpec((1, CP), lambda bi, ti: (0, 0)),
            ],
            out_specs=[
                pl.BlockSpec((1, TH, W, CP), lambda bi, ti: (bi, ti, 0, 0)),
                pl.BlockSpec((1, 1, 1, CP), lambda bi, ti: (bi, ti, 0, 0)),
                pl.BlockSpec((1, 1, 1, CP), lambda bi, ti: (bi, ti, 0, 0)),
            ],
            scratch_shapes=[
                pltpu.VMEM((TH + 2, W, cin_total), jnp.float32),   # halo-extended tile
                pltpu.VMEM((TH * W, K), jnp.bfloat16),             # im2col slab
            ]),
        compiler_params=cparams,
    )(x_nhwc, x_nhwc, x_nhwc, w_flat, b_p)

    # ---- finalize GroupNorm(1) statistics (tiny per-sample work in the wrapper).
    # Per-channel within/between variance decomposition: exact, and numerically
    # far more robust than the raw one-pass E[x^2]-E[x]^2 over all elements.
    hw = H * W
    s_lane = jnp.sum(s_sum, axis=(1, 2))                         # (B, CP)
    q_lane = jnp.sum(s_sq, axis=(1, 2))                          # (B, CP)
    m_lane = s_lane / hw                                         # per-channel mean
    mu = jnp.sum(s_lane, axis=1) / (hw * out_c)                  # (B,)
    lane_mask = (jnp.arange(CP) < out_c).astype(jnp.float32)
    var_within = (q_lane / hw - m_lane * m_lane) * lane_mask[None, :]
    var_between = (m_lane - mu[:, None]) ** 2 * lane_mask[None, :]
    var = (jnp.sum(var_within, axis=1) + jnp.sum(var_between, axis=1)) / out_c
    inv = lax.rsqrt(var + 1e-5)
    scale = (g_p[None, :] * inv[:, None]).reshape(B, 1, CP)
    shift = (beta_p[None, :] - mu[:, None] * g_p[None, :] * inv[:, None]
             ).reshape(B, 1, CP)

    # ---- fused normalize + affine + ReLU on a flat lane-dense view ----
    R = _largest_divisor_leq(hw, 4096)
    if R % 8 and R != hw:
        R = hw                                                   # safe fallback
    y = pl.pallas_call(
        _gn_relu_kernel,
        out_shape=jax.ShapeDtypeStruct((B, hw, CP), jnp.float32),
        grid_spec=pltpu.PrefetchScalarGridSpec(
            num_scalar_prefetch=0,
            grid=(B, hw // R),
            in_specs=[
                pl.BlockSpec((1, R, CP), lambda bi, ri: (bi, ri, 0)),
                pl.BlockSpec((1, 1, CP), lambda bi, ri: (bi, 0, 0)),
                pl.BlockSpec((1, 1, CP), lambda bi, ri: (bi, 0, 0)),
            ],
            out_specs=pl.BlockSpec((1, R, CP), lambda bi, ri: (bi, ri, 0))),
        compiler_params=cparams,
    )(conv_out.reshape(B, hw, CP), scale, shift)
    return y.reshape(B, H, W, CP)


def double_conv(x_nchw, params, *, tile_h=None):
    """Matches DoubleConv.forward: returns (concate, x), both NCHW f32."""
    out_c = params["w1"].shape[-1]
    # NCHW <-> NHWC transposes kept to preserve the torch interface.
    x = jnp.transpose(x_nchw, (0, 2, 3, 1))
    y1 = conv3x3_gn_relu(x, params["w1"], params["b1"],
                         params["g1"], params["beta1"], tile_h=tile_h)
    # Stage 2 consumes the lane-dense CP tensor directly (no slice copy).
    y2 = conv3x3_gn_relu(y1, params["w2"], params["b2"],
                         params["g2"], params["beta2"], tile_h=tile_h)
    concate = jnp.transpose(y1[..., :out_c], (0, 3, 1, 2))
    out = jnp.transpose(y2[..., :out_c], (0, 3, 1, 2))
    return concate, out


def init_params(key, in_c, out_c):
    """Deterministic synthetic parameters (shapes follow the torch module)."""
    k1, k2, k3, k4 = jax.random.split(key, 4)
    bound1 = 1.0 / (in_c * 9) ** 0.5
    bound2 = 1.0 / (out_c * 9) ** 0.5
    return dict(
        w1=jax.random.uniform(k1, (3, 3, in_c, out_c), jnp.float32, -bound1, bound1),
        b1=jax.random.uniform(k2, (out_c,), jnp.float32, -bound1, bound1),
        g1=jnp.ones((out_c,), jnp.float32),
        beta1=jnp.zeros((out_c,), jnp.float32),
        w2=jax.random.uniform(k3, (3, 3, out_c, out_c), jnp.float32, -bound2, bound2),
        b2=jax.random.uniform(k4, (out_c,), jnp.float32, -bound2, bound2),
        g2=jnp.ones((out_c,), jnp.float32),
        beta2=jnp.zeros((out_c,), jnp.float32),
    )


# ---- pure-JAX reference (mirrors bf16 MXU operands + bf16 conv intermediate) --
def _ref_stage(x_nhwc, w, b, gamma, beta):
    y32 = lax.conv_general_dilated(
        x_nhwc.astype(jnp.bfloat16), w.astype(jnp.bfloat16),
        window_strides=(1, 1), padding=((1, 1), (1, 1)),
        dimension_numbers=("NHWC", "HWIO", "NHWC"),
        preferred_element_type=jnp.float32)
    y32 = y32 + b[None, None, None, :]
    mean = jnp.mean(y32, axis=(1, 2, 3), keepdims=True)          # stats from f32
    var = jnp.mean((y32 - mean) ** 2, axis=(1, 2, 3), keepdims=True)
    y = y32.astype(jnp.bfloat16).astype(jnp.float32)             # bf16 round trip
    y = (y - mean) * lax.rsqrt(var + 1e-5)
    y = y * gamma[None, None, None, :] + beta[None, None, None, :]
    return jnp.maximum(y, 0.0)


def double_conv_ref(x_nchw, p):
    x = jnp.transpose(x_nchw, (0, 2, 3, 1))
    y1 = _ref_stage(x, p["w1"], p["b1"], p["g1"], p["beta1"])
    y2 = _ref_stage(y1, p["w2"], p["b2"], p["g2"], p["beta2"])
    return jnp.transpose(y1, (0, 3, 1, 2)), jnp.transpose(y2, (0, 3, 1, 2))


if __name__ == "__main__":
    key = jax.random.PRNGKey(0)
    kx, kp = jax.random.split(key)

    B, in_c, out_c, H, W = 2, 4, 8, 16, 16
    x = jax.random.normal(kx, (B, in_c, H, W), jnp.float32)      # NCHW like torch
    params = init_params(kp, in_c, out_c)

    ref_concate, ref_out = double_conv_ref(x, params)

    # Default (auto tile_h -> single H-tile at this size).
    concate, out = jax.jit(double_conv)(x, params)
    jax.block_until_ready((concate, out))
    assert concate.shape == (B, out_c, H, W)
    assert out.shape == (B, out_c, H, W)
    assert jnp.allclose(concate, ref_concate, atol=2e-2, rtol=2e-2), \
        float(jnp.max(jnp.abs(concate - ref_concate)))
    assert jnp.allclose(out, ref_out, atol=2e-2, rtol=2e-2), \
        float(jnp.max(jnp.abs(out - ref_out)))

    # Force multiple H-tiles to exercise the halo + stats-combine path.
    concate_t, out_t = jax.jit(functools.partial(double_conv, tile_h=4))(x, params)
    jax.block_until_ready((concate_t, out_t))
    assert jnp.allclose(concate_t, ref_concate, atol=2e-2, rtol=2e-2), \
        float(jnp.max(jnp.abs(concate_t - ref_concate)))
    assert jnp.allclose(out_t, ref_out, atol=2e-2, rtol=2e-2), \
        float(jnp.max(jnp.abs(out_t - ref_out)))

    print("KERNEL_OK")
</pallas_src>

<mosaic_0001>
module attributes {stable_mosaic.version = 11 : i64} {
  func.func @_gn_relu_kernel(%arg0: i32, %arg1: i32, %arg2: memref<1x256x128xbf16, #tpu.memory_space<vmem>>, %arg3: memref<1x1x128xf32, #tpu.memory_space<vmem>>, %arg4: memref<1x1x128xf32, #tpu.memory_space<vmem>>, %arg5: memref<1x256x128xf32, #tpu.memory_space<vmem>>) attributes {dimension_semantics = [#tpu.dimension_semantics<parallel>, #tpu.dimension_semantics<parallel>], iteration_bounds = array<i64: 2, 1>, scalar_prefetch = 0 : i64, scratch_operands = 0 : i64, tpu.core_type = #tpu.core_type<tc>, window_params = [{transform_indices = @transform_0, window_bounds = array<i64: 1, 256, 128>}, {transform_indices = @transform_1, window_bounds = array<i64: 1, 1, 128>}, {transform_indices = @transform_2, window_bounds = array<i64: 1, 1, 128>}, {transform_indices = @transform_3, window_bounds = array<i64: 1, 256, 128>}]} {
    %c0 = arith.constant 0 : index
    %c0_0 = arith.constant 0 : index
    %c0_1 = arith.constant 0 : index
    %0 = vector.load %arg2[%c0, %c0_0, %c0_1] : memref<1x256x128xbf16, #tpu.memory_space<vmem>>, vector<1x256x128xbf16>
    %1 = arith.extf %0 : vector<1x256x128xbf16> to vector<1x256x128xf32>
    %c0_2 = arith.constant 0 : index
    %c0_3 = arith.constant 0 : index
    %c0_4 = arith.constant 0 : index
    %2 = vector.load %arg3[%c0_2, %c0_3, %c0_4] : memref<1x1x128xf32, #tpu.memory_space<vmem>>, vector<1x1x128xf32>
    %3 = vector.broadcast %2 : vector<1x1x128xf32> to vector<1x256x128xf32>
    %4 = arith.mulf %1, %3 : vector<1x256x128xf32>
    %c0_5 = arith.constant 0 : index
    %c0_6 = arith.constant 0 : index
    %c0_7 = arith.constant 0 : index
    %5 = vector.load %arg4[%c0_5, %c0_6, %c0_7] : memref<1x1x128xf32, #tpu.memory_space<vmem>>, vector<1x1x128xf32>
    %6 = vector.broadcast %5 : vector<1x1x128xf32> to vector<1x256x128xf32>
    %7 = arith.addf %4, %6 : vector<1x256x128xf32>
    %cst = arith.constant 0.000000e+00 : f32
    %8 = vector.broadcast %cst : f32 to vector<1x256x128xf32>
    %9 = arith.maximumf %7, %8 : vector<1x256x128xf32>
    %c0_8 = arith.constant 0 : index
    %c0_9 = arith.constant 0 : index
    %c0_10 = arith.constant 0 : index
    %10 = vector.load %arg5[%c0_8, %c0_9, %c0_10] : memref<1x256x128xf32, #tpu.memory_space<vmem>>, vector<1x256x128xf32>
    tpu.vector_store %arg5[%c0_8, %c0_9, %c0_10], %9 {strides = array<i32>} : memref<1x256x128xf32, #tpu.memory_space<vmem>>, vector<1x256x128xf32>,
    return
  }
  func.func @transform_0(%arg0: i32, %arg1: i32) -> (i32, i32, i32) {
    %c0_i32 = arith.constant 0 : i32
    %c0_i32_0 = arith.constant 0 : i32
    return %arg0, %arg1, %c0_i32 : i32, i32, i32
  }
  func.func @transform_1(%arg0: i32, %arg1: i32) -> (i32, i32, i32) {
    %c0_i32 = arith.constant 0 : i32
    %c0_i32_0 = arith.constant 0 : i32
    %c0_i32_1 = arith.constant 0 : i32
    return %arg0, %c0_i32, %c0_i32_0 : i32, i32, i32
  }
  func.func @transform_2(%arg0: i32, %arg1: i32) -> (i32, i32, i32) {
    %c0_i32 = arith.constant 0 : i32
    %c0_i32_0 = arith.constant 0 : i32
    %c0_i32_1 = arith.constant 0 : i32
    return %arg0, %c0_i32, %c0_i32_0 : i32, i32, i32
  }
  func.func @transform_3(%arg0: i32, %arg1: i32) -> (i32, i32, i32) {
    %c0_i32 = arith.constant 0 : i32
    %c0_i32_0 = arith.constant 0 : i32
    return %arg0, %arg1, %c0_i32 : i32, i32, i32
  }
}

module attributes {stable_mosaic.version = 11 : i64} {
  func.func @_conv_stage_kernel(%arg0: i32, %arg1: i32, %arg2: memref<1x16x16x4xf32, #tpu.memory_space<vmem>>, %arg3: memref<1x1x16x4xf32, #tpu.memory_space<vmem>>, %arg4: memref<1x1x16x4xf32, #tpu.memory_space<vmem>>, %arg5: memref<36x128xbf16, #tpu.memory_space<vmem>>, %arg6: memref<1x128xf32, #tpu.memory_space<vmem>>, %arg7: memref<1x16x16x128xbf16, #tpu.memory_space<vmem>>, %arg8: memref<1x1x1x128xf32, #tpu.memory_space<vmem>>, %arg9: memref<1x1x1x128xf32, #tpu.memory_space<vmem>>, %arg10: memref<18x16x4xf32, #tpu.memory_space<vmem>>, %arg11: memref<256x36xbf16, #tpu.memory_space<vmem>>) attributes {dimension_semantics = [#tpu.dimension_semantics<parallel>, #tpu.dimension_semantics<parallel>], iteration_bounds = array<i64: 2, 1>, scalar_prefetch = 0 : i64, scratch_operands = 2 : i64, tpu.core_type = #tpu.core_type<tc>, window_params = [{transform_indices = @transform_0, window_bounds = array<i64: 1, 16, 16, 4>}, {transform_indices = @transform_1, window_bounds = array<i64: 1, 1, 16, 4>}, {transform_indices = @transform_2, window_bounds = array<i64: 1, 1, 16, 4>}, {pipeline_mode = #tpu.pipeline_mode<synchronous>, transform_indices = @transform_3, window_bounds = array<i64: 36, 128>}, {pipeline_mode = #tpu.pipeline_mode<synchronous>, transform_indices = @transform_4, window_bounds = array<i64: 1, 128>}, {transform_indices = @transform_5, window_bounds = array<i64: 1, 16, 16, 128>}, {transform_indices = @transform_6, window_bounds = array<i64: 1, 1, 1, 128>}, {transform_indices = @transform_7, window_bounds = array<i64: 1, 1, 1, 128>}]} {
    %c0 = arith.constant 0 : index
    %c0_0 = arith.constant 0 : index
    %c0_1 = arith.constant 0 : index
    %c0_2 = arith.constant 0 : index
    %0 = vector.load %arg2[%c0, %c0_0, %c0_1, %c0_2] : memref<1x16x16x4xf32, #tpu.memory_space<vmem>>, vector<1x16x16x4xf32>
    %1 = vector.shape_cast %0 : vector<1x16x16x4xf32> to vector<16x16x4xf32>
    %c1 = arith.constant 1 : index
    %c0_3 = arith.constant 0 : index
    %c0_4 = arith.constant 0 : index
    %2 = vector.load %arg10[%c1, %c0_3, %c0_4] : memref<18x16x4xf32, #tpu.memory_space<vmem>>, vector<16x16x4xf32>
    tpu.vector_store %arg10[%c1, %c0_3, %c0_4], %1 {strides = array<i32>} : memref<18x16x4xf32, #tpu.memory_space<vmem>>, vector<16x16x4xf32>,
    %c0_i32 = arith.constant 0 : i32
    %3 = arith.cmpi sgt, %arg1, %c0_i32 : i32
    %c0_5 = arith.constant 0 : index
    %c0_6 = arith.constant 0 : index
    %c0_7 = arith.constant 0 : index
    %c0_8 = arith.constant 0 : index
    %4 = vector.load %arg3[%c0_5, %c0_6, %c0_7, %c0_8] : memref<1x1x16x4xf32, #tpu.memory_space<vmem>>, vector<1x1x16x4xf32>
    %5 = vector.shape_cast %4 : vector<1x1x16x4xf32> to vector<1x16x4xf32>
    %cst = arith.constant 0.000000e+00 : f32
    %6 = vector.broadcast %cst : f32 to vector<1x16x4xf32>
    %7 = arith.select %3, %5, %6 : vector<1x16x4xf32>
    %c0_9 = arith.constant 0 : index
    %c0_10 = arith.constant 0 : index
    %c0_11 = arith.constant 0 : index
    %8 = vector.load %arg10[%c0_9, %c0_10, %c0_11] : memref<18x16x4xf32, #tpu.memory_space<vmem>>, vector<1x16x4xf32>
    tpu.vector_store %arg10[%c0_9, %c0_10, %c0_11], %7 {strides = array<i32>} : memref<18x16x4xf32, #tpu.memory_space<vmem>>, vector<1x16x4xf32>,
    %c0_i32_12 = arith.constant 0 : i32
    %9 = arith.cmpi slt, %arg1, %c0_i32_12 : i32
    %c0_13 = arith.constant 0 : index
    %c0_14 = arith.constant 0 : index
    %c0_15 = arith.constant 0 : index
    %c0_16 = arith.constant 0 : index
    %10 = vector.load %arg4[%c0_13, %c0_14, %c0_15, %c0_16] : memref<1x1x16x4xf32, #tpu.memory_space<vmem>>, vector<1x1x16x4xf32>
    %11 = vector.shape_cast %10 : vector<1x1x16x4xf32> to vector<1x16x4xf32>
    %cst_17 = arith.constant 0.000000e+00 : f32
    %12 = vector.broadcast %cst_17 : f32 to vector<1x16x4xf32>
    %13 = arith.select %9, %11, %12 : vector<1x16x4xf32>
    %c17 = arith.constant 17 : index
    %c0_18 = arith.constant 0 : index
    %c0_19 = arith.constant 0 : index
    %14 = vector.load %arg10[%c17, %c0_18, %c0_19] : memref<18x16x4xf32, #tpu.memory_space<vmem>>, vector<1x16x4xf32>
    tpu.vector_store %arg10[%c17, %c0_18, %c0_19], %13 {strides = array<i32>} : memref<18x16x4xf32, #tpu.memory_space<vmem>>, vector<1x16x4xf32>,
    %c0_20 = arith.constant 0 : index
    %c0_21 = arith.constant 0 : index
    %c0_22 = arith.constant 0 : index
    %15 = vector.load %arg10[%c0_20, %c0_21, %c0_22] : memref<18x16x4xf32, #tpu.memory_space<vmem>>, vector<18x16x4xf32>
    %16 = tpu.iota {dimensions = array<i32: 1>} : vector<18x16x4xi32>
    %c0_i32_23 = arith.constant 0 : i32
    %17 = vector.broadcast %c0_i32_23 : i32 to vector<18x16x4xi32>
    %18 = arith.cmpi eq, %16, %17 : vector<18x16x4xi32>
    %c1_i32 = arith.constant 1 : i32
    %19 = tpu.dynamic_rotate %15 by %c1_i32 dim 1 : vector<18x16x4xf32>, i32 -> vector<18x16x4xf32>
    %cst_24 = arith.constant 0.000000e+00 : f32
    %20 = vector.broadcast %cst_24 : f32 to vector<18x16x4xf32>
    %21 = arith.select %18, %20, %19 : vector<18x16x4xi1>, vector<18x16x4xf32>
    %c15_i32 = arith.constant 15 : i32
    %22 = vector.broadcast %c15_i32 : i32 to vector<18x16x4xi32>
    %23 = arith.cmpi eq, %16, %22 : vector<18x16x4xi32>
    %c15_i32_25 = arith.constant 15 : i32
    %24 = tpu.dynamic_rotate %15 by %c15_i32_25 dim 1 : vector<18x16x4xf32>, i32 -> vector<18x16x4xf32>
    %cst_26 = arith.constant 0.000000e+00 : f32
    %25 = vector.broadcast %cst_26 : f32 to vector<18x16x4xf32>
    %26 = arith.select %23, %25, %24 : vector<18x16x4xi1>, vector<18x16x4xf32>
    %27 = vector.extract_strided_slice %21 {offsets = [0, 0, 0], sizes = [16, 16, 4], strides = [1, 1, 1]} : vector<18x16x4xf32> to vector<16x16x4xf32>
    %28 = vector.shape_cast %27 : vector<16x16x4xf32> to vector<256x4xf32>
    %29 = arith.truncf %28 : vector<256x4xf32> to vector<256x4xbf16>
    %c0_27 = arith.constant 0 : index
    %c0_28 = arith.constant 0 : index
    %30 = vector.load %arg11[%c0_27, %c0_28] : memref<256x36xbf16, #tpu.memory_space<vmem>>, vector<256x4xbf16>
    tpu.vector_store %arg11[%c0_27, %c0_28], %29 {strides = array<i32>} : memref<256x36xbf16, #tpu.memory_space<vmem>>, vector<256x4xbf16>,
    %31 = vector.extract_strided_slice %15 {offsets = [0, 0, 0], sizes = [16, 16, 4], strides = [1, 1, 1]} : vector<18x16x4xf32> to vector<16x16x4xf32>
    %32 = vector.shape_cast %31 : vector<16x16x4xf32> to vector<256x4xf32>
    %33 = arith.truncf %32 : vector<256x4xf32> to vector<256x4xbf16>
    %c0_29 = arith.constant 0 : index
    %c4 = arith.constant 4 : index
    %34 = vector.load %arg11[%c0_29, %c4] : memref<256x36xbf16, #tpu.memory_space<vmem>>, vector<256x4xbf16>
    tpu.vector_store %arg11[%c0_29, %c4], %33 {strides = array<i32>} : memref<256x36xbf16, #tpu.memory_space<vmem>>, vector<256x4xbf16>,
    %35 = vector.extract_strided_slice %26 {offsets = [0, 0, 0], sizes = [16, 16, 4], strides = [1, 1, 1]} : vector<18x16x4xf32> to vector<16x16x4xf32>
    %36 = vector.shape_cast %35 : vector<16x16x4xf32> to vector<256x4xf32>
    %37 = arith.truncf %36 : vector<256x4xf32> to vector<256x4xbf16>
    %c0_30 = arith.constant 0 : index
    %c8 = arith.constant 8 : index
    %38 = vector.load %arg11[%c0_30, %c8] : memref<256x36xbf16, #tpu.memory_space<vmem>>, vector<256x4xbf16>
    tpu.vector_store %arg11[%c0_30, %c8], %37 {strides = array<i32>} : memref<256x36xbf16, #tpu.memory_space<vmem>>, vector<256x4xbf16>,
    %39 = vector.extract_strided_slice %21 {offsets = [1, 0, 0], sizes = [16, 16, 4], strides = [1, 1, 1]} : vector<18x16x4xf32> to vector<16x16x4xf32>
    %40 = vector.shape_cast %39 : vector<16x16x4xf32> to vector<256x4xf32>
    %41 = arith.truncf %40 : vector<256x4xf32> to vector<256x4xbf16>
    %c0_31 = arith.constant 0 : index
    %c12 = arith.constant 12 : index
    %42 = vector.load %arg11[%c0_31, %c12] : memref<256x36xbf16, #tpu.memory_space<vmem>>, vector<256x4xbf16>
    tpu.vector_store %arg11[%c0_31, %c12], %41 {strides = array<i32>} : memref<256x36xbf16, #tpu.memory_space<vmem>>, vector<256x4xbf16>,
    %43 = vector.extract_strided_slice %15 {offsets = [1, 0, 0], sizes = [16, 16, 4], strides = [1, 1, 1]} : vector<18x16x4xf32> to vector<16x16x4xf32>
    %44 = vector.shape_cast %43 : vector<16x16x4xf32> to vector<256x4xf32>
    %45 = arith.truncf %44 : vector<256x4xf32> to vector<256x4xbf16>
    %c0_32 = arith.constant 0 : index
    %c16 = arith.constant 16 : index
    %46 = vector.load %arg11[%c0_32, %c16] : memref<256x36xbf16, #tpu.memory_space<vmem>>, vector<256x4xbf16>
    tpu.vector_store %arg11[%c0_32, %c16], %45 {strides = array<i32>} : memref<256x36xbf16, #tpu.memory_space<vmem>>, vector<256x4xbf16>,
    %47 = vector.extract_strided_slice %26 {offsets = [1, 0, 0], sizes = [16, 16, 4], strides = [1, 1, 1]} : vector<18x16x4xf32> to vector<16x16x4xf32>
    %48 = vector.shape_cast %47 : vector<16x16x4xf32> to vector<256x4xf32>
    %49 = arith.truncf %48 : vector<256x4xf32> to vector<256x4xbf16>
    %c0_33 = arith.constant 0 : index
    %c20 = arith.constant 20 : index
    %50 = vector.load %arg11[%c0_33, %c20] : memref<256x36xbf16, #tpu.memory_space<vmem>>, vector<256x4xbf16>
    tpu.vector_store %arg11[%c0_33, %c20], %49 {strides = array<i32>} : memref<256x36xbf16, #tpu.memory_space<vmem>>, vector<256x4xbf16>,
    %51 = vector.extract_strided_slice %21 {offsets = [2, 0, 0], sizes = [16, 16, 4], strides = [1, 1, 1]} : vector<18x16x4xf32> to vector<16x16x4xf32>
    %52 = vector.shape_cast %51 : vector<16x16x4xf32> to vector<256x4xf32>
    %53 = arith.truncf %52 : vector<256x4xf32> to vector<256x4xbf16>
    %c0_34 = arith.constant 0 : index
    %c24 = arith.constant 24 : index
    %54 = vector.load %arg11[%c0_34, %c24] : memref<256x36xbf16, #tpu.memory_space<vmem>>, vector<256x4xbf16>
    tpu.vector_store %arg11[%c0_34, %c24], %53 {strides = array<i32>} : memref<256x36xbf16, #tpu.memory_space<vmem>>, vector<256x4xbf16>,
    %55 = vector.extract_strided_slice %15 {offsets = [2, 0, 0], sizes = [16, 16, 4], strides = [1, 1, 1]} : vector<18x16x4xf32> to vector<16x16x4xf32>
    %56 = vector.shape_cast %55 : vector<16x16x4xf32> to vector<256x4xf32>
    %57 = arith.truncf %56 : vector<256x4xf32> to vector<256x4xbf16>
    %c0_35 = arith.constant 0 : index
    %c28 = arith.constant 28 : index
    %58 = vector.load %arg11[%c0_35, %c28] : memref<256x36xbf16, #tpu.memory_space<vmem>>, vector<256x4xbf16>
    tpu.vector_store %arg11[%c0_35, %c28], %57 {strides = array<i32>} : memref<256x36xbf16, #tpu.memory_space<vmem>>, vector<256x4xbf16>,
    %59 = vector.extract_strided_slice %26 {offsets = [2, 0, 0], sizes = [16, 16, 4], strides = [1, 1, 1]} : vector<18x16x4xf32> to vector<16x16x4xf32>
    %60 = vector.shape_cast %59 : vector<16x16x4xf32> to vector<256x4xf32>
    %61 = arith.truncf %60 : vector<256x4xf32> to vector<256x4xbf16>
    %c0_36 = arith.constant 0 : index
    %c32 = arith.constant 32 : index
    %62 = vector.load %arg11[%c0_36, %c32] : memref<256x36xbf16, #tpu.memory_space<vmem>>, vector<256x4xbf16>
    tpu.vector_store %arg11[%c0_36, %c32], %61 {strides = array<i32>} : memref<256x36xbf16, #tpu.memory_space<vmem>>, vector<256x4xbf16>,
    %c0_37 = arith.constant 0 : index
    %c0_38 = arith.constant 0 : index
    %63 = vector.load %arg11[%c0_37, %c0_38] : memref<256x36xbf16, #tpu.memory_space<vmem>>, vector<256x36xbf16>
    %c0_39 = arith.constant 0 : index
    %c0_40 = arith.constant 0 : index
    %64 = vector.load %arg5[%c0_39, %c0_40] : memref<36x128xbf16, #tpu.memory_space<vmem>>, vector<36x128xbf16>
    %cst_41 = arith.constant dense<0.000000e+00> : vector<256x128xf32>
    %65 = tpu.matmul %63, %64, %cst_41 {dimension_numbers = #tpu.dot_dimension_numbers<[1], [0], [0], [1], [0, 0, 1, 1], [], []>} : vector<256x36xbf16>, vector<36x128xbf16>, vector<256x128xf32> -> vector<256x128xf32>
    %c0_42 = arith.constant 0 : index
    %c0_43 = arith.constant 0 : index
    %66 = vector.load %arg6[%c0_42, %c0_43] : memref<1x128xf32, #tpu.memory_space<vmem>>, vector<1x128xf32>
    %67 = vector.broadcast %66 : vector<1x128xf32> to vector<256x128xf32>
    %68 = arith.addf %65, %67 : vector<256x128xf32>
    %69 = vector.shape_cast %68 : vector<256x128xf32> to vector<1x16x16x128xf32>
    %70 = arith.truncf %69 : vector<1x16x16x128xf32> to vector<1x16x16x128xbf16>
    %c0_44 = arith.constant 0 : index
    %c0_45 = arith.constant 0 : index
    %c0_46 = arith.constant 0 : index
    %c0_47 = arith.constant 0 : index
    %71 = vector.load %arg7[%c0_44, %c0_45, %c0_46, %c0_47] : memref<1x16x16x128xbf16, #tpu.memory_space<vmem>>, vector<1x16x16x128xbf16>
    tpu.vector_store %arg7[%c0_44, %c0_45, %c0_46, %c0_47], %70 {strides = array<i32>} : memref<1x16x16x128xbf16, #tpu.memory_space<vmem>>, vector<1x16x16x128xbf16>,
    %cst_48 = arith.constant dense<0.000000e+00> : vector<128xf32>
    %72 = vector.multi_reduction <add>, %68, %cst_48 [0] : vector<256x128xf32> to vector<128xf32>
    %73 = vector.shape_cast %72 : vector<128xf32> to vector<1x1x1x128xf32>
    %c0_49 = arith.constant 0 : index
    %c0_50 = arith.constant 0 : index
    %c0_51 = arith.constant 0 : index
    %c0_52 = arith.constant 0 : index
    %74 = vector.load %arg8[%c0_49, %c0_50, %c0_51, %c0_52] : memref<1x1x1x128xf32, #tpu.memory_space<vmem>>, vector<1x1x1x128xf32>
    tpu.vector_store %arg8[%c0_49, %c0_50, %c0_51, %c0_52], %73 {strides = array<i32>} : memref<1x1x1x128xf32, #tpu.memory_space<vmem>>, vector<1x1x1x128xf32>,
    %75 = arith.mulf %68, %68 : vector<256x128xf32>
    %cst_53 = arith.constant dense<0.000000e+00> : vector<128xf32>
    %76 = vector.multi_reduction <add>, %75, %cst_53 [0] : vector<256x128xf32> to vector<128xf32>
    %77 = vector.shape_cast %76 : vector<128xf32> to vector<1x1x1x128xf32>
    %c0_54 = arith.constant 0 : index
    %c0_55 = arith.constant 0 : index
    %c0_56 = arith.constant 0 : index
    %c0_57 = arith.constant 0 : index
    %78 = vector.load %arg9[%c0_54, %c0_55, %c0_56, %c0_57] : memref<1x1x1x128xf32, #tpu.memory_space<vmem>>, vector<1x1x1x128xf32>
    tpu.vector_store %arg9[%c0_54, %c0_55, %c0_56, %c0_57], %77 {strides = array<i32>} : memref<1x1x1x128xf32, #tpu.memory_space<vmem>>, vector<1x1x1x128xf32>,
    return
  }
  func.func @transform_0(%arg0: i32, %arg1: i32) -> (i32, i32, i32, i32) {
    %c0_i32 = arith.constant 0 : i32
    %c0_i32_0 = arith.constant 0 : i32
    %c0_i32_1 = arith.constant 0 : i32
    return %arg0, %arg1, %c0_i32, %c0_i32_0 : i32, i32, i32, i32
  }
  func.func @transform_1(%arg0: i32, %arg1: i32) -> (i32, i32, i32, i32) {
    %c16_i32 = arith.constant 16 : i32
    %0 = arith.muli %arg1, %c16_i32 : i32
    %c1_i32 = arith.constant 1 : i32
    %1 = arith.subi %0, %c1_i32 : i32
    %c0_i32 = arith.constant 0 : i32
    %2 = arith.maxsi %1, %c0_i32 : i32
    %c0_i32_0 = arith.constant 0 : i32
    %c0_i32_1 = arith.constant 0 : i32
    %c0_i32_2 = arith.constant 0 : i32
    return %arg0, %2, %c0_i32_0, %c0_i32_1 : i32, i32, i32, i32
  }
  func.func @transform_2(%arg0: i32, %arg1: i32) -> (i32, i32, i32, i32) {
    %c1_i32 = arith.constant 1 : i32
    %0 = arith.addi %arg1, %c1_i32 : i32
    %c16_i32 = arith.constant 16 : i32
    %1 = arith.muli %0, %c16_i32 : i32
    %c15_i32 = arith.constant 15 : i32
    %2 = arith.minsi %1, %c15_i32 : i32
    %c0_i32 = arith.constant 0 : i32
    %c0_i32_0 = arith.constant 0 : i32
    %c0_i32_1 = arith.constant 0 : i32
    return %arg0, %2, %c0_i32, %c0_i32_0 : i32, i32, i32, i32
  }
  func.func @transform_3(%arg0: i32, %arg1: i32) -> (i32, i32) {
    %c0_i32 = arith.constant 0 : i32
    %c0_i32_0 = arith.constant 0 : i32
    %c0_i32_1 = arith.constant 0 : i32
    return %c0_i32, %c0_i32_0 : i32, i32
  }
  func.func @transform_4(%arg0: i32, %arg1: i32) -> (i32, i32) {
    %c0_i32 = arith.constant 0 : i32
    %c0_i32_0 = arith.constant 0 : i32
    %c0_i32_1 = arith.constant 0 : i32
    return %c0_i32, %c0_i32_0 : i32, i32
  }
  func.func @transform_5(%arg0: i32, %arg1: i32) -> (i32, i32, i32, i32) {
    %c0_i32 = arith.constant 0 : i32
    %c0_i32_0 = arith.constant 0 : i32
    %c0_i32_1 = arith.constant 0 : i32
    return %arg0, %arg1, %c0_i32, %c0_i32_0 : i32, i32, i32, i32
  }
  func.func @transform_6(%arg0: i32, %arg1: i32) -> (i32, i32, i32, i32) {
    %c0_i32 = arith.constant 0 : i32
    %c0_i32_0 = arith.constant 0 : i32
    %c0_i32_1 = arith.constant 0 : i32
    return %arg0, %arg1, %c0_i32, %c0_i32_0 : i32, i32, i32, i32
  }
  func.func @transform_7(%arg0: i32, %arg1: i32) -> (i32, i32, i32, i32) {
    %c0_i32 = arith.constant 0 : i32
    %c0_i32_0 = arith.constant 0 : i32
    %c0_i32_1 = arith.constant 0 : i32
    return %arg0, %arg1, %c0_i32, %c0_i32_0 : i32, i32, i32, i32
  }
}

module attributes {stable_mosaic.version = 11 : i64} {
  func.func @_conv_stage_kernel(%arg0: i32, %arg1: i32, %arg2: memref<1x16x16x128xf32, #tpu.memory_space<vmem>>, %arg3: memref<1x1x16x128xf32, #tpu.memory_space<vmem>>, %arg4: memref<1x1x16x128xf32, #tpu.memory_space<vmem>>, %arg5: memref<1152x128xbf16, #tpu.memory_space<vmem>>, %arg6: memref<1x128xf32, #tpu.memory_space<vmem>>, %arg7: memref<1x16x16x128xbf16, #tpu.memory_space<vmem>>, %arg8: memref<1x1x1x128xf32, #tpu.memory_space<vmem>>, %arg9: memref<1x1x1x128xf32, #tpu.memory_space<vmem>>, %arg10: memref<18x16x128xf32, #tpu.memory_space<vmem>>, %arg11: memref<256x1152xbf16, #tpu.memory_space<vmem>>) attributes {dimension_semantics = [#tpu.dimension_semantics<parallel>, #tpu.dimension_semantics<parallel>], iteration_bounds = array<i64: 2, 1>, scalar_prefetch = 0 : i64, scratch_operands = 2 : i64, tpu.core_type = #tpu.core_type<tc>, window_params = [{transform_indices = @transform_0, window_bounds = array<i64: 1, 16, 16, 128>}, {transform_indices = @transform_1, window_bounds = array<i64: 1, 1, 16, 128>}, {transform_indices = @transform_2, window_bounds = array<i64: 1, 1, 16, 128>}, {pipeline_mode = #tpu.pipeline_mode<synchronous>, transform_indices = @transform_3, window_bounds = array<i64: 1152, 128>}, {pipeline_mode = #tpu.pipeline_mode<synchronous>, transform_indices = @transform_4, window_bounds = array<i64: 1, 128>}, {transform_indices = @transform_5, window_bounds = array<i64: 1, 16, 16, 128>}, {transform_indices = @transform_6, window_bounds = array<i64: 1, 1, 1, 128>}, {transform_indices = @transform_7, window_bounds = array<i64: 1, 1, 1, 128>}]} {
    %c0 = arith.constant 0 : index
    %c0_0 = arith.constant 0 : index
    %c0_1 = arith.constant 0 : index
    %c0_2 = arith.constant 0 : index
    %0 = vector.load %arg2[%c0, %c0_0, %c0_1, %c0_2] : memref<1x16x16x128xf32, #tpu.memory_space<vmem>>, vector<1x16x16x128xf32>
    %1 = vector.shape_cast %0 : vector<1x16x16x128xf32> to vector<16x16x128xf32>
    %c1 = arith.constant 1 : index
    %c0_3 = arith.constant 0 : index
    %c0_4 = arith.constant 0 : index
    %2 = vector.load %arg10[%c1, %c0_3, %c0_4] : memref<18x16x128xf32, #tpu.memory_space<vmem>>, vector<16x16x128xf32>
    tpu.vector_store %arg10[%c1, %c0_3, %c0_4], %1 {strides = array<i32>} : memref<18x16x128xf32, #tpu.memory_space<vmem>>, vector<16x16x128xf32>,
    %c0_i32 = arith.constant 0 : i32
    %3 = arith.cmpi sgt, %arg1, %c0_i32 : i32
    %c0_5 = arith.constant 0 : index
    %c0_6 = arith.constant 0 : index
    %c0_7 = arith.constant 0 : index
    %c0_8 = arith.constant 0 : index
    %4 = vector.load %arg3[%c0_5, %c0_6, %c0_7, %c0_8] : memref<1x1x16x128xf32, #tpu.memory_space<vmem>>, vector<1x1x16x128xf32>
    %5 = vector.shape_cast %4 : vector<1x1x16x128xf32> to vector<1x16x128xf32>
    %cst = arith.constant 0.000000e+00 : f32
    %6 = vector.broadcast %cst : f32 to vector<1x16x128xf32>
    %7 = arith.select %3, %5, %6 : vector<1x16x128xf32>
    %c0_9 = arith.constant 0 : index
    %c0_10 = arith.constant 0 : index
    %c0_11 = arith.constant 0 : index
    %8 = vector.load %arg10[%c0_9, %c0_10, %c0_11] : memref<18x16x128xf32, #tpu.memory_space<vmem>>, vector<1x16x128xf32>
    tpu.vector_store %arg10[%c0_9, %c0_10, %c0_11], %7 {strides = array<i32>} : memref<18x16x128xf32, #tpu.memory_space<vmem>>, vector<1x16x128xf32>,
    %c0_i32_12 = arith.constant 0 : i32
    %9 = arith.cmpi slt, %arg1, %c0_i32_12 : i32
    %c0_13 = arith.constant 0 : index
    %c0_14 = arith.constant 0 : index
    %c0_15 = arith.constant 0 : index
    %c0_16 = arith.constant 0 : index
    %10 = vector.load %arg4[%c0_13, %c0_14, %c0_15, %c0_16] : memref<1x1x16x128xf32, #tpu.memory_space<vmem>>, vector<1x1x16x128xf32>
    %11 = vector.shape_cast %10 : vector<1x1x16x128xf32> to vector<1x16x128xf32>
    %cst_17 = arith.constant 0.000000e+00 : f32
    %12 = vector.broadcast %cst_17 : f32 to vector<1x16x128xf32>
    %13 = arith.select %9, %11, %12 : vector<1x16x128xf32>
    %c17 = arith.constant 17 : index
    %c0_18 = arith.constant 0 : index
    %c0_19 = arith.constant 0 : index
    %14 = vector.load %arg10[%c17, %c0_18, %c0_19] : memref<18x16x128xf32, #tpu.memory_space<vmem>>, vector<1x16x128xf32>
    tpu.vector_store %arg10[%c17, %c0_18, %c0_19], %13 {strides = array<i32>} : memref<18x16x128xf32, #tpu.memory_space<vmem>>, vector<1x16x128xf32>,
    %c0_20 = arith.constant 0 : index
    %c0_21 = arith.constant 0 : index
    %c0_22 = arith.constant 0 : index
    %15 = vector.load %arg10[%c0_20, %c0_21, %c0_22] : memref<18x16x128xf32, #tpu.memory_space<vmem>>, vector<18x16x128xf32>
    %16 = tpu.iota {dimensions = array<i32: 1>} : vector<18x16x128xi32>
    %c0_i32_23 = arith.constant 0 : i32
    %17 = vector.broadcast %c0_i32_23 : i32 to vector<18x16x128xi32>
    %18 = arith.cmpi eq, %16, %17 : vector<18x16x128xi32>
    %c1_i32 = arith.constant 1 : i32
    %19 = tpu.dynamic_rotate %15 by %c1_i32 dim 1 : vector<18x16x128xf32>, i32 -> vector<18x16x128xf32>
    %cst_24 = arith.constant 0.000000e+00 : f32
    %20 = vector.broadcast %cst_24 : f32 to vector<18x16x128xf32>
    %21 = arith.select %18, %20, %19 : vector<18x16x128xi1>, vector<18x16x128xf32>
    %c15_i32 = arith.constant 15 : i32
    %22 = vector.broadcast %c15_i32 : i32 to vector<18x16x128xi32>
    %23 = arith.cmpi eq, %16, %22 : vector<18x16x128xi32>
    %c15_i32_25 = arith.constant 15 : i32
    %24 = tpu.dynamic_rotate %15 by %c15_i32_25 dim 1 : vector<18x16x128xf32>, i32 -> vector<18x16x128xf32>
    %cst_26 = arith.constant 0.000000e+00 : f32
    %25 = vector.broadcast %cst_26 : f32 to vector<18x16x128xf32>
    %26 = arith.select %23, %25, %24 : vector<18x16x128xi1>, vector<18x16x128xf32>
    %27 = vector.extract_strided_slice %21 {offsets = [0, 0, 0], sizes = [16, 16, 128], strides = [1, 1, 1]} : vector<18x16x128xf32> to vector<16x16x128xf32>
    %28 = vector.shape_cast %27 : vector<16x16x128xf32> to vector<256x128xf32>
    %29 = arith.truncf %28 : vector<256x128xf32> to vector<256x128xbf16>
    %c0_27 = arith.constant 0 : index
    %c0_28 = arith.constant 0 : index
    %30 = vector.load %arg11[%c0_27, %c0_28] : memref<256x1152xbf16, #tpu.memory_space<vmem>>, vector<256x128xbf16>
    tpu.vector_store %arg11[%c0_27, %c0_28], %29 {strides = array<i32>} : memref<256x1152xbf16, #tpu.memory_space<vmem>>, vector<256x128xbf16>,
    %31 = vector.extract_strided_slice %15 {offsets = [0, 0, 0], sizes = [16, 16, 128], strides = [1, 1, 1]} : vector<18x16x128xf32> to vector<16x16x128xf32>
    %32 = vector.shape_cast %31 : vector<16x16x128xf32> to vector<256x128xf32>
    %33 = arith.truncf %32 : vector<256x128xf32> to vector<256x128xbf16>
    %c0_29 = arith.constant 0 : index
    %c128 = arith.constant 128 : index
    %34 = vector.load %arg11[%c0_29, %c128] : memref<256x1152xbf16, #tpu.memory_space<vmem>>, vector<256x128xbf16>
    tpu.vector_store %arg11[%c0_29, %c128], %33 {strides = array<i32>} : memref<256x1152xbf16, #tpu.memory_space<vmem>>, vector<256x128xbf16>,
    %35 = vector.extract_strided_slice %26 {offsets = [0, 0, 0], sizes = [16, 16, 128], strides = [1, 1, 1]} : vector<18x16x128xf32> to vector<16x16x128xf32>
    %36 = vector.shape_cast %35 : vector<16x16x128xf32> to vector<256x128xf32>
    %37 = arith.truncf %36 : vector<256x128xf32> to vector<256x128xbf16>
    %c0_30 = arith.constant 0 : index
    %c256 = arith.constant 256 : index
    %38 = vector.load %arg11[%c0_30, %c256] : memref<256x1152xbf16, #tpu.memory_space<vmem>>, vector<256x128xbf16>
    tpu.vector_store %arg11[%c0_30, %c256], %37 {strides = array<i32>} : memref<256x1152xbf16, #tpu.memory_space<vmem>>, vector<256x128xbf16>,
    %39 = vector.extract_strided_slice %21 {offsets = [1, 0, 0], sizes = [16, 16, 128], strides = [1, 1, 1]} : vector<18x16x128xf32> to vector<16x16x128xf32>
    %40 = vector.shape_cast %39 : vector<16x16x128xf32> to vector<256x128xf32>
    %41 = arith.truncf %40 : vector<256x128xf32> to vector<256x128xbf16>
    %c0_31 = arith.constant 0 : index
    %c384 = arith.constant 384 : index
    %42 = vector.load %arg11[%c0_31, %c384] : memref<256x1152xbf16, #tpu.memory_space<vmem>>, vector<256x128xbf16>
    tpu.vector_store %arg11[%c0_31, %c384], %41 {strides = array<i32>} : memref<256x1152xbf16, #tpu.memory_space<vmem>>, vector<256x128xbf16>,
    %43 = vector.extract_strided_slice %15 {offsets = [1, 0, 0], sizes = [16, 16, 128], strides = [1, 1, 1]} : vector<18x16x128xf32> to vector<16x16x128xf32>
    %44 = vector.shape_cast %43 : vector<16x16x128xf32> to vector<256x128xf32>
    %45 = arith.truncf %44 : vector<256x128xf32> to vector<256x128xbf16>
    %c0_32 = arith.constant 0 : index
    %c512 = arith.constant 512 : index
    %46 = vector.load %arg11[%c0_32, %c512] : memref<256x1152xbf16, #tpu.memory_space<vmem>>, vector<256x128xbf16>
    tpu.vector_store %arg11[%c0_32, %c512], %45 {strides = array<i32>} : memref<256x1152xbf16, #tpu.memory_space<vmem>>, vector<256x128xbf16>,
    %47 = vector.extract_strided_slice %26 {offsets = [1, 0, 0], sizes = [16, 16, 128], strides = [1, 1, 1]} : vector<18x16x128xf32> to vector<16x16x128xf32>
    %48 = vector.shape_cast %47 : vector<16x16x128xf32> to vector<256x128xf32>
    %49 = arith.truncf %48 : vector<256x128xf32> to vector<256x128xbf16>
    %c0_33 = arith.constant 0 : index
    %c640 = arith.constant 640 : index
    %50 = vector.load %arg11[%c0_33, %c640] : memref<256x1152xbf16, #tpu.memory_space<vmem>>, vector<256x128xbf16>
    tpu.vector_store %arg11[%c0_33, %c640], %49 {strides = array<i32>} : memref<256x1152xbf16, #tpu.memory_space<vmem>>, vector<256x128xbf16>,
    %51 = vector.extract_strided_slice %21 {offsets = [2, 0, 0], sizes = [16, 16, 128], strides = [1, 1, 1]} : vector<18x16x128xf32> to vector<16x16x128xf32>
    %52 = vector.shape_cast %51 : vector<16x16x128xf32> to vector<256x128xf32>
    %53 = arith.truncf %52 : vector<256x128xf32> to vector<256x128xbf16>
    %c0_34 = arith.constant 0 : index
    %c768 = arith.constant 768 : index
    %54 = vector.load %arg11[%c0_34, %c768] : memref<256x1152xbf16, #tpu.memory_space<vmem>>, vector<256x128xbf16>
    tpu.vector_store %arg11[%c0_34, %c768], %53 {strides = array<i32>} : memref<256x1152xbf16, #tpu.memory_space<vmem>>, vector<256x128xbf16>,
    %55 = vector.extract_strided_slice %15 {offsets = [2, 0, 0], sizes = [16, 16, 128], strides = [1, 1, 1]} : vector<18x16x128xf32> to vector<16x16x128xf32>
    %56 = vector.shape_cast %55 : vector<16x16x128xf32> to vector<256x128xf32>
    %57 = arith.truncf %56 : vector<256x128xf32> to vector<256x128xbf16>
    %c0_35 = arith.constant 0 : index
    %c896 = arith.constant 896 : index
    %58 = vector.load %arg11[%c0_35, %c896] : memref<256x1152xbf16, #tpu.memory_space<vmem>>, vector<256x128xbf16>
    tpu.vector_store %arg11[%c0_35, %c896], %57 {strides = array<i32>} : memref<256x1152xbf16, #tpu.memory_space<vmem>>, vector<256x128xbf16>,
    %59 = vector.extract_strided_slice %26 {offsets = [2, 0, 0], sizes = [16, 16, 128], strides = [1, 1, 1]} : vector<18x16x128xf32> to vector<16x16x128xf32>
    %60 = vector.shape_cast %59 : vector<16x16x128xf32> to vector<256x128xf32>
    %61 = arith.truncf %60 : vector<256x128xf32> to vector<256x128xbf16>
    %c0_36 = arith.constant 0 : index
    %c1024 = arith.constant 1024 : index
    %62 = vector.load %arg11[%c0_36, %c1024] : memref<256x1152xbf16, #tpu.memory_space<vmem>>, vector<256x128xbf16>
    tpu.vector_store %arg11[%c0_36, %c1024], %61 {strides = array<i32>} : memref<256x1152xbf16, #tpu.memory_space<vmem>>, vector<256x128xbf16>,
    %c0_37 = arith.constant 0 : index
    %c0_38 = arith.constant 0 : index
    %63 = vector.load %arg11[%c0_37, %c0_38] : memref<256x1152xbf16, #tpu.memory_space<vmem>>, vector<256x1152xbf16>
    %c0_39 = arith.constant 0 : index
    %c0_40 = arith.constant 0 : index
    %64 = vector.load %arg5[%c0_39, %c0_40] : memref<1152x128xbf16, #tpu.memory_space<vmem>>, vector<1152x128xbf16>
    %cst_41 = arith.constant dense<0.000000e+00> : vector<256x128xf32>
    %65 = tpu.matmul %63, %64, %cst_41 {dimension_numbers = #tpu.dot_dimension_numbers<[1], [0], [0], [1], [0, 0, 1, 1], [], []>} : vector<256x1152xbf16>, vector<1152x128xbf16>, vector<256x128xf32> -> vector<256x128xf32>
    %c0_42 = arith.constant 0 : index
    %c0_43 = arith.constant 0 : index
    %66 = vector.load %arg6[%c0_42, %c0_43] : memref<1x128xf32, #tpu.memory_space<vmem>>, vector<1x128xf32>
    %67 = vector.broadcast %66 : vector<1x128xf32> to vector<256x128xf32>
    %68 = arith.addf %65, %67 : vector<256x128xf32>
    %69 = vector.shape_cast %68 : vector<256x128xf32> to vector<1x16x16x128xf32>
    %70 = arith.truncf %69 : vector<1x16x16x128xf32> to vector<1x16x16x128xbf16>
    %c0_44 = arith.constant 0 : index
    %c0_45 = arith.constant 0 : index
    %c0_46 = arith.constant 0 : index
    %c0_47 = arith.constant 0 : index
    %71 = vector.load %arg7[%c0_44, %c0_45, %c0_46, %c0_47] : memref<1x16x16x128xbf16, #tpu.memory_space<vmem>>, vector<1x16x16x128xbf16>
    tpu.vector_store %arg7[%c0_44, %c0_45, %c0_46, %c0_47], %70 {strides = array<i32>} : memref<1x16x16x128xbf16, #tpu.memory_space<vmem>>, vector<1x16x16x128xbf16>,
    %cst_48 = arith.constant dense<0.000000e+00> : vector<128xf32>
    %72 = vector.multi_reduction <add>, %68, %cst_48 [0] : vector<256x128xf32> to vector<128xf32>
    %73 = vector.shape_cast %72 : vector<128xf32> to vector<1x1x1x128xf32>
    %c0_49 = arith.constant 0 : index
    %c0_50 = arith.constant 0 : index
    %c0_51 = arith.constant 0 : index
    %c0_52 = arith.constant 0 : index
    %74 = vector.load %arg8[%c0_49, %c0_50, %c0_51, %c0_52] : memref<1x1x1x128xf32, #tpu.memory_space<vmem>>, vector<1x1x1x128xf32>
    tpu.vector_store %arg8[%c0_49, %c0_50, %c0_51, %c0_52], %73 {strides = array<i32>} : memref<1x1x1x128xf32, #tpu.memory_space<vmem>>, vector<1x1x1x128xf32>,
    %75 = arith.mulf %68, %68 : vector<256x128xf32>
    %cst_53 = arith.constant dense<0.000000e+00> : vector<128xf32>
    %76 = vector.multi_reduction <add>, %75, %cst_53 [0] : vector<256x128xf32> to vector<128xf32>
    %77 = vector.shape_cast %76 : vector<128xf32> to vector<1x1x1x128xf32>
    %c0_54 = arith.constant 0 : index
    %c0_55 = arith.constant 0 : index
    %c0_56 = arith.constant 0 : index
    %c0_57 = arith.constant 0 : index
    %78 = vector.load %arg9[%c0_54, %c0_55, %c0_56, %c0_57] : memref<1x1x1x128xf32, #tpu.memory_space<vmem>>, vector<1x1x1x128xf32>
    tpu.vector_store %arg9[%c0_54, %c0_55, %c0_56, %c0_57], %77 {strides = array<i32>} : memref<1x1x1x128xf32, #tpu.memory_space<vmem>>, vector<1x1x1x128xf32>,
    return
  }
  func.func @transform_0(%arg0: i32, %arg1: i32) -> (i32, i32, i32, i32) {
    %c0_i32 = arith.constant 0 : i32
    %c0_i32_0 = arith.constant 0 : i32
    %c0_i32_1 = arith.constant 0 : i32
    return %arg0, %arg1, %c0_i32, %c0_i32_0 : i32, i32, i32, i32
  }
  func.func @transform_1(%arg0: i32, %arg1: i32) -> (i32, i32, i32, i32) {
    %c16_i32 = arith.constant 16 : i32
    %0 = arith.muli %arg1, %c16_i32 : i32
    %c1_i32 = arith.constant 1 : i32
    %1 = arith.subi %0, %c1_i32 : i32
    %c0_i32 = arith.constant 0 : i32
    %2 = arith.maxsi %1, %c0_i32 : i32
    %c0_i32_0 = arith.constant 0 : i32
    %c0_i32_1 = arith.constant 0 : i32
    %c0_i32_2 = arith.constant 0 : i32
    return %arg0, %2, %c0_i32_0, %c0_i32_1 : i32, i32, i32, i32
  }
  func.func @transform_2(%arg0: i32, %arg1: i32) -> (i32, i32, i32, i32) {
    %c1_i32 = arith.constant 1 : i32
    %0 = arith.addi %arg1, %c1_i32 : i32
    %c16_i32 = arith.constant 16 : i32
    %1 = arith.muli %0, %c16_i32 : i32
    %c15_i32 = arith.constant 15 : i32
    %2 = arith.minsi %1, %c15_i32 : i32
    %c0_i32 = arith.constant 0 : i32
    %c0_i32_0 = arith.constant 0 : i32
    %c0_i32_1 = arith.constant 0 : i32
    return %arg0, %2, %c0_i32, %c0_i32_0 : i32, i32, i32, i32
  }
  func.func @transform_3(%arg0: i32, %arg1: i32) -> (i32, i32) {
    %c0_i32 = arith.constant 0 : i32
    %c0_i32_0 = arith.constant 0 : i32
    %c0_i32_1 = arith.constant 0 : i32
    return %c0_i32, %c0_i32_0 : i32, i32
  }
  func.func @transform_4(%arg0: i32, %arg1: i32) -> (i32, i32) {
    %c0_i32 = arith.constant 0 : i32
    %c0_i32_0 = arith.constant 0 : i32
    %c0_i32_1 = arith.constant 0 : i32
    return %c0_i32, %c0_i32_0 : i32, i32
  }
  func.func @transform_5(%arg0: i32, %arg1: i32) -> (i32, i32, i32, i32) {
    %c0_i32 = arith.constant 0 : i32
    %c0_i32_0 = arith.constant 0 : i32
    %c0_i32_1 = arith.constant 0 : i32
    return %arg0, %arg1, %c0_i32, %c0_i32_0 : i32, i32, i32, i32
  }
  func.func @transform_6(%arg0: i32, %arg1: i32) -> (i32, i32, i32, i32) {
    %c0_i32 = arith.constant 0 : i32
    %c0_i32_0 = arith.constant 0 : i32
    %c0_i32_1 = arith.constant 0 : i32
    return %arg0, %arg1, %c0_i32, %c0_i32_0 : i32, i32, i32, i32
  }
  func.func @transform_7(%arg0: i32, %arg1: i32) -> (i32, i32, i32, i32) {
    %c0_i32 = arith.constant 0 : i32
    %c0_i32_0 = arith.constant 0 : i32
    %c0_i32_1 = arith.constant 0 : i32
    return %arg0, %arg1, %c0_i32, %c0_i32_0 : i32, i32, i32, i32
  }
}

</mosaic_0001>

<bundles_post_ra>
// kernel: double_conv.5
= control target key start
LH: loop header
LB: loop body
LE: loop exit
PB: predicated region body
PF: predicated region fallthrough
CT: control target
= control target key end

     0   :  { %s711_s12 = smov 0   ;;  %s713_s13 = smov 0   ;;  %s876_s0 = inlined_call_operand.vmem [shape: bf16[2,256,128], index: 0, kind: input, shape index: {}]   ;;  %s877_s1 = inlined_call_operand.vmem [shape: f32[2,1,128], index: 1, kind: input, shape index: {}]   ;;  %s878_s2 = inlined_call_operand.vmem [shape: f32[2,1,128], index: 2, kind: input, shape index: {}]   ;;  %s879_s3 = inlined_call_operand.vmem [shape: f32[2,256,128], index: 3, kind: output, shape index: {}]  }
   0x1   :  { %s715_s14 = smov 0  }
   0x2 LB: > { %s25_s15 = sadd.s32 1, %s685_s13  ;;  %p553_p0 = scmp.ge.s32.totalorder %s689_s14, 1  ;;  %s689_s14 = sphi %s715_s14, %s13_s14   ;;  %s685_s13 = sphi %s713_s13, %s881_s13   ;;  %s681_s12 = sphi %s711_s12, %s880_s12  }
   0x3   : > { %p27_p1 = scmp.ge.s32.totalorder %s25_s15, 2  ;;  %p174_p2 = scmp.lt.s32.totalorder %s689_s14, 3 }
   0x5   : > { %s883_s15 = smov (%p27_p1, %s25_s15), 0  ;;  %p175_p3 = pnand %p553_p0, %p174_p2 }
   0x6   : > { %p213_p4 = scmp.lt.s32.totalorder (!%p175_p3), %s681_s12, 1 }
   0x7   : > { %178 = sbr.rel (%p175_p3) target bundleno = 54 (0x36), region = 32 }
   0xe   : > { %s885_s12 = smov (!%p213_p4, %s681_s12), 1 }
   0xf   : > { %s562_s16 = sshll.u32 %s885_s12, 7  ;;  %s224_s19 = scalar_lea.vmem %s877_s1, %s885_s12 }
  0x10   : > { %s739_s22 = scalar_lea.vmem %s876_s0, %s562_s16  ;;  %s227_s25 = scalar_lea.vmem %s878_s2, %s885_s12  ;;  %v746_v1 = vld [vmem:[%s224_s19] ss:$0 sm:$0xff] }
  0x11   : > { %v565_v0 = vld [vmem:[%s739_s22] sm:$0xff]   ;;  %v628_v2 = vld [vmem:[%s739_s22 + $0x8] sm:$0xff]   ;;  %v629_v7 = vld [vmem:[%s739_s22 + $0x10] sm:$0xff]   ;;  %s563_s26 = sshll.u32 %s885_s12, 8 }
  0x12   : > { %v566_v3 = vunpack.c.l.bf16 %v565_v0  ;;  %v567_v4 = vunpack.c.h.bf16 %v565_v0  ;;  %v570_v5 = vunpack.c.l.bf16 %v628_v2  ;;  %v571_v6 = vunpack.c.h.bf16 %v628_v2  ;;  %v630_v8 = vld [vmem:[%s739_s22 + $0x18] sm:$0xff]   ;;  %v751_v9 = vld [vmem:[%s227_s25] ss:$0 sm:$0xff]  ;;  %s769_s29 = scalar_lea.vmem %s879_s3, %s563_s26  ;;  %v632_v31 = vld [vmem:[%s739_s22 + $0x28] sm:$0xff]  }
  0x13   : > { %v574_v10 = vunpack.c.l.bf16 %v629_v7  ;;  %v575_v11 = vunpack.c.h.bf16 %v629_v7  ;;  %v578_v12 = vunpack.c.l.bf16 %v630_v8  ;;  %v579_v13 = vunpack.c.h.bf16 %v630_v8  ;;  %v631_v30 = vld [vmem:[%s739_s22 + $0x20] sm:$0xff]   ;;  %v633_v36 = vld [vmem:[%s739_s22 + $0x30] sm:$0xff]   ;;  %v634_v37 = vld [vmem:[%s739_s22 + $0x38] sm:$0xff]  }
  0x14   : > { %v309_v14 = vmul.f32 %v566_v3, %v746_v1  ;;  %v310_v15 = vmul.f32 %v567_v4, %v746_v1  ;;  %v311_v16 = vmul.f32 %v570_v5, %v746_v1  ;;  %v312_v17 = vmul.f32 %v571_v6, %v746_v1  ;;  %v635_v3 = vld [vmem:[%s739_s22 + $0x40] sm:$0xff]   ;;  %v636_v4 = vld [vmem:[%s739_s22 + $0x48] sm:$0xff]  }
  0x15   : > { %v313_v18 = vmul.f32 %v574_v10, %v746_v1  ;;  %v314_v19 = vmul.f32 %v575_v11, %v746_v1  ;;  %v315_v20 = vmul.f32 %v578_v12, %v746_v1  ;;  %v316_v21 = vmul.f32 %v579_v13, %v746_v1  ;;  %v637_v10 = vld [vmem:[%s739_s22 + $0x50] sm:$0xff]   ;;  %v638_v11 = vld [vmem:[%s739_s22 + $0x58] sm:$0xff]  }
  0x16   : > { %v348_v22 = vadd.f32 %v751_v9, %v309_v14  ;;  %v349_v23 = vadd.f32 %v751_v9, %v310_v15  ;;  %v350_v24 = vadd.f32 %v751_v9, %v311_v16  ;;  %v351_v25 = vadd.f32 %v751_v9, %v312_v17 }
  0x17   : > { %v352_v26 = vadd.f32 %v751_v9, %v313_v18  ;;  %v353_v27 = vadd.f32 %v751_v9, %v314_v19  ;;  %v354_v28 = vadd.f32 %v751_v9, %v315_v20  ;;  %v355_v29 = vadd.f32 %v751_v9, %v316_v21 }
  0x18   : > { %v380_v32 = vmax.f32 %v348_v22, 0.0  ;;  %v381_v33 = vmax.f32 %v349_v23, 0.0  ;;  %v382_v34 = vmax.f32 %v350_v24, 0.0  ;;  %v383_v35 = vmax.f32 %v351_v25, 0.0 }
  0x19   : > { %v384_v38 = vmax.f32 %v352_v26, 0.0  ;;  %v385_v39 = vmax.f32 %v353_v27, 0.0  ;;  %v386_v40 = vmax.f32 %v354_v28, 0.0  ;;  %v387_v41 = vmax.f32 %v355_v29, 0.0 }
  0x1a   : > { %412 = vst [vmem:[%s769_s29] sm:$0xff] %v380_v32  ;;  %413 = vst [vmem:[%s769_s29 + $0x8] sm:$0xff] %v381_v33  ;;  %v582_v42 = vunpack.c.l.bf16 %v631_v30  ;;  %v583_v43 = vunpack.c.h.bf16 %v631_v30  ;;  %v586_v44 = vunpack.c.l.bf16 %v632_v31  ;;  %v587_v45 = vunpack.c.h.bf16 %v632_v31 }
  0x1b   : > { %414 = vst [vmem:[%s769_s29 + $0x10] sm:$0xff] %v382_v34  ;;  %415 = vst [vmem:[%s769_s29 + $0x18] sm:$0xff] %v383_v35  ;;  %v590_v46 = vunpack.c.l.bf16 %v633_v36  ;;  %v591_v47 = vunpack.c.h.bf16 %v633_v36  ;;  %v594_v48 = vunpack.c.l.bf16 %v634_v37  ;;  %v595_v49 = vunpack.c.h.bf16 %v634_v37 }
  0x1c   : > { %416 = vst [vmem:[%s769_s29 + $0x20] sm:$0xff] %v384_v38  ;;  %417 = vst [vmem:[%s769_s29 + $0x28] sm:$0xff] %v385_v39  ;;  %v317_v50 = vmul.f32 %v582_v42, %v746_v1  ;;  %v318_v51 = vmul.f32 %v583_v43, %v746_v1  ;;  %v319_v52 = vmul.f32 %v586_v44, %v746_v1  ;;  %v598_v16 = vunpack.c.l.bf16 %v635_v3 }
  0x1d   : > { %418 = vst [vmem:[%s769_s29 + $0x30] sm:$0xff] %v386_v40  ;;  %419 = vst [vmem:[%s769_s29 + $0x38] sm:$0xff] %v387_v41  ;;  %v320_v53 = vmul.f32 %v587_v45, %v746_v1  ;;  %v321_v54 = vmul.f32 %v590_v46, %v746_v1  ;;  %v322_v55 = vmul.f32 %v591_v47, %v746_v1  ;;  %v599_v17 = vunpack.c.h.bf16 %v635_v3  ;;  %v639_v40 = vld [vmem:[%s739_s22 + $0x60] sm:$0xff]   ;;  %v640_v41 = vld [vmem:[%s739_s22 + $0x68] sm:$0xff]  }
  0x1e   : > { %v323_v56 = vmul.f32 %v594_v48, %v746_v1  ;;  %v324_v57 = vmul.f32 %v595_v49, %v746_v1  ;;  %v356_v58 = vadd.f32 %v751_v9, %v317_v50  ;;  %v357_v59 = vadd.f32 %v751_v9, %v318_v51  ;;  %v641_v46 = vld [vmem:[%s739_s22 + $0x70] sm:$0xff]   ;;  %v642_v47 = vld [vmem:[%s739_s22 + $0x78] sm:$0xff]  }
  0x1f   : > { %v358_v60 = vadd.f32 %v751_v9, %v319_v52  ;;  %v359_v61 = vadd.f32 %v751_v9, %v320_v53  ;;  %v360_v62 = vadd.f32 %v751_v9, %v321_v54  ;;  %v361_v63 = vadd.f32 %v751_v9, %v322_v55 }
  0x20   : > { %v362_v0 = vadd.f32 %v751_v9, %v323_v56  ;;  %v363_v2 = vadd.f32 %v751_v9, %v324_v57  ;;  %v388_v5 = vmax.f32 %v356_v58, 0.0  ;;  %v389_v6 = vmax.f32 %v357_v59, 0.0 }
  0x21   : > { %v390_v7 = vmax.f32 %v358_v60, 0.0  ;;  %v391_v8 = vmax.f32 %v359_v61, 0.0  ;;  %v392_v12 = vmax.f32 %v360_v62, 0.0  ;;  %v393_v13 = vmax.f32 %v361_v63, 0.0 }
  0x22   : > { %v394_v14 = vmax.f32 %v362_v0, 0.0  ;;  %v395_v15 = vmax.f32 %v363_v2, 0.0  ;;  %420 = vst [vmem:[%s769_s29 + $0x40] sm:$0xff] %v388_v5  ;;  %421 = vst [vmem:[%s769_s29 + $0x48] sm:$0xff] %v389_v6  ;;  %v602_v18 = vunpack.c.l.bf16 %v636_v4  ;;  %v603_v19 = vunpack.c.h.bf16 %v636_v4 }
  0x23   : > { %422 = vst [vmem:[%s769_s29 + $0x50] sm:$0xff] %v390_v7  ;;  %423 = vst [vmem:[%s769_s29 + $0x58] sm:$0xff] %v391_v8  ;;  %v606_v20 = vunpack.c.l.bf16 %v637_v10  ;;  %v607_v21 = vunpack.c.h.bf16 %v637_v10  ;;  %v610_v22 = vunpack.c.l.bf16 %v638_v11  ;;  %v611_v23 = vunpack.c.h.bf16 %v638_v11 }
  0x24   : > { %424 = vst [vmem:[%s769_s29 + $0x60] sm:$0xff] %v392_v12  ;;  %425 = vst [vmem:[%s769_s29 + $0x68] sm:$0xff] %v393_v13  ;;  %v325_v24 = vmul.f32 %v598_v16, %v746_v1  ;;  %v326_v25 = vmul.f32 %v599_v17, %v746_v1  ;;  %v327_v26 = vmul.f32 %v602_v18, %v746_v1  ;;  %v614_v52 = vunpack.c.l.bf16 %v639_v40 }
  0x25   : > { %426 = vst [vmem:[%s769_s29 + $0x70] sm:$0xff] %v394_v14  ;;  %427 = vst [vmem:[%s769_s29 + $0x78] sm:$0xff] %v395_v15  ;;  %v328_v27 = vmul.f32 %v603_v19, %v746_v1  ;;  %v329_v28 = vmul.f32 %v606_v20, %v746_v1  ;;  %v330_v29 = vmul.f32 %v607_v21, %v746_v1  ;;  %v615_v53 = vunpack.c.h.bf16 %v639_v40 }
  0x26   : > { %v331_v30 = vmul.f32 %v610_v22, %v746_v1  ;;  %v332_v31 = vmul.f32 %v611_v23, %v746_v1  ;;  %v364_v32 = vadd.f32 %v751_v9, %v325_v24  ;;  %v365_v33 = vadd.f32 %v751_v9, %v326_v25 }
  0x27   : > { %v366_v34 = vadd.f32 %v751_v9, %v327_v26  ;;  %v367_v35 = vadd.f32 %v751_v9, %v328_v27  ;;  %v368_v36 = vadd.f32 %v751_v9, %v329_v28  ;;  %v369_v37 = vadd.f32 %v751_v9, %v330_v29 }
  0x28   : > { %v370_v38 = vadd.f32 %v751_v9, %v331_v30  ;;  %v371_v39 = vadd.f32 %v751_v9, %v332_v31  ;;  %v396_v42 = vmax.f32 %v364_v32, 0.0  ;;  %v397_v43 = vmax.f32 %v365_v33, 0.0 }
  0x29   : > { %v398_v44 = vmax.f32 %v366_v34, 0.0  ;;  %v399_v45 = vmax.f32 %v367_v35, 0.0  ;;  %v400_v48 = vmax.f32 %v368_v36, 0.0  ;;  %v401_v49 = vmax.f32 %v369_v37, 0.0 }
  0x2a   : > { %v402_v50 = vmax.f32 %v370_v38, 0.0  ;;  %v403_v51 = vmax.f32 %v371_v39, 0.0  ;;  %428 = vst [vmem:[%s769_s29 + $0x80] sm:$0xff] %v396_v42  ;;  %429 = vst [vmem:[%s769_s29 + $0x88] sm:$0xff] %v397_v43  ;;  %v618_v54 = vunpack.c.l.bf16 %v640_v41  ;;  %v619_v55 = vunpack.c.h.bf16 %v640_v41 }
  0x2b   : > { %430 = vst [vmem:[%s769_s29 + $0x90] sm:$0xff] %v398_v44  ;;  %431 = vst [vmem:[%s769_s29 + $0x98] sm:$0xff] %v399_v45  ;;  %v622_v56 = vunpack.c.l.bf16 %v641_v46  ;;  %v623_v57 = vunpack.c.h.bf16 %v641_v46  ;;  %v626_v58 = vunpack.c.l.bf16 %v642_v47  ;;  %v627_v59 = vunpack.c.h.bf16 %v642_v47 }
  0x2c   : > { %432 = vst [vmem:[%s769_s29 + $0xa0] sm:$0xff] %v400_v48  ;;  %433 = vst [vmem:[%s769_s29 + $0xa8] sm:$0xff] %v401_v49  ;;  %v333_v60 = vmul.f32 %v614_v52, %v746_v1  ;;  %v334_v61 = vmul.f32 %v615_v53, %v746_v1  ;;  %v335_v62 = vmul.f32 %v618_v54, %v746_v1 }
  0x2d   : > { %434 = vst [vmem:[%s769_s29 + $0xb0] sm:$0xff] %v402_v50  ;;  %435 = vst [vmem:[%s769_s29 + $0xb8] sm:$0xff] %v403_v51  ;;  %v336_v63 = vmul.f32 %v619_v55, %v746_v1  ;;  %v337_v0 = vmul.f32 %v622_v56, %v746_v1  ;;  %v338_v2 = vmul.f32 %v623_v57, %v746_v1 }
  0x2e   : > { %v339_v3 = vmul.f32 %v626_v58, %v746_v1  ;;  %v340_v4 = vmul.f32 %v627_v59, %v746_v1  ;;  %v372_v5 = vadd.f32 %v751_v9, %v333_v60  ;;  %v373_v6 = vadd.f32 %v751_v9, %v334_v61 }
  0x2f   : > { %v374_v7 = vadd.f32 %v751_v9, %v335_v62  ;;  %v375_v8 = vadd.f32 %v751_v9, %v336_v63  ;;  %v376_v10 = vadd.f32 %v751_v9, %v337_v0  ;;  %v377_v11 = vadd.f32 %v751_v9, %v338_v2 }
  0x30   : > { %v378_v1 = vadd.f32 %v751_v9, %v339_v3  ;;  %v379_v12 = vadd.f32 %v751_v9, %v340_v4  ;;  %v404_v13 = vmax.f32 %v372_v5, 0.0  ;;  %v405_v14 = vmax.f32 %v373_v6, 0.0 }
  0x31   : > { %v406_v15 = vmax.f32 %v374_v7, 0.0  ;;  %v407_v16 = vmax.f32 %v375_v8, 0.0  ;;  %v408_v17 = vmax.f32 %v376_v10, 0.0  ;;  %v409_v18 = vmax.f32 %v377_v11, 0.0 }
  0x32   : > { %v410_v19 = vmax.f32 %v378_v1, 0.0  ;;  %v411_v20 = vmax.f32 %v379_v12, 0.0  ;;  %436 = vst [vmem:[%s769_s29 + $0xc0] sm:$0xff] %v404_v13  ;;  %437 = vst [vmem:[%s769_s29 + $0xc8] sm:$0xff] %v405_v14 }
  0x33   : > { %438 = vst [vmem:[%s769_s29 + $0xd0] sm:$0xff] %v406_v15  ;;  %439 = vst [vmem:[%s769_s29 + $0xd8] sm:$0xff] %v407_v16 }
  0x34   : > { %440 = vst [vmem:[%s769_s29 + $0xe0] sm:$0xff] %v408_v17  ;;  %441 = vst [vmem:[%s769_s29 + $0xe8] sm:$0xff] %v409_v18 }
  0x35   : > { %442 = vst [vmem:[%s769_s29 + $0xf0] sm:$0xff] %v410_v19  ;;  %443 = vst [vmem:[%s769_s29 + $0xf8] sm:$0xff] %v411_v20 }
  0x36 PF: > { %s13_s14 = sadd.s32 1, %s689_s14   ;;  %s880_s12 = smov %s685_s13 }
  0x37   : > { %p10_p5 = scmp.ge.s32.totalorder %s13_s14, 4   ;;  %s881_s13 = smov %s883_s15 }
  0x39   :  { %12 = sbr.rel (!%p10_p5) target bundleno = 2 (0x2), region = 68 }

// kernel: double_conv.4
= control target key start
LH: loop header
LB: loop body
LE: loop exit
PB: predicated region body
PF: predicated region fallthrough
CT: control target
= control target key end

     0   :  { %s2578_s24 = smov 0   ;;  %s2580_s1 = smov 0   ;;  %s3489_s0 = inlined_call_operand.vmem [shape: f32[2,16,16,4], index: 0, kind: input, shape index: {}, may-alias: {0,1,2}]   ;;  %s3490_s1 = inlined_call_operand.vmem [shape: f32[2,16,16,4], index: 1, kind: input, shape index: {}, may-alias: {0,1,2}]   ;;  %s3491_s2 = inlined_call_operand.vmem [shape: f32[2,16,16,4], index: 2, kind: input, shape index: {}, may-alias: {0,1,2}]   ;;  %s3492_s3 = inlined_call_operand.vmem [shape: bf16[36,128], index: 3, kind: input, shape index: {}]   ;;  %s3493_s4 = inlined_call_operand.vmem [shape: f32[1,128], index: 4, kind: input, shape index: {}]   ;;  %s3494_s5 = inlined_call_operand.vmem [shape: bf16[2,16,16,128], index: 5, kind: output, shape index: {0}]   ;;  %s3495_s6 = inlined_call_operand.vmem [shape: f32[2,1,1,128], index: 6, kind: output, shape index: {1}]   ;;  %s3496_s7 = inlined_call_operand.vmem [shape: f32[2,1,1,128], index: 7, kind: output, shape index: {2}]  }
   0x1   :  { %s2582_s2 = smov 0  }
   0x2 LB: > { %s30_s25 = sadd.s32 1, %s2523_s1  ;;  %p2209_p0 = scmp.ge.s32.totalorder %s2527_s2, 1  ;;  %s2527_s2 = sphi %s2582_s2, %s18_s2   ;;  %s2523_s1 = sphi %s2580_s1, %s3498_s1   ;;  %s2519_s24 = sphi %s2578_s24, %s3497_s24  }
   0x3   : > { %p32_p1 = scmp.ge.s32.totalorder %s30_s25, 2  ;;  %p332_p2 = scmp.lt.s32.totalorder %s2527_s2, 3 }
   0x5   : > { %s3500_s25 = smov (%p32_p1, %s30_s25), 0  ;;  %p333_p3 = pnand %p2209_p0, %p332_p2 }
   0x6   : > { %vm514_vm0 = vcmask (!%p333_p3), 31744   ;;  %v604_v0 = vlaneseq (!%p333_p3)  ;;  %v2529_v1 = vmov (!%p333_p3), 0.0   ;;  %p413_p4 = scmp.lt.s32.totalorder (!%p333_p3), %s2519_s24, 1  ;;  %s2530_s30 = smov (!%p333_p3), 4   ;;  %vm1564_vm5 = vcmask (!%p333_p3), 1041408  }
   0x7   : > { %336 = sbr.rel (%p333_p3) target bundleno = 640 (0x280), region = 40  ;;  %555 = vst.msk [vmem:[#allocation2] sm:$0xff] (!%p333_p3), %vm514_vm0, %v2529_v1  ;;  %556 = vst.msk [vmem:[#allocation2 + $0x8] sm:$0xff] (!%p333_p3), %vm514_vm0, %v2529_v1  ;;  %s2531_s8 = smov (!%p333_p3), 8   ;;  %vm941_vm6 = vcmask (!%p333_p3), 64544   ;;  %vm1038_vm7 = vcmask (!%p333_p3), 97344  }
   0x8   : > { %566 = vst.msk [vmem:[#allocation2 + $0x110] sm:$0xff] (!%p333_p3), %vm514_vm0, %v2529_v1  ;;  %567 = vst.msk [vmem:[#allocation2 + $0x118] sm:$0xff] (!%p333_p3), %vm514_vm0, %v2529_v1  ;;  %v2600_v2 = vshrl.u32 (!%p333_p3), %v604_v0, 7  ;;  %s2532_s9 = smov (!%p333_p3), 16   ;;  %s2533_s10 = smov (!%p333_p3), 12   ;;  %vm1120_vm8 = vcmask (!%p333_p3), 130144  }
   0x9   : > { %s2534_s13 = smov (!%p333_p3), 20   ;;  %s2535_s16 = smov (!%p333_p3), 24   ;;  %vm1187_vm9 = vcmask (!%p333_p3), 162944   ;;  %vm1254_vm10 = vcmask (!%p333_p3), 195744   ;;  %vm1321_vm11 = vcmask (!%p333_p3), 228544   ;;  %vm1388_vm12 = vcmask (!%p333_p3), 261344  }
   0xa   : > { %v2606_v3 = vadd.s32 (!%p333_p3), 8, %v2600_v2  ;;  %vm756_vm1 = vcmp.lt.s32.totalorder (!%p333_p3), %v2600_v2, 7  ;;  %vm645_vm2 = vcmp.lt.s32.totalorder (!%p333_p3), %v2600_v2, 1  ;;  %vm607_vm4 = vcmp.eq.s32.totalorder (!%p333_p3), %v2600_v2, 0  ;;  %s2536_s17 = smov (!%p333_p3), 28   ;;  %s2537_s18 = smov (!%p333_p3), 32  }
   0xb   : > { %vm1455_vm13 = vcmask (!%p333_p3), 294144   ;;  %vm1515_vm14 = vcmask (!%p333_p3), 293888  }
   0xc   : > { %vm719_vm3 = vcmp.eq.s32.totalorder (!%p333_p3), %v2606_v3, 15 }
   0xe   : > { %s3502_s24 = smov (!%p413_p4, %s2519_s24), 1  ;;  %v568_v7 = vld [vmem:[#allocation2] sm:$0xff]  ;;  %v569_v8 = vld [vmem:[#allocation2 + $0x8] sm:$0xff] }
   0xf   : > { %s2272_s26 = sshll.u32 %s3502_s24, 8  ;;  %v627_v10 = vrot.slane %v569_v8, 7  ;;  %v738_v11 = vrot.slane %v569_v8, 1  ;;  %v861_v12 = vpack.c.bf16 %v569_v8, %v568_v7  ;;  %v609_v13 = vrot.slane %v568_v7, 7  ;;  %s2276_s23 = sshll.u32 %s3502_s24, 7 }
  0x10   : > { %s2611_s29 = scalar_lea.vmem %s3489_s0, %s2272_s26  ;;  %v720_v17 = vrot.slane %v568_v7, 1  ;;  %s3423_s28 = scalar_lea.vmem %s3494_s5, %s2276_s23 }
  0x11   : > { %v481_v4 = vld [vmem:[%s2611_s29] sm:$0xff]  ;;  %v482_v5 = vld [vmem:[%s2611_s29 + $0x8] sm:$0xff]  ;;  %v483_v6 = vld [vmem:[%s2611_s29 + $0x10] sm:$0xff]  ;;  %893 = vrot.lane.b32.xlu0 %v861_v12, %s2530_s30  ;;  %v646_v24 = vsel %vm645_vm2, %v609_v13, %v627_v10  ;;  %v664_v25 = vsel %vm645_vm2, %v627_v10, %v609_v13  ;;  %s479_s11 = scalar_lea.vmem %s3496_s7, %s3502_s24 }
  0x12   : > { %515 = vst.msk [vmem:[#allocation2 + $0x10] sm:$0xff] %vm514_vm0, %v481_v4  ;;  %516 = vst.msk [vmem:[#allocation2 + $0x18] sm:$0xff] %vm514_vm0, %v482_v5  ;;  %v484_v9 = vld [vmem:[%s2611_s29 + $0x18] sm:$0xff]  ;;  %v485_v14 = vld [vmem:[%s2611_s29 + $0x20] sm:$0xff]  ;;  %v757_v26 = vsel %vm756_vm1, %v720_v17, %v738_v11  ;;  %v775_v27 = vsel %vm756_vm1, %v738_v11, %v720_v17  ;;  %v682_v31 = vsel %vm607_vm4, 0.0, %v664_v25 }
  0x13   : > { %517 = vst.msk [vmem:[#allocation2 + $0x20] sm:$0xff] %vm514_vm0, %v483_v6  ;;  %518 = vst.msk [vmem:[#allocation2 + $0x28] sm:$0xff] %vm514_vm0, %v484_v9  ;;  %v486_v15 = vld [vmem:[%s2611_s29 + $0x28] sm:$0xff]  ;;  %v487_v16 = vld [vmem:[%s2611_s29 + $0x30] sm:$0xff]  ;;  %v794_v32 = vsel %vm719_vm3, 0.0, %v775_v27  ;;  %v829_v33 = vpack.c.bf16 %v646_v24, %v682_v31 }
  0x14   : > { %519 = vst.msk [vmem:[#allocation2 + $0x30] sm:$0xff] %vm514_vm0, %v485_v14  ;;  %520 = vst.msk [vmem:[#allocation2 + $0x38] sm:$0xff] %vm514_vm0, %v486_v15  ;;  %v488_v18 = vld [vmem:[%s2611_s29 + $0x38] sm:$0xff]  ;;  %v489_v19 = vld [vmem:[%s2611_s29 + $0x40] sm:$0xff]  ;;  %v958_v37 = vpack.c.bf16 %v794_v32, %v757_v26 }
  0x15   : > { %521 = vst.msk [vmem:[#allocation2 + $0x40] sm:$0xff] %vm514_vm0, %v487_v16  ;;  %v490_v20 = vld [vmem:[%s2611_s29 + $0x48] sm:$0xff]  ;;  %522 = vst.msk [vmem:[#allocation2 + $0x48] sm:$0xff] %vm514_vm0, %v488_v18  ;;  %v491_v21 = vld [vmem:[%s2611_s29 + $0x50] sm:$0xff] }
  0x16   : > { %523 = vst.msk [vmem:[#allocation2 + $0x50] sm:$0xff] %vm514_vm0, %v489_v19  ;;  %524 = vst.msk [vmem:[#allocation2 + $0x58] sm:$0xff] %vm514_vm0, %v490_v20  ;;  %v492_v22 = vld [vmem:[%s2611_s29 + $0x58] sm:$0xff]  ;;  %v493_v23 = vld [vmem:[%s2611_s29 + $0x60] sm:$0xff]  ;;  %990 = vrot.lane.b32.xlu1 %v958_v37, %s2531_s8 }
  0x17   : > { %525 = vst.msk [vmem:[#allocation2 + $0x60] sm:$0xff] %vm514_vm0, %v491_v21  ;;  %526 = vst.msk [vmem:[#allocation2 + $0x68] sm:$0xff] %vm514_vm0, %v492_v22  ;;  %v494_v28 = vld [vmem:[%s2611_s29 + $0x68] sm:$0xff]  ;;  %v495_v29 = vld [vmem:[%s2611_s29 + $0x70] sm:$0xff] }
  0x18   : > { %527 = vst.msk [vmem:[#allocation2 + $0x70] sm:$0xff] %vm514_vm0, %v493_v23  ;;  %v496_v30 = vld [vmem:[%s2611_s29 + $0x78] sm:$0xff]  ;;  %528 = vst.msk [vmem:[#allocation2 + $0x78] sm:$0xff] %vm514_vm0, %v494_v28  ;;  %v497_v34 = vld [vmem:[%s2611_s29 + $0x80] sm:$0xff] }
  0x19   : > { %529 = vst.msk [vmem:[#allocation2 + $0x80] sm:$0xff] %vm514_vm0, %v495_v29  ;;  %530 = vst.msk [vmem:[#allocation2 + $0x88] sm:$0xff] %vm514_vm0, %v496_v30  ;;  %v498_v35 = vld [vmem:[%s2611_s29 + $0x88] sm:$0xff]  ;;  %v499_v36 = vld [vmem:[%s2611_s29 + $0x90] sm:$0xff] }
  0x1a   : > { %531 = vst.msk [vmem:[#allocation2 + $0x90] sm:$0xff] %vm514_vm0, %v497_v34  ;;  %532 = vst.msk [vmem:[#allocation2 + $0x98] sm:$0xff] %vm514_vm0, %v498_v35  ;;  %v500_v38 = vld [vmem:[%s2611_s29 + $0x98] sm:$0xff]  ;;  %v570_v39 = vld [vmem:[#allocation2 + $0x10] sm:$0xff] }
  0x1b   : > { %533 = vst.msk [vmem:[#allocation2 + $0xa0] sm:$0xff] %vm514_vm0, %v499_v36  ;;  %v571_v40 = vld [vmem:[#allocation2 + $0x18] sm:$0xff]  ;;  %v572_v41 = vld [vmem:[#allocation2 + $0x20] sm:$0xff]  ;;  %845 = vst.msk [vmem:[#allocation3] sm:$0xff] %vm514_vm0, %v829_v33  ;;  %v610_v45 = vrot.slane %v570_v39, 7  ;;  %v721_v47 = vrot.slane %v570_v39, 1 }
  0x1c   : > { %534 = vst.msk [vmem:[#allocation2 + $0xa8] sm:$0xff] %vm514_vm0, %v500_v38  ;;  %v628_v42 = vrot.slane %v571_v40, 7  ;;  %v739_v43 = vrot.slane %v571_v40, 1  ;;  %v862_v44 = vpack.c.bf16 %v571_v40, %v570_v39  ;;  %v573_v46 = vld [vmem:[#allocation2 + $0x28] sm:$0xff]  ;;  %v2674_v51 = vld [vmem:[#allocation2 + $0x30] sm:$0xff]  ;;  %v611_v52 = vrot.slane %v572_v41, 7 }
  0x1d   : > { %v629_v48 = vrot.slane %v573_v46, 7  ;;  %v740_v49 = vrot.slane %v573_v46, 1  ;;  %v2672_v50 = vpack.c.bf16 %v573_v46, %v572_v41  ;;  %v722_v53 = vrot.slane %v572_v41, 1  ;;  %v2687_v59 = vld [vmem:[#allocation2 + $0x38] sm:$0xff]  ;;  %v2698_v1 = vld [vmem:[#allocation2 + $0x40] sm:$0xff]  ;;  %v2704_v7 = vld [vmem:[#allocation2 + $0x48] sm:$0xff] }
  0x1e   : > { %895 = vrot.lane.b32.xlu0 %v862_v44, %s2530_s30  ;;  %v647_v54 = vsel %vm645_vm2, %v610_v45, %v628_v42  ;;  %v665_v55 = vsel %vm645_vm2, %v628_v42, %v610_v45  ;;  %v758_v56 = vsel %vm756_vm1, %v721_v47, %v739_v43  ;;  %v776_v57 = vsel %vm756_vm1, %v739_v43, %v721_v47  ;;  %v501_v10 = vld [vmem:[%s2611_s29 + $0xa0] sm:$0xff]  ;;  %v502_v11 = vld [vmem:[%s2611_s29 + $0xa8] sm:$0xff]  ;;  %v2725_v18 = vld [vmem:[#allocation2 + $0x50] sm:$0xff] }
  0x1f   : > { %v684_v58 = vsel %vm607_vm4, 0.0, %v665_v55  ;;  %v612_v60 = vrot.slane %v2674_v51, 7  ;;  %1141 = vrot.lane.b32.xlu1 %v2672_v50, %s2532_s9  ;;  %v796_v61 = vsel %vm719_vm3, 0.0, %v776_v57  ;;  %v648_v63 = vsel %vm645_vm2, %v611_v52, %v629_v48  ;;  %535 = vst.msk [vmem:[#allocation2 + $0xb0] sm:$0xff] %vm514_vm0, %v501_v10  ;;  %536 = vst.msk [vmem:[#allocation2 + $0xb8] sm:$0xff] %vm514_vm0, %v502_v11  ;;  %v2729_v20 = vld [vmem:[#allocation2 + $0x58] sm:$0xff] }
  0x20   : > { %v830_v62 = vpack.c.bf16 %v647_v54, %v684_v58  ;;  %v666_v0 = vsel %vm645_vm2, %v629_v48, %v611_v52  ;;  %v959_v4 = vpack.c.bf16 %v796_v61, %v758_v56  ;;  %v777_v6 = vsel %vm756_vm1, %v740_v49, %v722_v53  ;;  %v2738_v24 = vld [vmem:[#allocation2 + $0x60] sm:$0xff]  ;;  %v2745_v28 = vld [vmem:[#allocation2 + $0x68] sm:$0xff]  ;;  %v582_v39 = vld [vmem:[#allocation2 + $0x70] sm:$0xff] }
  0x21   : > { %v686_v5 = vsel %vm607_vm4, 0.0, %v666_v0  ;;  %v630_v9 = vrot.slane %v2687_v59, 7  ;;  %v759_v12 = vsel %vm756_vm1, %v722_v53, %v740_v49  ;;  %v613_v13 = vrot.slane %v2698_v1, 7  ;;  %v2502_v29 = vld [vmem:[%s3492_s3] sm:$0xff]   ;;  %v583_v40 = vld [vmem:[#allocation2 + $0x78] sm:$0xff]  ;;  %v2503_v41 = vld [vmem:[%s3492_s3 + $0x8] sm:$0xff]  }
  0x22   : > { %1139 = vrot.lane.b32.xlu0 %v862_v44, %s2532_s9  ;;  %846 = vst.msk [vmem:[#allocation3 + $0x8] sm:$0xff] %vm514_vm0, %v830_v62  ;;  %v831_v8 = vpack.c.bf16 %v648_v63, %v686_v5  ;;  %v798_v14 = vsel %vm719_vm3, 0.0, %v777_v6  ;;  %v631_v17 = vrot.slane %v2704_v7, 7  ;;  %v614_v27 = vrot.slane %v2725_v18, 7  ;;  %2423 = vmatprep.subr.bf16.mxu0 %v2502_v29  ;;  %v584_v47 = vld [vmem:[#allocation2 + $0x80] sm:$0xff]  ;;  %v585_v58 = vld [vmem:[#allocation2 + $0x88] sm:$0xff] }
  0x23   : > { %992 = vrot.lane.b32.xlu1 %v959_v4, %s2531_s8  ;;  %v649_v15 = vsel %vm645_vm2, %v612_v60, %v630_v9  ;;  %v667_v16 = vsel %vm645_vm2, %v630_v9, %v612_v60  ;;  %v2740_v25 = vpack.c.bf16 %v798_v14, %v759_v12  ;;  %v723_v30 = vrot.slane %v2674_v51, 1  ;;  %2461 = vmatprep.subr.bf16.mxu1 %v2502_v29  ;;  %v587_v5 = vld [vmem:[#allocation2 + $0x98] sm:$0xff] }
  0x24   : > { %847 = vst.msk [vmem:[#allocation3 + $0x10] sm:$0xff] %vm514_vm0, %v831_v8  ;;  %v688_v19 = vsel %vm607_vm4, 0.0, %v667_v16  ;;  %v650_v22 = vsel %vm645_vm2, %v613_v13, %v631_v17  ;;  %v668_v23 = vsel %vm645_vm2, %v631_v17, %v613_v13  ;;  %v741_v31 = vrot.slane %v2687_v59, 1  ;;  %2424 = vmatpush3.bf16.msra.mxu0 %v2502_v29  ;;  %2464 = vmatpush3.bf16.msra.mxu1 %v2502_v29  ;;  %v588_v29 = vld [vmem:[#allocation2 + $0xa0] sm:$0xff] }
  0x25   : > { %v2732_v21 = vpack.c.bf16 %v649_v15, %v688_v19  ;;  %v690_v26 = vsel %vm607_vm4, 0.0, %v668_v23  ;;  %v632_v33 = vrot.slane %v2729_v20, 7  ;;  %v615_v34 = vrot.slane %v2738_v24, 7  ;;  %2425 = vmatprep.subr.bf16.mxu0 %v2503_v41  ;;  %2462 = vmatprep.subr.bf16.mxu1 %v2503_v41 }
  0x26   : > { %1072 = vrot.lane.b32.xlu0 %v830_v62, %s2533_s10  ;;  %v2755_v32 = vpack.c.bf16 %v650_v22, %v690_v26  ;;  %v633_v37 = vrot.slane %v2745_v28, 7  ;;  %v778_v42 = vsel %vm756_vm1, %v741_v31, %v723_v30  ;;  %v760_v48 = vsel %vm756_vm1, %v723_v30, %v741_v31  ;;  %v503_v30 = vld [vmem:[%s2611_s29 + $0xb0] sm:$0xff]  ;;  %v504_v31 = vld [vmem:[%s2611_s29 + $0xb8] sm:$0xff] }
  0x27   : > { %1074 = vrot.lane.b32.xlu1 %v831_v8, %s2533_s10  ;;  %848 = vst.msk [vmem:[#allocation3 + $0x18] sm:$0xff] %vm514_vm0, %v2732_v21  ;;  %v651_v35 = vsel %vm645_vm2, %v614_v27, %v632_v33  ;;  %v669_v36 = vsel %vm645_vm2, %v632_v33, %v614_v27  ;;  %v616_v52 = vrot.slane %v582_v39, 7  ;;  %v634_v53 = vrot.slane %v583_v40, 7  ;;  %537 = vst.msk [vmem:[#allocation2 + $0xc0] sm:$0xff] %vm514_vm0, %v503_v30 }
  0x28   : > { %849 = vst.msk [vmem:[#allocation3 + $0x20] sm:$0xff] %vm514_vm0, %v2755_v32  ;;  %v692_v38 = vsel %vm607_vm4, 0.0, %v669_v36  ;;  %v652_v44 = vsel %vm645_vm2, %v615_v34, %v633_v37  ;;  %v670_v45 = vsel %vm645_vm2, %v633_v37, %v615_v34  ;;  %2426 = vmatpush3.bf16.msra.mxu0 %v2503_v41  ;;  %v800_v54 = vsel %vm719_vm3, 0.0, %v778_v42  ;;  %2465 = vmatpush3.bf16.msra.mxu1 %v2503_v41  ;;  %v589_v37 = vld [vmem:[#allocation2 + $0xa8] sm:$0xff] }
  0x29   : > { %v2776_v43 = vpack.c.bf16 %v651_v35, %v692_v38  ;;  %v694_v46 = vsel %vm607_vm4, 0.0, %v670_v45  ;;  %v2793_v55 = vpack.c.bf16 %v583_v40, %v582_v39  ;;  %v727_v56 = vrot.slane %v582_v39, 1  ;;  %538 = vst.msk [vmem:[#allocation2 + $0xc8] sm:$0xff] %vm514_vm0, %v504_v31 }
  0x2a   : > { %1206 = vrot.lane.b32.xlu0 %v959_v4, %s2534_s13  ;;  %v2789_v49 = vpack.c.bf16 %v652_v44, %v694_v46  ;;  %v745_v57 = vrot.slane %v583_v40, 1  ;;  %v2799_v60 = vpack.c.bf16 %v2687_v59, %v2674_v51  ;;  %v653_v61 = vsel %vm645_vm2, %v616_v52, %v634_v53  ;;  %v586_v59 = vld [vmem:[#allocation2 + $0x90] sm:$0xff] }
  0x2b   : > { %1208 = vrot.lane.b32.xlu1 %v2740_v25, %s2534_s13  ;;  %850 = vst.msk [vmem:[#allocation3 + $0x28] sm:$0xff] %vm514_vm0, %v2776_v43  ;;  %v671_v62 = vsel %vm645_vm2, %v634_v53, %v616_v52  ;;  %v617_v63 = vrot.slane %v584_v47, 7  ;;  %v2815_v6 = vpack.c.bf16 %v800_v54, %v760_v48  ;;  %v635_v10 = vrot.slane %v585_v58, 7  ;;  %v590_v52 = vld [vmem:[#allocation2 + $0xb0] sm:$0xff]  ;;  %v591_v53 = vld [vmem:[#allocation2 + $0xb8] sm:$0xff] }
  0x2c   : > { %851 = vst.msk [vmem:[#allocation3 + $0x30] sm:$0xff] %vm514_vm0, %v2789_v49  ;;  %v696_v0 = vsel %vm607_vm4, 0.0, %v671_v62  ;;  %v764_v4 = vsel %vm756_vm1, %v727_v56, %v745_v57  ;;  %v782_v51 = vsel %vm756_vm1, %v745_v57, %v727_v56  ;;  %v2823_v12 = vpack.c.bf16 %v585_v58, %v584_v47 }
  0x2d   : > { %v808_v9 = vsel %vm719_vm3, 0.0, %v782_v51  ;;  %v728_v13 = vrot.slane %v584_v47, 1  ;;  %v746_v14 = vrot.slane %v585_v58, 1  ;;  %v654_v15 = vsel %vm645_vm2, %v617_v63, %v635_v10 }
  0x2e   : > { %1273 = vrot.lane.b32.xlu0 %v831_v8, %s2535_s16  ;;  %v2817_v8 = vpack.c.bf16 %v653_v61, %v696_v0  ;;  %v2821_v11 = vpack.c.bf16 %v808_v9, %v764_v4  ;;  %v672_v16 = vsel %vm645_vm2, %v635_v10, %v617_v63  ;;  %v618_v17 = vrot.slane %v586_v59, 7 }
  0x2f   : > { %1275 = vrot.lane.b32.xlu1 %v2732_v21, %s2535_s16  ;;  %v636_v19 = vrot.slane %v587_v5, 7  ;;  %v698_v22 = vsel %vm607_vm4, 0.0, %v672_v16  ;;  %v765_v23 = vsel %vm756_vm1, %v728_v13, %v746_v14  ;;  %v783_v26 = vsel %vm756_vm1, %v746_v14, %v728_v13  ;;  %v592_v14 = vld [vmem:[#allocation2 + $0xc0] sm:$0xff] }
  0x30   : > { %852 = vst.msk [vmem:[#allocation3 + $0x38] sm:$0xff] %vm514_vm0, %v2817_v8  ;;  %v2839_v27 = vpack.c.bf16 %v587_v5, %v586_v59  ;;  %v2845_v33 = vpack.c.bf16 %v654_v15, %v698_v22  ;;  %v810_v34 = vsel %vm719_vm3, 0.0, %v783_v26  ;;  %v729_v40 = vrot.slane %v586_v59, 1  ;;  %v593_v15 = vld [vmem:[#allocation2 + $0xc8] sm:$0xff] }
  0x31   : > { %v655_v35 = vsel %vm645_vm2, %v618_v17, %v636_v19  ;;  %v673_v36 = vsel %vm645_vm2, %v636_v19, %v618_v17  ;;  %v2855_v38 = vpack.c.bf16 %v810_v34, %v765_v23  ;;  %v747_v41 = vrot.slane %v587_v5, 1 }
  0x32   : > { %1340 = vrot.lane.b32.xlu0 %v2672_v50, %s2536_s17  ;;  %v700_v39 = vsel %vm607_vm4, 0.0, %v673_v36  ;;  %v724_v42 = vrot.slane %v2698_v1, 1  ;;  %853 = vst.msk [vmem:[#allocation3 + $0x40] sm:$0xff] %vm514_vm0, %v2845_v33  ;;  %v619_v45 = vrot.slane %v588_v29, 7  ;;  %v637_v48 = vrot.slane %v589_v37, 7  ;;  %v505_v36 = vld [vmem:[%s2611_s29 + $0xc0] sm:$0xff] }
  0x33   : > { %1342 = vrot.lane.b32.xlu1 %v2799_v60, %s2536_s17  ;;  %v2864_v44 = vpack.c.bf16 %v655_v35, %v700_v39  ;;  %v766_v46 = vsel %vm756_vm1, %v729_v40, %v747_v41  ;;  %v784_v47 = vsel %vm756_vm1, %v747_v41, %v729_v40  ;;  %v742_v54 = vrot.slane %v2704_v7, 1  ;;  %539 = vst.msk [vmem:[#allocation2 + $0xd0] sm:$0xff] %vm514_vm0, %v505_v36 }
  0x34   : > { %v812_v56 = vsel %vm719_vm3, 0.0, %v784_v47  ;;  %v2880_v57 = vpack.c.bf16 %v589_v37, %v588_v29  ;;  %v730_v58 = vrot.slane %v588_v29, 1  ;;  %v656_v62 = vsel %vm645_vm2, %v619_v45, %v637_v48 }
  0x35   : > { %854 = vst.msk [vmem:[#allocation3 + $0x48] sm:$0xff] %vm514_vm0, %v2864_v44  ;;  %v2882_v61 = vpack.c.bf16 %v812_v56, %v766_v46  ;;  %v674_v63 = vsel %vm645_vm2, %v637_v48, %v619_v45  ;;  %v748_v0 = vrot.slane %v589_v37, 1  ;;  %v620_v51 = vrot.slane %v590_v52, 7  ;;  %v506_v37 = vld [vmem:[%s2611_s29 + $0xc8] sm:$0xff] }
  0x36   : > { %1407 = vrot.lane.b32.xlu0 %v2740_v25, %s2537_s18  ;;  %v702_v4 = vsel %vm607_vm4, 0.0, %v674_v63  ;;  %v638_v59 = vrot.slane %v591_v53, 7  ;;  %v2912_v23 = vpack.c.bf16 %v591_v53, %v590_v52  ;;  %v731_v26 = vrot.slane %v590_v52, 1  ;;  %540 = vst.msk [vmem:[#allocation2 + $0xd8] sm:$0xff] %vm514_vm0, %v506_v37 }
  0x37   : > { %897 = vrot.lane.b32.xlu1 %v2672_v50, %s2530_s30  ;;  %v2504_v50 = vld [vmem:[%s3492_s3 + $0x10] ss:$0 sps:$4 sm:$0x33]   ;;  %v2892_v5 = vpack.c.bf16 %v656_v62, %v702_v4  ;;  %v767_v9 = vsel %vm756_vm1, %v730_v58, %v748_v0  ;;  %v785_v10 = vsel %vm756_vm1, %v748_v0, %v730_v58  ;;  %v749_v30 = vrot.slane %v591_v53, 1 }
  0x38   : > { %2467 = vmatprep.subr.msk.bf16.mxu0 %vm1564_vm5, %v2504_v50  ;;  %v1566_v13 = vsel %vm1564_vm5, %v2504_v50, 0  ;;  %2468 = vmatprep.subr.msk.bf16.mxu1 %vm1564_vm5, %v2504_v50  ;;  %v814_v16 = vsel %vm719_vm3, 0.0, %v785_v10  ;;  %v657_v17 = vsel %vm645_vm2, %v620_v51, %v638_v59  ;;  %v675_v19 = vsel %vm645_vm2, %v638_v59, %v620_v51 }
  0x39   : > { %2428 = vmatpush3.bf16.msra.mxu0 %v1566_v13  ;;  %855 = vst.msk [vmem:[#allocation3 + $0x50] sm:$0xff] %vm514_vm0, %v2892_v5  ;;  %v2908_v22 = vpack.c.bf16 %v814_v16, %v767_v9  ;;  %2466 = vmatpush3.bf16.msra.mxu1 %v1566_v13  ;;  %v621_v31 = vrot.slane %v592_v14, 7  ;;  %v639_v34 = vrot.slane %v593_v15, 7  ;;  %v779_v35 = vsel %vm756_vm1, %v742_v54, %v724_v42 }
  0x3a   : > { %1409 = vrot.lane.b32.xlu0 %v2815_v6, %s2537_s18  ;;  %v768_v39 = vsel %vm756_vm1, %v731_v26, %v749_v30  ;;  %v786_v40 = vsel %vm756_vm1, %v749_v30, %v731_v26  ;;  %v865_v47 = vpack.c.bf16 %v2704_v7, %v2698_v1  ;;  %v761_v53 = vsel %vm756_vm1, %v724_v42, %v742_v54  ;;  %v508_v26 = vld [vmem:[%s2611_s29 + $0xd8] sm:$0xff] }
  0x3b   : > { %899 = vrot.lane.b32.xlu1 %v2799_v60, %s2530_s30  ;;  %v658_v41 = vsel %vm645_vm2, %v621_v31, %v639_v34  ;;  %v676_v45 = vsel %vm645_vm2, %v639_v34, %v621_v31  ;;  %v802_v50 = vsel %vm719_vm3, 0.0, %v779_v35  ;;  %v2960_v56 = vpack.c.bf16 %v593_v15, %v592_v14  ;;  %542 = vst.msk [vmem:[#allocation2 + $0xe8] sm:$0xff] %vm514_vm0, %v508_v26  ;;  %v511_v26 = vld [vmem:[%s2611_s29 + $0xf0] sm:$0xff] }
  0x3c   : > { %v706_v46 = vsel %vm607_vm4, 0.0, %v676_v45  ;;  %v732_v7 = vrot.slane %v592_v14, 1  ;;  %v750_v58 = vrot.slane %v593_v15, 1  ;;  %v962_v62 = vpack.c.bf16 %v802_v50, %v761_v53  ;;  %v509_v50 = vld [vmem:[%s2611_s29 + $0xe0] sm:$0xff]  ;;  %545 = vst.msk [vmem:[#allocation2 + $0x100] sm:$0xff] %vm514_vm0, %v511_v26 }
  0x3d   : > { %v2948_v52 = vpack.c.bf16 %v658_v41, %v706_v46  ;;  %v595_v63 = vld [vmem:[#allocation2 + $0xd8] sm:$0xff]  ;;  %v725_v59 = vrot.slane %v2725_v18, 1  ;;  %v743_v9 = vrot.slane %v2729_v20, 1  ;;  %v866_v15 = vpack.c.bf16 %v2729_v20, %v2725_v18  ;;  %v507_v20 = vld [vmem:[%s2611_s29 + $0xd0] sm:$0xff]  ;;  %543 = vst.msk [vmem:[#allocation2 + $0xf0] sm:$0xff] %vm514_vm0, %v509_v50 }
  0x3e   : > { %994 = vrot.lane.b32.xlu0 %v2740_v25, %s2531_s8  ;;  %v704_v25 = vsel %vm607_vm4, 0.0, %v675_v19  ;;  %v787_v1 = vsel %vm756_vm1, %v750_v58, %v732_v7  ;;  %v769_v42 = vsel %vm756_vm1, %v732_v7, %v750_v58  ;;  %v640_v51 = vrot.slane %v595_v63, 7  ;;  %541 = vst.msk [vmem:[#allocation2 + $0xe0] sm:$0xff] %vm514_vm0, %v507_v20  ;;  %v510_v7 = vld [vmem:[%s2611_s29 + $0xe8] sm:$0xff] }
  0x3f   : > { %996 = vrot.lane.b32.xlu1 %v2815_v6, %s2531_s8  ;;  %v2916_v29 = vpack.c.bf16 %v657_v17, %v704_v25  ;;  %857 = vst.msk [vmem:[#allocation3 + $0x60] sm:$0xff] %vm514_vm0, %v2948_v52  ;;  %v818_v54 = vsel %vm719_vm3, 0.0, %v787_v1  ;;  %v780_v16 = vsel %vm756_vm1, %v743_v9, %v725_v59  ;;  %v751_v18 = vrot.slane %v595_v63, 1  ;;  %544 = vst.msk [vmem:[#allocation2 + $0xf8] sm:$0xff] %vm514_vm0, %v510_v7 }
  0x40   : > { %v2971_v0 = vpack.c.bf16 %v818_v54, %v769_v42  ;;  %v804_v19 = vsel %vm719_vm3, 0.0, %v780_v16  ;;  %v744_v41 = vrot.slane %v2745_v28, 1  ;;  %v867_v1 = vpack.c.bf16 %v2745_v28, %v2738_v24 }
  0x41   : > { %856 = vst.msk [vmem:[#allocation3 + $0x58] sm:$0xff] %vm514_vm0, %v2916_v29 }
  0x42   : > { %1076 = vrot.lane.b32.xlu0 %v2732_v21, %s2533_s10  ;;  %v816_v21 = vsel %vm719_vm3, 0.0, %v786_v40  ;;  %v726_v40 = vrot.slane %v2738_v24, 1 }
  0x43   : > { %1078 = vrot.lane.b32.xlu1 %v2755_v32, %s2533_s10  ;;  %v2946_v48 = vpack.c.bf16 %v816_v21, %v768_v39  ;;  %v597_v39 = vld [vmem:[#allocation2 + $0xe8] sm:$0xff] }
  0x44   : > { %v641_v21 = vrot.slane %v597_v39, 7  ;;  %v781_v58 = vsel %vm756_vm1, %v744_v41, %v726_v40 }
  0x45   : > { %v596_v37 = vld [vmem:[#allocation2 + $0xe0] sm:$0xff]  ;;  %v806_v42 = vsel %vm719_vm3, 0.0, %v781_v58 }
  0x46   : > { %1143 = vrot.lane.b32.xlu0 %v2799_v60, %s2532_s9  ;;  %v594_v60 = vld [vmem:[#allocation2 + $0xd0] sm:$0xff]  ;;  %v623_v45 = vrot.slane %v596_v37, 7  ;;  %v3049_v54 = vpack.c.bf16 %v597_v39, %v596_v37 }
  0x47   : > { %1145 = vrot.lane.b32.xlu1 %v865_v47, %s2532_s9  ;;  %v622_v4 = vrot.slane %v594_v60, 7  ;;  %v2995_v17 = vpack.c.bf16 %v595_v63, %v594_v60  ;;  %v733_v25 = vrot.slane %v594_v60, 1  ;;  %v734_v60 = vrot.slane %v596_v37, 1 }
  0x48   : > { %v678_v46 = vsel %vm645_vm2, %v641_v21, %v623_v45  ;;  %v752_v63 = vrot.slane %v597_v39, 1 }
  0x49   : > { %v677_v10 = vsel %vm645_vm2, %v640_v51, %v622_v4  ;;  %v659_v13 = vsel %vm645_vm2, %v622_v4, %v640_v51  ;;  %v788_v31 = vsel %vm756_vm1, %v751_v18, %v733_v25  ;;  %v770_v34 = vsel %vm756_vm1, %v733_v25, %v751_v18 }
  0x4a   : > { %1210 = vrot.lane.b32.xlu0 %v2815_v6, %s2534_s13  ;;  %v708_v6 = vsel %vm607_vm4, 0.0, %v677_v10  ;;  %v820_v35 = vsel %vm719_vm3, 0.0, %v788_v31  ;;  %v710_v53 = vsel %vm607_vm4, 0.0, %v678_v46  ;;  %v789_v24 = vsel %vm756_vm1, %v752_v63, %v734_v60 }
  0x4b   : > { %1212 = vrot.lane.b32.xlu1 %v962_v62, %s2534_s13  ;;  %v2984_v14 = vpack.c.bf16 %v659_v13, %v708_v6  ;;  %v3014_v36 = vpack.c.bf16 %v820_v35, %v770_v34  ;;  %v771_v28 = vsel %vm756_vm1, %v734_v60, %v752_v63  ;;  %v822_v51 = vsel %vm719_vm3, 0.0, %v789_v24 }
  0x4c   : > { %v3059_v10 = vpack.c.bf16 %v822_v51, %v771_v28 }
  0x4d   : > { %858 = vst.msk [vmem:[#allocation3 + $0x68] sm:$0xff] %vm514_vm0, %v2984_v14 }
  0x4e   : > { %1277 = vrot.lane.b32.xlu0 %v2755_v32, %s2535_s16  ;;  %v762_v32 = vsel %vm756_vm1, %v725_v59, %v743_v9  ;;  %v598_v59 = vld [vmem:[#allocation2 + $0xf0] sm:$0xff]  ;;  %v599_v9 = vld [vmem:[#allocation2 + $0xf8] sm:$0xff] }
  0x4f   : > { %1279 = vrot.lane.b32.xlu1 %v2776_v43, %s2535_s16  ;;  %v963_v30 = vpack.c.bf16 %v804_v19, %v762_v32  ;;  %v624_v13 = vrot.slane %v598_v59, 7  ;;  %v642_v6 = vrot.slane %v599_v9, 7  ;;  %v3077_v25 = vpack.c.bf16 %v599_v9, %v598_v59 }
  0x50   : > { %v735_v18 = vrot.slane %v598_v59, 1  ;;  %v753_v20 = vrot.slane %v599_v9, 1 }
  0x51   : > { %v661_v16 = vsel %vm645_vm2, %v624_v13, %v642_v6 }
  0x52   : > { %1344 = vrot.lane.b32.xlu0 %v865_v47, %s2536_s17  ;;  %v772_v31 = vsel %vm756_vm1, %v735_v18, %v753_v20 }
  0x53   : > { %1346 = vrot.lane.b32.xlu1 %v866_v15, %s2536_s17 }
  0x56   : > { %1411 = vrot.lane.b32.xlu0 %v962_v62, %s2537_s18 }
  0x57   : > { %901 = vrot.lane.b32.xlu1 %v865_v47, %s2530_s30  ;;  %v660_v47 = vsel %vm645_vm2, %v623_v45, %v641_v21 }
  0x5a   : > { %1413 = vrot.lane.b32.xlu0 %v963_v30, %s2537_s18 }
  0x5b   : > { %903 = vrot.lane.b32.xlu1 %v866_v15, %s2530_s30 }
  0x5e   : > { %998 = vrot.lane.b32.xlu0 %v962_v62, %s2531_s8  ;;  %v3034_v62 = vpack.c.bf16 %v660_v47, %v710_v53 }
  0x5f   : > { %1000 = vrot.lane.b32.xlu1 %v963_v30, %s2531_s8 }
  0x60   : > { %859 = vst.msk [vmem:[#allocation3 + $0x70] sm:$0xff] %vm514_vm0, %v3034_v62 }
  0x62   : > { %1080 = vrot.lane.b32.xlu0 %v2776_v43, %s2533_s10  ;;  %v763_v43 = vsel %vm756_vm1, %v726_v40, %v744_v41 }
  0x63   : > { %1082 = vrot.lane.b32.xlu1 %v2789_v49, %s2533_s10  ;;  %v964_v4 = vpack.c.bf16 %v806_v42, %v763_v43 }
  0x66   : > { %1147 = vrot.lane.b32.xlu0 %v866_v15, %s2532_s9  ;;  %v679_v15 = vsel %vm645_vm2, %v642_v6, %v624_v13 }
  0x67   : > { %1149 = vrot.lane.b32.xlu1 %v867_v1, %s2532_s9  ;;  %v712_v32 = vsel %vm607_vm4, 0.0, %v679_v15 }
  0x68   : > { %v3070_v19 = vpack.c.bf16 %v661_v16, %v712_v32 }
  0x6a   : > { %1214 = vrot.lane.b32.xlu0 %v963_v30, %s2534_s13  ;;  %860 = vst.msk [vmem:[#allocation3 + $0x78] sm:$0xff] %vm514_vm0, %v3070_v19  ;;  %v512_v30 = vld [vmem:[%s2611_s29 + $0xf8] sm:$0xff] }
  0x6b   : > { %1216 = vrot.lane.b32.xlu1 %v964_v4, %s2534_s13  ;;  %546 = vst.msk [vmem:[#allocation2 + $0x108] sm:$0xff] %vm514_vm0, %v512_v30 }
  0x6e   : > { %1281 = vrot.lane.b32.xlu0 %v2789_v49, %s2535_s16  ;;  %v790_v49 = vsel %vm756_vm1, %v753_v20, %v735_v18 }
  0x6f   : > { %1283 = vrot.lane.b32.xlu1 %v2817_v8, %s2535_s16  ;;  %v824_v34 = vsel %vm719_vm3, 0.0, %v790_v49 }
  0x70   : > { %v3093_v35 = vpack.c.bf16 %v824_v34, %v772_v31 }
  0x72   : > { %1348 = vrot.lane.b32.xlu0 %v867_v1, %s2536_s17 }
  0x73   : > { %1350 = vrot.lane.b32.xlu1 %v2793_v55, %s2536_s17 }
  0x76   : > { %1415 = vrot.lane.b32.xlu0 %v964_v4, %s2537_s18 }
  0x77   : > { %905 = vrot.lane.b32.xlu1 %v867_v1, %s2530_s30 }
  0x7a   : > { %1417 = vrot.lane.b32.xlu0 %v2821_v11, %s2537_s18 }
  0x7b   : > { %907 = vrot.lane.b32.xlu1 %v2793_v55, %s2530_s30 }
  0x7e   : > { %1002 = vrot.lane.b32.xlu0 %v964_v4, %s2531_s8 }
  0x7f   : > { %1004 = vrot.lane.b32.xlu1 %v2821_v11, %s2531_s8 }
  0x82   : > { %1084 = vrot.lane.b32.xlu0 %v2817_v8, %s2533_s10 }
  0x83   : > { %1086 = vrot.lane.b32.xlu1 %v2845_v33, %s2533_s10  ;;  %v894_v37 = vpop.permute.xlu0 %893 }
  0x84   : > { %942 = vst.msk [vmem:[#allocation3] sm:$0xff] %vm941_vm6, %v894_v37 }
  0x86   : > { %1151 = vrot.lane.b32.xlu0 %v2793_v55, %s2532_s9 }
  0x87   : > { %1153 = vrot.lane.b32.xlu1 %v2823_v12, %s2532_s9 }
  0x88   : > { %v991_v8 = vpop.permute.xlu1 %990 }
  0x89   : > { %1039 = vst.msk [vmem:[#allocation3] sm:$0xff] %vm1038_vm7, %v991_v8  ;;  %v600_v8 = vld [vmem:[#allocation2 + $0x100] sm:$0xff] }
  0x8a   : > { %1218 = vrot.lane.b32.xlu0 %v2821_v11, %s2534_s13 }
  0x8b   : > { %1220 = vrot.lane.b32.xlu1 %v2855_v38, %s2534_s13 }
  0x8e   : > { %1285 = vrot.lane.b32.xlu0 %v2845_v33, %s2535_s16 }
  0x8f   : > { %1287 = vrot.lane.b32.xlu1 %v2864_v44, %s2535_s16 }
  0x90   : > { %v896_v55 = vpop.permute.xlu0 %895 }
  0x91   : > { %943 = vst.msk [vmem:[#allocation3 + $0x8] sm:$0xff] %vm941_vm6, %v896_v55  ;;  %v1142_v39 = vpop.permute.xlu1 %1141  ;;  %v601_v55 = vld [vmem:[#allocation2 + $0x108] sm:$0xff] }
  0x92   : > { %1352 = vrot.lane.b32.xlu0 %v2823_v12, %s2536_s17 }
  0x93   : > { %1354 = vrot.lane.b32.xlu1 %v2839_v27, %s2536_s17 }
  0x94   : > { %v1140_v11 = vpop.permute.xlu0 %1139 }
  0x95   : > { %v993_v40 = vpop.permute.xlu1 %992 }
  0x96   : > { %1419 = vrot.lane.b32.xlu0 %v2855_v38, %s2537_s18  ;;  %1040 = vst.msk [vmem:[#allocation3 + $0x8] sm:$0xff] %vm1038_vm7, %v993_v40  ;;  %v625_v40 = vrot.slane %v600_v8, 7 }
  0x97   : > { %909 = vrot.lane.b32.xlu1 %v2823_v12, %s2530_s30 }
  0x98   : > { %v1073_v33 = vpop.permute.xlu0 %1072 }
  0x99   : > { %1121 = vst.msk [vmem:[#allocation3] sm:$0xff] %vm1120_vm8, %v1073_v33  ;;  %v1075_v41 = vpop.permute.xlu1 %1074  ;;  %v643_v33 = vrot.slane %v601_v55, 7 }
  0x9a   : > { %1421 = vrot.lane.b32.xlu0 %v2882_v61, %s2537_s18  ;;  %1188 = vst.msk [vmem:[#allocation3] sm:$0xff] %vm1187_vm9, %v1140_v11 }
  0x9b   : > { %1122 = vst.msk [vmem:[#allocation3 + $0x8] sm:$0xff] %vm1120_vm8, %v1075_v41  ;;  %911 = vrot.lane.b32.xlu1 %v2839_v27, %s2530_s30 }
  0x9c   : > { %v1207_v45 = vpop.permute.xlu0 %1206  ;;  %1189 = vst.msk [vmem:[#allocation3 + $0x8] sm:$0xff] %vm1187_vm9, %v1142_v39 }
  0x9d   : > { %1255 = vst.msk [vmem:[#allocation3] sm:$0xff] %vm1254_vm10, %v1207_v45  ;;  %v1209_v12 = vpop.permute.xlu1 %1208 }
  0x9e   : > { %1006 = vrot.lane.b32.xlu0 %v2855_v38, %s2531_s8  ;;  %1256 = vst.msk [vmem:[#allocation3 + $0x8] sm:$0xff] %vm1254_vm10, %v1209_v12  ;;  %v680_v12 = vsel %vm645_vm2, %v643_v33, %v625_v40 }
  0x9f   : > { %1008 = vrot.lane.b32.xlu1 %v2882_v61, %s2531_s8 }
  0xa0   : > { %v1274_v21 = vpop.permute.xlu0 %1273 }
  0xa1   : > { %1322 = vst.msk [vmem:[#allocation3] sm:$0xff] %vm1321_vm11, %v1274_v21  ;;  %v1276_v46 = vpop.permute.xlu1 %1275 }
  0xa2   : > { %1088 = vrot.lane.b32.xlu0 %v2864_v44, %s2533_s10  ;;  %1323 = vst.msk [vmem:[#allocation3 + $0x8] sm:$0xff] %vm1321_vm11, %v1276_v46  ;;  %v714_v46 = vsel %vm607_vm4, 0.0, %v680_v12 }
  0xa3   : > { %1090 = vrot.lane.b32.xlu1 %v2892_v5, %s2533_s10 }
  0xa4   : > { %v1341_v38 = vpop.permute.xlu0 %1340 }
  0xa5   : > { %1389 = vst.msk [vmem:[#allocation3] sm:$0xff] %vm1388_vm12, %v1341_v38  ;;  %v1343_v47 = vpop.permute.xlu1 %1342 }
  0xa6   : > { %1155 = vrot.lane.b32.xlu0 %v2839_v27, %s2532_s9  ;;  %1390 = vst.msk [vmem:[#allocation3 + $0x8] sm:$0xff] %vm1388_vm12, %v1343_v47  ;;  %v736_v47 = vrot.slane %v600_v8, 1 }
  0xa7   : > { %1157 = vrot.lane.b32.xlu1 %v2880_v57, %s2532_s9 }
  0xa8   : > { %v1408_v44 = vpop.permute.xlu0 %1407 }
  0xa9   : > { %1456 = vst.msk [vmem:[#allocation3] sm:$0xff] %vm1455_vm13, %v1408_v44  ;;  %v898_v53 = vpop.permute.xlu1 %897  ;;  %v754_v44 = vrot.slane %v601_v55, 1 }
  0xaa   : > { %1222 = vrot.lane.b32.xlu0 %v2882_v61, %s2534_s13  ;;  %944 = vst.msk [vmem:[#allocation3 + $0x10] sm:$0xff] %vm941_vm6, %v898_v53  ;;  %v602_v53 = vld [vmem:[#allocation2 + $0x110] sm:$0xff] }
  0xab   : > { %1224 = vrot.lane.b32.xlu1 %v2908_v22, %s2534_s13 }
  0xac   : > { %v1410_v50 = vpop.permute.xlu0 %1409 }
  0xad   : > { %1457 = vst.msk [vmem:[#allocation3 + $0x8] sm:$0xff] %vm1455_vm13, %v1410_v50  ;;  %v900_v27 = vpop.permute.xlu1 %899  ;;  %v603_v50 = vld [vmem:[#allocation2 + $0x118] sm:$0xff] }
  0xae   : > { %1289 = vrot.lane.b32.xlu0 %v2892_v5, %s2535_s16  ;;  %945 = vst.msk [vmem:[#allocation3 + $0x18] sm:$0xff] %vm941_vm6, %v900_v27 }
  0xaf   : > { %1291 = vrot.lane.b32.xlu1 %v2916_v29, %s2535_s16 }
  0xb0   : > { %v995_v7 = vpop.permute.xlu0 %994  ;;  %v1472_v61 = vld [vmem:[#allocation3] sm:$0xff] }
  0xb1   : > { %1041 = vst.msk [vmem:[#allocation3 + $0x10] sm:$0xff] %vm1038_vm7, %v995_v7  ;;  %2429 = vmatprep.mubr.msk.bf16.mxu0 %vm1515_vm14, %v1472_v61  ;;  %v997_v58 = vpop.permute.xlu1 %996 }
  0xb2   : > { %1356 = vrot.lane.b32.xlu0 %v2880_v57, %s2536_s17  ;;  %1042 = vst.msk [vmem:[#allocation3 + $0x18] sm:$0xff] %vm1038_vm7, %v997_v58  ;;  %v626_v58 = vrot.slane %v602_v53, 7 }
  0xb3   : > { %1358 = vrot.lane.b32.xlu1 %v2912_v23, %s2536_s17 }
  0xb4   : > { %v1077_v5 = vpop.permute.xlu0 %1076  ;;  %v1473_v1 = vld [vmem:[#allocation3 + $0x8] sm:$0xff] }
  0xb5   : > { %1123 = vst.msk [vmem:[#allocation3 + $0x10] sm:$0xff] %vm1120_vm8, %v1077_v5  ;;  %2430 = vmatmul.mubr.msk.bf16.vlgmr.msra.gmra.mrb[0].mxu0 %vm1515_vm14, %v1473_v1  ;;  %v1079_v43 = vpop.permute.xlu1 %1078  ;;  %v644_v5 = vrot.slane %v603_v50, 7 }
  0xb6   : > { %1423 = vrot.lane.b32.xlu0 %v2908_v22, %s2537_s18  ;;  %1124 = vst.msk [vmem:[#allocation3 + $0x18] sm:$0xff] %vm1120_vm8, %v1079_v43  ;;  %v1137_v43 = vpack.c.bf16 %v601_v55, %v600_v8 }
  0xb7   : > { %913 = vrot.lane.b32.xlu1 %v2880_v57, %s2530_s30 }
  0xb8   : > { %v1144_v42 = vpop.permute.xlu0 %1143 }
  0xb9   : > { %1190 = vst.msk [vmem:[#allocation3 + $0x10] sm:$0xff] %vm1187_vm9, %v1144_v42  ;;  %v1146_v60 = vpop.permute.xlu1 %1145  ;;  %v773_v42 = vsel %vm756_vm1, %v736_v47, %v754_v44 }
  0xba   : > { %1425 = vrot.lane.b32.xlu0 %v2946_v48, %s2537_s18  ;;  %1191 = vst.msk [vmem:[#allocation3 + $0x18] sm:$0xff] %vm1187_vm9, %v1146_v60 }
  0xbb   : > { %915 = vrot.lane.b32.xlu1 %v2912_v23, %s2530_s30 }
  0xbc   : > { %v1211_v63 = vpop.permute.xlu0 %1210 }
  0xbd   : > { %1257 = vst.msk [vmem:[#allocation3 + $0x10] sm:$0xff] %vm1254_vm10, %v1211_v63  ;;  %v1213_v4 = vpop.permute.xlu1 %1212  ;;  %v681_v63 = vsel %vm645_vm2, %v644_v5, %v626_v58 }
  0xbe   : > { %1010 = vrot.lane.b32.xlu0 %v2908_v22, %s2531_s8  ;;  %1258 = vst.msk [vmem:[#allocation3 + $0x18] sm:$0xff] %vm1254_vm10, %v1213_v4 }
  0xbf   : > { %1012 = vrot.lane.b32.xlu1 %v2946_v48, %s2531_s8 }
  0xc0   : > { %v1278_v57 = vpop.permute.xlu0 %1277 }
  0xc1   : > { %1324 = vst.msk [vmem:[#allocation3 + $0x10] sm:$0xff] %vm1321_vm11, %v1278_v57  ;;  %v1280_v24 = vpop.permute.xlu1 %1279 }
  0xc2   : > { %1092 = vrot.lane.b32.xlu0 %v2916_v29, %s2533_s10  ;;  %1325 = vst.msk [vmem:[#allocation3 + $0x18] sm:$0xff] %vm1321_vm11, %v1280_v24  ;;  %v663_v24 = vsel %vm645_vm2, %v626_v58, %v644_v5 }
  0xc3   : > { %1094 = vrot.lane.b32.xlu1 %v2948_v52, %s2533_s10 }
  0xc4   : > { %v1345_v28 = vpop.permute.xlu0 %1344 }
  0xc5   : > { %1391 = vst.msk [vmem:[#allocation3 + $0x10] sm:$0xff] %vm1388_vm12, %v1345_v28  ;;  %v1347_v22 = vpop.permute.xlu1 %1346  ;;  %v716_v28 = vsel %vm607_vm4, 0.0, %v681_v63 }
  0xc6   : > { %1159 = vrot.lane.b32.xlu0 %v2912_v23, %s2532_s9  ;;  %1392 = vst.msk [vmem:[#allocation3 + $0x18] sm:$0xff] %vm1388_vm12, %v1347_v22 }
  0xc7   : > { %1161 = vrot.lane.b32.xlu1 %v2960_v56, %s2532_s9 }
  0xc8   : > { %v1412_v51 = vpop.permute.xlu0 %1411 }
  0xc9   : > { %1458 = vst.msk [vmem:[#allocation3 + $0x10] sm:$0xff] %vm1455_vm13, %v1412_v51  ;;  %v902_v29 = vpop.permute.xlu1 %901  ;;  %v755_v51 = vrot.slane %v603_v50, 1 }
  0xca   : > { %1226 = vrot.lane.b32.xlu0 %v2946_v48, %s2534_s13  ;;  %946 = vst.msk [vmem:[#allocation3 + $0x20] sm:$0xff] %vm941_vm6, %v902_v29 }
  0xcb   : > { %1228 = vrot.lane.b32.xlu1 %v2971_v0, %s2534_s13 }
  0xcc   : > { %v1414_v59 = vpop.permute.xlu0 %1413 }
  0xcd   : > { %1459 = vst.msk [vmem:[#allocation3 + $0x18] sm:$0xff] %vm1455_vm13, %v1414_v59  ;;  %v904_v23 = vpop.permute.xlu1 %903  ;;  %v1271_v59 = vpack.c.bf16 %v663_v24, %v716_v28 }
  0xce   : > { %1293 = vrot.lane.b32.xlu0 %v2948_v52, %s2535_s16  ;;  %947 = vst.msk [vmem:[#allocation3 + $0x28] sm:$0xff] %vm941_vm6, %v904_v23 }
  0xcf   : > { %1295 = vrot.lane.b32.xlu1 %v2984_v14, %s2535_s16 }
  0xd0   : > { %v999_v9 = vpop.permute.xlu0 %998  ;;  %v1474_v13 = vld [vmem:[#allocation3 + $0x10] sm:$0xff] }
  0xd1   : > { %1043 = vst.msk [vmem:[#allocation3 + $0x20] sm:$0xff] %vm1038_vm7, %v999_v9  ;;  %2433 = vmatprep.mubr.msk.bf16.mxu0 %vm1515_vm14, %v1474_v13  ;;  %v1001_v48 = vpop.permute.xlu1 %1000 }
  0xd2   : > { %1360 = vrot.lane.b32.xlu0 %v2960_v56, %s2536_s17  ;;  %1044 = vst.msk [vmem:[#allocation3 + $0x28] sm:$0xff] %vm1038_vm7, %v1001_v48  ;;  %v1338_v48 = vpack.c.bf16 %v603_v50, %v602_v53 }
  0xd3   : > { %1362 = vrot.lane.b32.xlu1 %v2995_v17, %s2536_s17 }
  0xd4   : > { %v1081_v52 = vpop.permute.xlu0 %1080  ;;  %v1475_v6 = vld [vmem:[#allocation3 + $0x18] sm:$0xff] }
  0xd5   : > { %1125 = vst.msk [vmem:[#allocation3 + $0x20] sm:$0xff] %vm1120_vm8, %v1081_v52  ;;  %2434 = vmatmul.mubr.msk.bf16.gmra.mrb[4].mxu0 %vm1515_vm14, %v1475_v6  ;;  %v1083_v15 = vpop.permute.xlu1 %1082 }
  0xd6   : > { %1427 = vrot.lane.b32.xlu0 %v2971_v0, %s2537_s18  ;;  %1126 = vst.msk [vmem:[#allocation3 + $0x28] sm:$0xff] %vm1120_vm8, %v1083_v15 }
  0xd7   : > { %917 = vrot.lane.b32.xlu1 %v2960_v56, %s2530_s30 }
  0xd8   : > { %v1148_v16 = vpop.permute.xlu0 %1147 }
  0xd9   : > { %1192 = vst.msk [vmem:[#allocation3 + $0x20] sm:$0xff] %vm1187_vm9, %v1148_v16  ;;  %v1150_v32 = vpop.permute.xlu1 %1149 }
  0xda   : > { %1429 = vrot.lane.b32.xlu0 %v3014_v36, %s2537_s18  ;;  %1193 = vst.msk [vmem:[#allocation3 + $0x28] sm:$0xff] %vm1187_vm9, %v1150_v32 }
  0xdb   : > { %919 = vrot.lane.b32.xlu1 %v2995_v17, %s2530_s30 }
  0xdc   : > { %v1215_v18 = vpop.permute.xlu0 %1214 }
  0xdd   : > { %1259 = vst.msk [vmem:[#allocation3 + $0x20] sm:$0xff] %vm1254_vm10, %v1215_v18  ;;  %v1217_v20 = vpop.permute.xlu1 %1216 }
  0xde   : > { %1014 = vrot.lane.b32.xlu0 %v2971_v0, %s2531_s8  ;;  %1260 = vst.msk [vmem:[#allocation3 + $0x28] sm:$0xff] %vm1254_vm10, %v1217_v20 }
  0xdf   : > { %1016 = vrot.lane.b32.xlu1 %v3014_v36, %s2531_s8 }
  0xe0   : > { %v1282_v56 = vpop.permute.xlu0 %1281 }
  0xe1   : > { %1326 = vst.msk [vmem:[#allocation3 + $0x20] sm:$0xff] %vm1321_vm11, %v1282_v56  ;;  %v1284_v26 = vpop.permute.xlu1 %1283 }
  0xe2   : > { %1096 = vrot.lane.b32.xlu0 %v2984_v14, %s2533_s10  ;;  %1327 = vst.msk [vmem:[#allocation3 + $0x28] sm:$0xff] %vm1321_vm11, %v1284_v26 }
  0xe3   : > { %1098 = vrot.lane.b32.xlu1 %v3034_v62, %s2533_s10 }
  0xe4   : > { %v1349_v30 = vpop.permute.xlu0 %1348 }
  0xe5   : > { %1393 = vst.msk [vmem:[#allocation3 + $0x20] sm:$0xff] %vm1388_vm12, %v1349_v30  ;;  %v1351_v0 = vpop.permute.xlu1 %1350 }
  0xe6   : > { %1163 = vrot.lane.b32.xlu0 %v2995_v17, %s2532_s9  ;;  %1394 = vst.msk [vmem:[#allocation3 + $0x28] sm:$0xff] %vm1388_vm12, %v1351_v0 }
  0xe7   : > { %1165 = vrot.lane.b32.xlu1 %v3049_v54, %s2532_s9 }
  0xe8   : > { %v1416_v49 = vpop.permute.xlu0 %1415 }
  0xe9   : > { %1460 = vst.msk [vmem:[#allocation3 + $0x20] sm:$0xff] %vm1455_vm13, %v1416_v49  ;;  %v906_v14 = vpop.permute.xlu1 %905 }
  0xea   : > { %1230 = vrot.lane.b32.xlu0 %v3014_v36, %s2534_s13  ;;  %948 = vst.msk [vmem:[#allocation3 + $0x30] sm:$0xff] %vm941_vm6, %v906_v14 }
  0xeb   : > { %1232 = vrot.lane.b32.xlu1 %v3059_v10, %s2534_s13 }
  0xec   : > { %v1418_v31 = vpop.permute.xlu0 %1417 }
  0xed   : > { %1461 = vst.msk [vmem:[#allocation3 + $0x28] sm:$0xff] %vm1455_vm13, %v1418_v31  ;;  %v908_v17 = vpop.permute.xlu1 %907 }
  0xee   : > { %1297 = vrot.lane.b32.xlu0 %v3034_v62, %s2535_s16  ;;  %949 = vst.msk [vmem:[#allocation3 + $0x38] sm:$0xff] %vm941_vm6, %v908_v17 }
  0xef   : > { %1299 = vrot.lane.b32.xlu1 %v3070_v19, %s2535_s16 }
  0xf0   : > { %v1003_v34 = vpop.permute.xlu0 %1002  ;;  %v1476_v37 = vld [vmem:[#allocation3 + $0x20] sm:$0xff] }
  0xf1   : > { %1045 = vst.msk [vmem:[#allocation3 + $0x30] sm:$0xff] %vm1038_vm7, %v1003_v34  ;;  %2437 = vmatprep.mubr.msk.bf16.mxu0 %vm1515_vm14, %v1476_v37  ;;  %v1005_v36 = vpop.permute.xlu1 %1004 }
  0xf2   : > { %1364 = vrot.lane.b32.xlu0 %v3049_v54, %s2536_s17  ;;  %1046 = vst.msk [vmem:[#allocation3 + $0x38] sm:$0xff] %vm1038_vm7, %v1005_v36 }
  0xf3   : > { %1366 = vrot.lane.b32.xlu1 %v3077_v25, %s2536_s17 }
  0xf4   : > { %v1085_v62 = vpop.permute.xlu0 %1084  ;;  %v1477_v39 = vld [vmem:[#allocation3 + $0x28] sm:$0xff] }
  0xf5   : > { %1127 = vst.msk [vmem:[#allocation3 + $0x30] sm:$0xff] %vm1120_vm8, %v1085_v62  ;;  %2438 = vmatmul.mubr.msk.bf16.gmra.mrb[8].mxu0 %vm1515_vm14, %v1477_v39  ;;  %v1087_v11 = vpop.permute.xlu1 %1086 }
  0xf6   : > { %1431 = vrot.lane.b32.xlu0 %v3059_v10, %s2537_s18  ;;  %1128 = vst.msk [vmem:[#allocation3 + $0x38] sm:$0xff] %vm1120_vm8, %v1087_v11 }
  0xf7   : > { %921 = vrot.lane.b32.xlu1 %v3049_v54, %s2530_s30  ;;  %v662_v54 = vsel %vm645_vm2, %v625_v40, %v643_v33 }
  0xf8   : > { %v1152_v41 = vpop.permute.xlu0 %1151  ;;  %v1055_v7 = vpack.c.bf16 %v662_v54, %v714_v46 }
  0xf9   : > { %1194 = vst.msk [vmem:[#allocation3 + $0x30] sm:$0xff] %vm1187_vm9, %v1152_v41  ;;  %v1154_v45 = vpop.permute.xlu1 %1153 }
  0xfa   : > { %1433 = vrot.lane.b32.xlu0 %v3093_v35, %s2537_s18  ;;  %1195 = vst.msk [vmem:[#allocation3 + $0x38] sm:$0xff] %vm1187_vm9, %v1154_v45 }
  0xfb   : > { %923 = vrot.lane.b32.xlu1 %v3077_v25, %s2530_s30 }
  0xfc   : > { %v1219_v21 = vpop.permute.xlu0 %1218 }
  0xfd   : > { %1261 = vst.msk [vmem:[#allocation3 + $0x30] sm:$0xff] %vm1254_vm10, %v1219_v21  ;;  %v1221_v38 = vpop.permute.xlu1 %1220 }
  0xfe   : > { %1018 = vrot.lane.b32.xlu0 %v3059_v10, %s2531_s8  ;;  %1262 = vst.msk [vmem:[#allocation3 + $0x38] sm:$0xff] %vm1254_vm10, %v1221_v38  ;;  %v791_v10 = vsel %vm756_vm1, %v754_v44, %v736_v47 }
  0xff   : > { %1020 = vrot.lane.b32.xlu1 %v3093_v35, %s2531_s8  ;;  %v826_v60 = vsel %vm719_vm3, 0.0, %v791_v10  ;;  %s473_s8 = scalar_lea.vmem %s3495_s6, %s3502_s24 }
 0x100   : > { %v1286_v27 = vpop.permute.xlu0 %1285  ;;  %v1204_v57 = vpack.c.bf16 %v826_v60, %v773_v42 }
 0x101   : > { %1328 = vst.msk [vmem:[#allocation3 + $0x30] sm:$0xff] %vm1321_vm11, %v1286_v27  ;;  %v1288_v61 = vpop.permute.xlu1 %1287 }
 0x102   : > { %1100 = vrot.lane.b32.xlu0 %v3070_v19, %s2533_s10  ;;  %1329 = vst.msk [vmem:[#allocation3 + $0x38] sm:$0xff] %vm1321_vm11, %v1288_v61 }
 0x103   : > { %1102 = vrot.lane.b32.xlu1 %v1055_v7, %s2533_s10 }
 0x104   : > { %v1353_v1 = vpop.permute.xlu0 %1352 }
 0x105   : > { %1395 = vst.msk [vmem:[#allocation3 + $0x30] sm:$0xff] %vm1388_vm12, %v1353_v1  ;;  %v1355_v19 = vpop.permute.xlu1 %1354 }
 0x106   : > { %1167 = vrot.lane.b32.xlu0 %v3077_v25, %s2532_s9  ;;  %1396 = vst.msk [vmem:[#allocation3 + $0x38] sm:$0xff] %vm1388_vm12, %v1355_v19  ;;  %v737_v25 = vrot.slane %v602_v53, 1 }
 0x107   : > { %1169 = vrot.lane.b32.xlu1 %v1137_v43, %s2532_s9 }
 0x108   : > { %v1420_v4 = vpop.permute.xlu0 %1419  ;;  %v792_v9 = vsel %vm756_vm1, %v755_v51, %v737_v25  ;;  %v774_v52 = vsel %vm756_vm1, %v737_v25, %v755_v51 }
 0x109   : > { %1462 = vst.msk [vmem:[#allocation3 + $0x30] sm:$0xff] %vm1455_vm13, %v1420_v4  ;;  %v910_v22 = vpop.permute.xlu1 %909  ;;  %v828_v6 = vsel %vm719_vm3, 0.0, %v792_v9 }
 0x10a   : > { %1234 = vrot.lane.b32.xlu0 %v3093_v35, %s2534_s13  ;;  %950 = vst.msk [vmem:[#allocation3 + $0x40] sm:$0xff] %vm941_vm6, %v910_v22  ;;  %v1405_v18 = vpack.c.bf16 %v828_v6, %v774_v52 }
 0x10b   : > { %1236 = vrot.lane.b32.xlu1 %v1204_v57, %s2534_s13 }
 0x10c   : > { %v1422_v29 = vpop.permute.xlu0 %1421 }
 0x10d   : > { %1463 = vst.msk [vmem:[#allocation3 + $0x38] sm:$0xff] %vm1455_vm13, %v1422_v29  ;;  %v912_v23 = vpop.permute.xlu1 %911 }
 0x10e   : > { %1301 = vrot.lane.b32.xlu0 %v1055_v7, %s2535_s16  ;;  %951 = vst.msk [vmem:[#allocation3 + $0x48] sm:$0xff] %vm941_vm6, %v912_v23 }
 0x10f   : > { %1303 = vrot.lane.b32.xlu1 %v1271_v59, %s2535_s16 }
 0x110   : > { %v1007_v35 = vpop.permute.xlu0 %1006  ;;  %v1478_v13 = vld [vmem:[#allocation3 + $0x30] sm:$0xff] }
 0x111   : > { %1047 = vst.msk [vmem:[#allocation3 + $0x40] sm:$0xff] %vm1038_vm7, %v1007_v35  ;;  %2441 = vmatprep.mubr.msk.bf16.mxu0 %vm1515_vm14, %v1478_v13  ;;  %v1009_v15 = vpop.permute.xlu1 %1008 }
 0x112   : > { %1368 = vrot.lane.b32.xlu0 %v1137_v43, %s2536_s17  ;;  %1048 = vst.msk [vmem:[#allocation3 + $0x48] sm:$0xff] %vm1038_vm7, %v1009_v15 }
 0x113   : > { %1370 = vrot.lane.b32.xlu1 %v1338_v48, %s2536_s17 }
 0x114   : > { %v1089_v16 = vpop.permute.xlu0 %1088  ;;  %v1479_v32 = vld [vmem:[#allocation3 + $0x38] sm:$0xff] }
 0x115   : > { %1129 = vst.msk [vmem:[#allocation3 + $0x40] sm:$0xff] %vm1120_vm8, %v1089_v16  ;;  %2442 = vmatmul.mubr.msk.bf16.gmra.mrb[12].mxu0 %vm1515_vm14, %v1479_v32  ;;  %v1091_v20 = vpop.permute.xlu1 %1090 }
 0x116   : > { %1435 = vrot.lane.b32.xlu0 %v1204_v57, %s2537_s18  ;;  %1130 = vst.msk [vmem:[#allocation3 + $0x48] sm:$0xff] %vm1120_vm8, %v1091_v20 }
 0x117   : > { %1437 = vrot.lane.b32.xlu1 %v1405_v18, %s2537_s18  ;;  %v3411_v18 = vld [vmem:[%s3493_s4] ss:$0 sm:$0xff] }
 0x118   : > { %v1156_v2 = vpop.permute.xlu0 %1155 }
 0x119   : > { %1196 = vst.msk [vmem:[#allocation3 + $0x40] sm:$0xff] %vm1187_vm9, %v1156_v2  ;;  %v1158_v3 = vpop.permute.xlu1 %1157 }
 0x11a   : > { %1197 = vst.msk [vmem:[#allocation3 + $0x48] sm:$0xff] %vm1187_vm9, %v1158_v3 }
 0x11c   : > { %v1223_v56 = vpop.permute.xlu0 %1222 }
 0x11d   : > { %1263 = vst.msk [vmem:[#allocation3 + $0x40] sm:$0xff] %vm1254_vm10, %v1223_v56  ;;  %v1225_v26 = vpop.permute.xlu1 %1224 }
 0x11e   : > { %1264 = vst.msk [vmem:[#allocation3 + $0x48] sm:$0xff] %vm1254_vm10, %v1225_v26 }
 0x120   : > { %v1290_v30 = vpop.permute.xlu0 %1289 }
 0x121   : > { %1330 = vst.msk [vmem:[#allocation3 + $0x40] sm:$0xff] %vm1321_vm11, %v1290_v30  ;;  %v1292_v0 = vpop.permute.xlu1 %1291 }
 0x122   : > { %1331 = vst.msk [vmem:[#allocation3 + $0x48] sm:$0xff] %vm1321_vm11, %v1292_v0 }
 0x124   : > { %v1357_v49 = vpop.permute.xlu0 %1356 }
 0x125   : > { %1397 = vst.msk [vmem:[#allocation3 + $0x40] sm:$0xff] %vm1388_vm12, %v1357_v49  ;;  %v1359_v14 = vpop.permute.xlu1 %1358 }
 0x126   : > { %1398 = vst.msk [vmem:[#allocation3 + $0x48] sm:$0xff] %vm1388_vm12, %v1359_v14 }
 0x128   : > { %v1424_v31 = vpop.permute.xlu0 %1423 }
 0x129   : > { %1464 = vst.msk [vmem:[#allocation3 + $0x40] sm:$0xff] %vm1455_vm13, %v1424_v31  ;;  %v914_v17 = vpop.permute.xlu1 %913 }
 0x12a   : > { %952 = vst.msk [vmem:[#allocation3 + $0x50] sm:$0xff] %vm941_vm6, %v914_v17 }
 0x12c   : > { %v1426_v34 = vpop.permute.xlu0 %1425 }
 0x12d   : > { %1465 = vst.msk [vmem:[#allocation3 + $0x48] sm:$0xff] %vm1455_vm13, %v1426_v34  ;;  %v916_v37 = vpop.permute.xlu1 %915 }
 0x12e   : > { %953 = vst.msk [vmem:[#allocation3 + $0x58] sm:$0xff] %vm941_vm6, %v916_v37 }
 0x130   : > { %v1011_v36 = vpop.permute.xlu0 %1010  ;;  %v1480_v8 = vld [vmem:[#allocation3 + $0x40] sm:$0xff] }
 0x131   : > { %1049 = vst.msk [vmem:[#allocation3 + $0x50] sm:$0xff] %vm1038_vm7, %v1011_v36  ;;  %2445 = vmatprep.mubr.msk.bf16.mxu1 %vm1515_vm14, %v1480_v8  ;;  %v1013_v55 = vpop.permute.xlu1 %1012 }
 0x132   : > { %1050 = vst.msk [vmem:[#allocation3 + $0x58] sm:$0xff] %vm1038_vm7, %v1013_v55 }
 0x134   : > { %v1093_v62 = vpop.permute.xlu0 %1092  ;;  %v1481_v39 = vld [vmem:[#allocation3 + $0x48] sm:$0xff] }
 0x135   : > { %1131 = vst.msk [vmem:[#allocation3 + $0x50] sm:$0xff] %vm1120_vm8, %v1093_v62  ;;  %2446 = vmatmul.mubr.msk.bf16.vlgmr.msra.gmra.mrb[0].mxu1 %vm1515_vm14, %v1481_v39  ;;  %v1095_v11 = vpop.permute.xlu1 %1094 }
 0x136   : > { %1132 = vst.msk [vmem:[#allocation3 + $0x58] sm:$0xff] %vm1120_vm8, %v1095_v11 }
 0x138   : > { %v1160_v40 = vpop.permute.xlu0 %1159 }
 0x139   : > { %1198 = vst.msk [vmem:[#allocation3 + $0x50] sm:$0xff] %vm1187_vm9, %v1160_v40  ;;  %v1162_v33 = vpop.permute.xlu1 %1161 }
 0x13a   : > { %1199 = vst.msk [vmem:[#allocation3 + $0x58] sm:$0xff] %vm1187_vm9, %v1162_v33 }
 0x13c   : > { %v1227_v41 = vpop.permute.xlu0 %1226 }
 0x13d   : > { %1265 = vst.msk [vmem:[#allocation3 + $0x50] sm:$0xff] %vm1254_vm10, %v1227_v41  ;;  %v1229_v45 = vpop.permute.xlu1 %1228 }
 0x13e   : > { %1266 = vst.msk [vmem:[#allocation3 + $0x58] sm:$0xff] %vm1254_vm10, %v1229_v45 }
 0x140   : > { %v1294_v12 = vpop.permute.xlu0 %1293 }
 0x141   : > { %1332 = vst.msk [vmem:[#allocation3 + $0x50] sm:$0xff] %vm1321_vm11, %v1294_v12  ;;  %v1296_v21 = vpop.permute.xlu1 %1295 }
 0x142   : > { %1333 = vst.msk [vmem:[#allocation3 + $0x58] sm:$0xff] %vm1321_vm11, %v1296_v21 }
 0x144   : > { %v1361_v54 = vpop.permute.xlu0 %1360 }
 0x145   : > { %1399 = vst.msk [vmem:[#allocation3 + $0x50] sm:$0xff] %vm1388_vm12, %v1361_v54  ;;  %v1363_v46 = vpop.permute.xlu1 %1362 }
 0x146   : > { %1400 = vst.msk [vmem:[#allocation3 + $0x58] sm:$0xff] %vm1388_vm12, %v1363_v46 }
 0x148   : > { %v1428_v38 = vpop.permute.xlu0 %1427 }
 0x149   : > { %1466 = vst.msk [vmem:[#allocation3 + $0x50] sm:$0xff] %vm1455_vm13, %v1428_v38  ;;  %v918_v47 = vpop.permute.xlu1 %917 }
 0x14a   : > { %954 = vst.msk [vmem:[#allocation3 + $0x60] sm:$0xff] %vm941_vm6, %v918_v47 }
 0x14c   : > { %v1430_v44 = vpop.permute.xlu0 %1429 }
 0x14d   : > { %1467 = vst.msk [vmem:[#allocation3 + $0x58] sm:$0xff] %vm1455_vm13, %v1430_v44  ;;  %v920_v53 = vpop.permute.xlu1 %919 }
 0x14e   : > { %955 = vst.msk [vmem:[#allocation3 + $0x68] sm:$0xff] %vm941_vm6, %v920_v53 }
 0x150   : > { %v1015_v50 = vpop.permute.xlu0 %1014  ;;  %v1482_v27 = vld [vmem:[#allocation3 + $0x50] sm:$0xff] }
 0x151   : > { %1051 = vst.msk [vmem:[#allocation3 + $0x60] sm:$0xff] %vm1038_vm7, %v1015_v50  ;;  %2449 = vmatprep.mubr.msk.bf16.mxu1 %vm1515_vm14, %v1482_v27  ;;  %v1017_v7 = vpop.permute.xlu1 %1016 }
 0x152   : > { %1052 = vst.msk [vmem:[#allocation3 + $0x68] sm:$0xff] %vm1038_vm7, %v1017_v7 }
 0x154   : > { %v1097_v61 = vpop.permute.xlu0 %1096  ;;  %v1483_v10 = vld [vmem:[#allocation3 + $0x58] sm:$0xff] }
 0x155   : > { %1133 = vst.msk [vmem:[#allocation3 + $0x60] sm:$0xff] %vm1120_vm8, %v1097_v61  ;;  %2450 = vmatmul.mubr.msk.bf16.gmra.mrb[4].mxu1 %vm1515_vm14, %v1483_v10  ;;  %v1099_v58 = vpop.permute.xlu1 %1098 }
 0x156   : > { %1134 = vst.msk [vmem:[#allocation3 + $0x68] sm:$0xff] %vm1120_vm8, %v1099_v58 }
 0x158   : > { %v1164_v5 = vpop.permute.xlu0 %1163 }
 0x159   : > { %1200 = vst.msk [vmem:[#allocation3 + $0x60] sm:$0xff] %vm1187_vm9, %v1164_v5  ;;  %v1166_v1 = vpop.permute.xlu1 %1165 }
 0x15a   : > { %1201 = vst.msk [vmem:[#allocation3 + $0x68] sm:$0xff] %vm1187_vm9, %v1166_v1 }
 0x15c   : > { %v1231_v43 = vpop.permute.xlu0 %1230 }
 0x15d   : > { %1267 = vst.msk [vmem:[#allocation3 + $0x60] sm:$0xff] %vm1254_vm10, %v1231_v43  ;;  %v1233_v42 = vpop.permute.xlu1 %1232 }
 0x15e   : > { %1268 = vst.msk [vmem:[#allocation3 + $0x68] sm:$0xff] %vm1254_vm10, %v1233_v42 }
 0x160   : > { %v1298_v60 = vpop.permute.xlu0 %1297 }
 0x161   : > { %1334 = vst.msk [vmem:[#allocation3 + $0x60] sm:$0xff] %vm1321_vm11, %v1298_v60  ;;  %v1300_v19 = vpop.permute.xlu1 %1299 }
 0x162   : > { %1335 = vst.msk [vmem:[#allocation3 + $0x68] sm:$0xff] %vm1321_vm11, %v1300_v19 }
 0x164   : > { %v1365_v63 = vpop.permute.xlu0 %1364 }
 0x165   : > { %1401 = vst.msk [vmem:[#allocation3 + $0x60] sm:$0xff] %vm1388_vm12, %v1365_v63  ;;  %v1367_v4 = vpop.permute.xlu1 %1366 }
 0x166   : > { %1402 = vst.msk [vmem:[#allocation3 + $0x68] sm:$0xff] %vm1388_vm12, %v1367_v4 }
 0x168   : > { %v1432_v57 = vpop.permute.xlu0 %1431 }
 0x169   : > { %1468 = vst.msk [vmem:[#allocation3 + $0x60] sm:$0xff] %vm1455_vm13, %v1432_v57  ;;  %v922_v24 = vpop.permute.xlu1 %921 }
 0x16a   : > { %956 = vst.msk [vmem:[#allocation3 + $0x70] sm:$0xff] %vm941_vm6, %v922_v24 }
 0x16c   : > { %v1434_v28 = vpop.permute.xlu0 %1433 }
 0x16d   : > { %1469 = vst.msk [vmem:[#allocation3 + $0x68] sm:$0xff] %vm1455_vm13, %v1434_v28  ;;  %v924_v22 = vpop.permute.xlu1 %923 }
 0x16e   : > { %957 = vst.msk [vmem:[#allocation3 + $0x78] sm:$0xff] %vm941_vm6, %v924_v22 }
 0x170   : > { %v1019_v25 = vpop.permute.xlu0 %1018  ;;  %v1484_v51 = vld [vmem:[#allocation3 + $0x60] sm:$0xff] }
 0x171   : > { %1053 = vst.msk [vmem:[#allocation3 + $0x70] sm:$0xff] %vm1038_vm7, %v1019_v25  ;;  %2453 = vmatprep.mubr.msk.bf16.mxu1 %vm1515_vm14, %v1484_v51  ;;  %v1021_v29 = vpop.permute.xlu1 %1020 }
 0x172   : > { %1054 = vst.msk [vmem:[#allocation3 + $0x78] sm:$0xff] %vm1038_vm7, %v1021_v29 }
 0x174   : > { %v1485_v59 = vld [vmem:[#allocation3 + $0x68] sm:$0xff]  ;;  %v1101_v23 = vpop.permute.xlu0 %1100 }
 0x175   : > { %2454 = vmatmul.mubr.msk.bf16.gmra.mrb[8].mxu1 %vm1515_vm14, %v1485_v59  ;;  %1135 = vst.msk [vmem:[#allocation3 + $0x70] sm:$0xff] %vm1120_vm8, %v1101_v23  ;;  %v1103_v9 = vpop.permute.xlu1 %1102 }
 0x176   : > { %1136 = vst.msk [vmem:[#allocation3 + $0x78] sm:$0xff] %vm1120_vm8, %v1103_v9 }
 0x178   : > { %v1168_v35 = vpop.permute.xlu0 %1167 }
 0x179   : > { %1202 = vst.msk [vmem:[#allocation3 + $0x70] sm:$0xff] %vm1187_vm9, %v1168_v35  ;;  %v1170_v13 = vpop.permute.xlu1 %1169 }
 0x17a   : > { %1203 = vst.msk [vmem:[#allocation3 + $0x78] sm:$0xff] %vm1187_vm9, %v1170_v13 }
 0x17c   : > { %v1235_v48 = vpop.permute.xlu0 %1234 }
 0x17d   : > { %1269 = vst.msk [vmem:[#allocation3 + $0x70] sm:$0xff] %vm1254_vm10, %v1235_v48  ;;  %v1237_v52 = vpop.permute.xlu1 %1236 }
 0x17e   : > { %1270 = vst.msk [vmem:[#allocation3 + $0x78] sm:$0xff] %vm1254_vm10, %v1237_v52 }
 0x180   : > { %v1302_v6 = vpop.permute.xlu0 %1301 }
 0x181   : > { %1336 = vst.msk [vmem:[#allocation3 + $0x70] sm:$0xff] %vm1321_vm11, %v1302_v6  ;;  %v1304_v15 = vpop.permute.xlu1 %1303 }
 0x182   : > { %1337 = vst.msk [vmem:[#allocation3 + $0x78] sm:$0xff] %vm1321_vm11, %v1304_v15 }
 0x184   : > { %v1369_v16 = vpop.permute.xlu0 %1368 }
 0x185   : > { %1403 = vst.msk [vmem:[#allocation3 + $0x70] sm:$0xff] %vm1388_vm12, %v1369_v16  ;;  %v1371_v32 = vpop.permute.xlu1 %1370 }
 0x186   : > { %1404 = vst.msk [vmem:[#allocation3 + $0x78] sm:$0xff] %vm1388_vm12, %v1371_v32 }
 0x188   : > { %v2431_v20 = vpop.f32.mrb[0].mxu0  ;;  %v1436_v2 = vpop.permute.xlu0 %1435 }
 0x189   : > { %v1611_v3 = vadd.f32 %v2431_v20, %v3411_v18  ;;  %1470 = vst.msk [vmem:[#allocation3 + $0x70] sm:$0xff] %vm1455_vm13, %v1436_v2  ;;  %v1602_v56 = vpop.f32.mrb[1].mxu0  ;;  %v1438_v30 = vpop.permute.xlu1 %1437 }
 0x18a   : > { %v1603_v26 = vadd.f32 %v3411_v18, %v1602_v56  ;;  %v2432_v0 = vpop.f32.mrb[2].mxu0  ;;  %1471 = vst.msk [vmem:[#allocation3 + $0x78] sm:$0xff] %vm1455_vm13, %v1438_v30 }
 0x18b   : > { %v1614_v49 = vadd.f32 %v2432_v0, %v3411_v18  ;;  %v1605_v14 = vpop.f32.mrb[3].mxu0  ;;  %v1929_v55 = vmul.f32 %v1611_v3, %v1611_v3 }
 0x18c   : > { %v1606_v31 = vadd.f32 %v3411_v18, %v1605_v14  ;;  %v1927_v34 = vmul.f32 %v1603_v26, %v1603_v26 }
 0x18d   : > { %v2317_v17 = vpack.c.bf16 %v1614_v49, %v1611_v3  ;;  %v1930_v40 = vmul.f32 %v1614_v49, %v1614_v49 }
 0x18e   : > { %v2312_v37 = vpack.c.bf16 %v1606_v31, %v1603_v26  ;;  %v1889_v36 = vadd.f32 %v1606_v31, %v1603_v26  ;;  %v1928_v8 = vmul.f32 %v1606_v31, %v1606_v31 }
 0x18f   : > { %2389 = vst [vmem:[%s3423_s28 + $0x8] sm:$0xff] %v2317_v17  }
 0x190   : > { %2313 = vst [vmem:[%s3423_s28] sm:$0xff] %v2312_v37   ;;  %v1890_v62 = vadd.f32 %v1889_v36, %v1611_v3  ;;  %v1959_v39 = vadd.f32 %v1928_v8, %v1927_v34  ;;  %v1486_v11 = vld [vmem:[#allocation3 + $0x70] sm:$0xff] }
 0x191   : > { %2457 = vmatprep.mubr.msk.bf16.mxu1 %vm1515_vm14, %v1486_v11  ;;  %v1487_v41 = vld [vmem:[#allocation3 + $0x78] sm:$0xff] }
 0x192   : > { %v1960_v33 = vadd.f32 %v1959_v39, %v1929_v55  ;;  %v1891_v45 = vadd.f32 %v1890_v62, %v1614_v49  ;;  %2458 = vmatmul.mubr.msk.bf16.gmra.mrb[12].mxu1 %vm1515_vm14, %v1487_v41 }
 0x194   : > { %v1961_v12 = vadd.f32 %v1960_v33, %v1930_v40 }
 0x1a8   : > { %v2435_v21 = vpop.f32.mrb[4].mxu0 }
 0x1a9   : > { %v1627_v54 = vadd.f32 %v2435_v21, %v3411_v18  ;;  %v1618_v46 = vpop.f32.mrb[5].mxu0 }
 0x1aa   : > { %v1619_v38 = vadd.f32 %v3411_v18, %v1618_v46  ;;  %v2436_v47 = vpop.f32.mrb[6].mxu0 }
 0x1ab   : > { %v1630_v44 = vadd.f32 %v2436_v47, %v3411_v18  ;;  %v1621_v53 = vpop.f32.mrb[7].mxu0  ;;  %v1933_v43 = vmul.f32 %v1627_v54, %v1627_v54 }
 0x1ac   : > { %v1892_v50 = vadd.f32 %v1891_v45, %v1619_v38  ;;  %v1931_v27 = vmul.f32 %v1619_v38, %v1619_v38  ;;  %v1622_v7 = vadd.f32 %v3411_v18, %v1621_v53 }
 0x1ad   : > { %v2327_v61 = vpack.c.bf16 %v1630_v44, %v1627_v54  ;;  %v1934_v19 = vmul.f32 %v1630_v44, %v1630_v44 }
 0x1ae   : > { %v1962_v10 = vadd.f32 %v1961_v12, %v1931_v27  ;;  %v2322_v58 = vpack.c.bf16 %v1622_v7, %v1619_v38  ;;  %v1893_v5 = vadd.f32 %v1892_v50, %v1622_v7  ;;  %v1932_v1 = vmul.f32 %v1622_v7, %v1622_v7 }
 0x1af   : > { %2391 = vst [vmem:[%s3423_s28 + $0x18] sm:$0xff] %v2327_v61  }
 0x1b0   : > { %2390 = vst [vmem:[%s3423_s28 + $0x10] sm:$0xff] %v2322_v58   ;;  %v1894_v42 = vadd.f32 %v1893_v5, %v1627_v54  ;;  %v1963_v60 = vadd.f32 %v1962_v10, %v1932_v1 }
 0x1b2   : > { %v1964_v63 = vadd.f32 %v1963_v60, %v1933_v43  ;;  %v1895_v4 = vadd.f32 %v1894_v42, %v1630_v44 }
 0x1b4   : > { %v1965_v57 = vadd.f32 %v1964_v63, %v1934_v19 }
 0x1c8   : > { %v2439_v24 = vpop.f32.mrb[8].mxu0 }
 0x1c9   : > { %v1643_v28 = vadd.f32 %v2439_v24, %v3411_v18  ;;  %v1634_v22 = vpop.f32.mrb[9].mxu0 }
 0x1ca   : > { %v1635_v25 = vadd.f32 %v3411_v18, %v1634_v22  ;;  %v2440_v51 = vpop.f32.mrb[10].mxu0 }
 0x1cb   : > { %v1646_v29 = vadd.f32 %v2440_v51, %v3411_v18  ;;  %v1637_v59 = vpop.f32.mrb[11].mxu0  ;;  %v1937_v16 = vmul.f32 %v1643_v28, %v1643_v28 }
 0x1cc   : > { %v1896_v23 = vadd.f32 %v1895_v4, %v1635_v25  ;;  %v1935_v9 = vmul.f32 %v1635_v25, %v1635_v25  ;;  %v1638_v35 = vadd.f32 %v3411_v18, %v1637_v59 }
 0x1cd   : > { %v2337_v13 = vpack.c.bf16 %v1646_v29, %v1643_v28  ;;  %v1938_v2 = vmul.f32 %v1646_v29, %v1646_v29 }
 0x1ce   : > { %v1966_v48 = vadd.f32 %v1965_v57, %v1935_v9  ;;  %v2332_v52 = vpack.c.bf16 %v1638_v35, %v1635_v25  ;;  %v1897_v6 = vadd.f32 %v1896_v23, %v1638_v35  ;;  %v1936_v15 = vmul.f32 %v1638_v35, %v1638_v35 }
 0x1cf   : > { %2393 = vst [vmem:[%s3423_s28 + $0x28] sm:$0xff] %v2337_v13  }
 0x1d0   : > { %2392 = vst [vmem:[%s3423_s28 + $0x20] sm:$0xff] %v2332_v52   ;;  %v1898_v32 = vadd.f32 %v1897_v6, %v1643_v28  ;;  %v1967_v20 = vadd.f32 %v1966_v48, %v1936_v15 }
 0x1d2   : > { %v1968_v3 = vadd.f32 %v1967_v20, %v1937_v16  ;;  %v1899_v56 = vadd.f32 %v1898_v32, %v1646_v29 }
 0x1d4   : > { %v1969_v26 = vadd.f32 %v1968_v3, %v1938_v2 }
 0x1e8   : > { %v2443_v30 = vpop.f32.mrb[12].mxu0 }
 0x1e9   : > { %v1659_v0 = vadd.f32 %v2443_v30, %v3411_v18  ;;  %v1650_v49 = vpop.f32.mrb[13].mxu0 }
 0x1ea   : > { %v1651_v14 = vadd.f32 %v3411_v18, %v1650_v49  ;;  %v2444_v31 = vpop.f32.mrb[14].mxu0 }
 0x1eb   : > { %v1662_v17 = vadd.f32 %v2444_v31, %v3411_v18  ;;  %v1653_v34 = vpop.f32.mrb[15].mxu0  ;;  %v1941_v33 = vmul.f32 %v1659_v0, %v1659_v0 }
 0x1ec   : > { %v1900_v37 = vadd.f32 %v1899_v56, %v1651_v14  ;;  %v1939_v36 = vmul.f32 %v1651_v14, %v1651_v14  ;;  %v1654_v8 = vadd.f32 %v3411_v18, %v1653_v34 }
 0x1ed   : > { %v2347_v55 = vpack.c.bf16 %v1662_v17, %v1659_v0  ;;  %v1942_v12 = vmul.f32 %v1662_v17, %v1662_v17 }
 0x1ee   : > { %v1970_v62 = vadd.f32 %v1969_v26, %v1939_v36  ;;  %v2342_v39 = vpack.c.bf16 %v1654_v8, %v1651_v14  ;;  %v1901_v11 = vadd.f32 %v1900_v37, %v1654_v8  ;;  %v1940_v40 = vmul.f32 %v1654_v8, %v1654_v8 }
 0x1ef   : > { %2395 = vst [vmem:[%s3423_s28 + $0x38] sm:$0xff] %v2347_v55  }
 0x1f0   : > { %2394 = vst [vmem:[%s3423_s28 + $0x30] sm:$0xff] %v2342_v39   ;;  %v1902_v41 = vadd.f32 %v1901_v11, %v1659_v0  ;;  %v1971_v45 = vadd.f32 %v1970_v62, %v1940_v40 }
 0x1f2   : > { %v1972_v21 = vadd.f32 %v1971_v45, %v1941_v33  ;;  %v1903_v54 = vadd.f32 %v1902_v41, %v1662_v17 }
 0x1f4   : > { %v1973_v46 = vadd.f32 %v1972_v21, %v1942_v12 }
 0x208   : > { %v2447_v38 = vpop.f32.mrb[0].mxu1 }
 0x209   : > { %v1675_v47 = vadd.f32 %v2447_v38, %v3411_v18  ;;  %v1666_v44 = vpop.f32.mrb[1].mxu1 }
 0x20a   : > { %v1667_v53 = vadd.f32 %v3411_v18, %v1666_v44  ;;  %v2448_v50 = vpop.f32.mrb[2].mxu1 }
 0x20b   : > { %v1678_v27 = vadd.f32 %v2448_v50, %v3411_v18  ;;  %v1669_v7 = vpop.f32.mrb[3].mxu1  ;;  %v1945_v19 = vmul.f32 %v1675_v47, %v1675_v47 }
 0x20c   : > { %v1904_v61 = vadd.f32 %v1903_v54, %v1667_v53  ;;  %v1943_v10 = vmul.f32 %v1667_v53, %v1667_v53  ;;  %v1670_v58 = vadd.f32 %v3411_v18, %v1669_v7 }
 0x20d   : > { %v2357_v5 = vpack.c.bf16 %v1678_v27, %v1675_v47  ;;  %v1946_v57 = vmul.f32 %v1678_v27, %v1678_v27 }
 0x20e   : > { %v1974_v1 = vadd.f32 %v1973_v46, %v1943_v10  ;;  %v2352_v43 = vpack.c.bf16 %v1670_v58, %v1667_v53  ;;  %v1905_v42 = vadd.f32 %v1904_v61, %v1670_v58  ;;  %v1944_v60 = vmul.f32 %v1670_v58, %v1670_v58 }
 0x20f   : > { %2397 = vst [vmem:[%s3423_s28 + $0x48] sm:$0xff] %v2357_v5  }
 0x210   : > { %2396 = vst [vmem:[%s3423_s28 + $0x40] sm:$0xff] %v2352_v43   ;;  %v1906_v63 = vadd.f32 %v1905_v42, %v1675_v47  ;;  %v1975_v4 = vadd.f32 %v1974_v1, %v1944_v60 }
 0x212   : > { %v1976_v24 = vadd.f32 %v1975_v4, %v1945_v19  ;;  %v1907_v28 = vadd.f32 %v1906_v63, %v1678_v27 }
 0x214   : > { %v1977_v22 = vadd.f32 %v1976_v24, %v1946_v57 }
 0x228   : > { %v2451_v25 = vpop.f32.mrb[4].mxu1 }
 0x229   : > { %v1691_v51 = vadd.f32 %v2451_v25, %v3411_v18  ;;  %v1682_v29 = vpop.f32.mrb[5].mxu1 }
 0x22a   : > { %v1683_v59 = vadd.f32 %v3411_v18, %v1682_v29  ;;  %v2452_v23 = vpop.f32.mrb[6].mxu1 }
 0x22b   : > { %v1694_v9 = vadd.f32 %v2452_v23, %v3411_v18  ;;  %v1685_v35 = vpop.f32.mrb[7].mxu1  ;;  %v1949_v2 = vmul.f32 %v1691_v51, %v1691_v51 }
 0x22c   : > { %v1908_v13 = vadd.f32 %v1907_v28, %v1683_v59  ;;  %v1947_v48 = vmul.f32 %v1683_v59, %v1683_v59  ;;  %v1686_v52 = vadd.f32 %v3411_v18, %v1685_v35 }
 0x22d   : > { %v2367_v6 = vpack.c.bf16 %v1694_v9, %v1691_v51  ;;  %v1950_v26 = vmul.f32 %v1694_v9, %v1694_v9 }
 0x22e   : > { %v1978_v15 = vadd.f32 %v1977_v22, %v1947_v48  ;;  %v2362_v16 = vpack.c.bf16 %v1686_v52, %v1683_v59  ;;  %v1909_v32 = vadd.f32 %v1908_v13, %v1686_v52  ;;  %v1948_v20 = vmul.f32 %v1686_v52, %v1686_v52 }
 0x22f   : > { %2399 = vst [vmem:[%s3423_s28 + $0x58] sm:$0xff] %v2367_v6  }
 0x230   : > { %2398 = vst [vmem:[%s3423_s28 + $0x50] sm:$0xff] %v2362_v16   ;;  %v1910_v3 = vadd.f32 %v1909_v32, %v1691_v51  ;;  %v1979_v56 = vadd.f32 %v1978_v15, %v1948_v20 }
 0x232   : > { %v1980_v30 = vadd.f32 %v1979_v56, %v1949_v2  ;;  %v1911_v0 = vadd.f32 %v1910_v3, %v1694_v9 }
 0x234   : > { %v1981_v49 = vadd.f32 %v1980_v30, %v1950_v26 }
 0x248   : > { %v2455_v14 = vpop.f32.mrb[8].mxu1 }
 0x249   : > { %v1707_v31 = vadd.f32 %v2455_v14, %v3411_v18  ;;  %v1698_v17 = vpop.f32.mrb[9].mxu1 }
 0x24a   : > { %v1699_v34 = vadd.f32 %v3411_v18, %v1698_v17  ;;  %v2456_v37 = vpop.f32.mrb[10].mxu1 }
 0x24b   : > { %v1710_v36 = vadd.f32 %v2456_v37, %v3411_v18  ;;  %v1701_v8 = vpop.f32.mrb[11].mxu1  ;;  %v1953_v12 = vmul.f32 %v1707_v31, %v1707_v31 }
 0x24c   : > { %v1912_v55 = vadd.f32 %v1911_v0, %v1699_v34  ;;  %v1951_v62 = vmul.f32 %v1699_v34, %v1699_v34  ;;  %v1702_v39 = vadd.f32 %v3411_v18, %v1701_v8 }
 0x24d   : > { %v2377_v11 = vpack.c.bf16 %v1710_v36, %v1707_v31  ;;  %v1954_v46 = vmul.f32 %v1710_v36, %v1710_v36 }
 0x24e   : > { %v1982_v40 = vadd.f32 %v1981_v49, %v1951_v62  ;;  %v2372_v33 = vpack.c.bf16 %v1702_v39, %v1699_v34  ;;  %v1913_v41 = vadd.f32 %v1912_v55, %v1702_v39  ;;  %v1952_v45 = vmul.f32 %v1702_v39, %v1702_v39 }
 0x24f   : > { %2401 = vst [vmem:[%s3423_s28 + $0x68] sm:$0xff] %v2377_v11  }
 0x250   : > { %2400 = vst [vmem:[%s3423_s28 + $0x60] sm:$0xff] %v2372_v33   ;;  %v1914_v21 = vadd.f32 %v1913_v41, %v1707_v31  ;;  %v1983_v54 = vadd.f32 %v1982_v40, %v1952_v45 }
 0x252   : > { %v1984_v38 = vadd.f32 %v1983_v54, %v1953_v12  ;;  %v1915_v47 = vadd.f32 %v1914_v21, %v1710_v36 }
 0x254   : > { %v1985_v44 = vadd.f32 %v1984_v38, %v1954_v46 }
 0x265   : > { %v2459_v53 = vpop.f32.mrb[12].mxu1 }
 0x266   : > { %v1714_v50 = vpop.f32.mrb[13].mxu1  ;;  %v1723_v61 = vadd.f32 %v2459_v53, %v3411_v18 }
 0x267   : > { %v1715_v27 = vadd.f32 %v3411_v18, %v1714_v50  ;;  %v2460_v7 = vpop.f32.mrb[14].mxu1 }
 0x268   : > { %v1726_v10 = vadd.f32 %v2460_v7, %v3411_v18  ;;  %v1717_v58 = vpop.f32.mrb[15].mxu1  ;;  %v1957_v57 = vmul.f32 %v1723_v61, %v1723_v61 }
 0x269   : > { %v1916_v5 = vadd.f32 %v1915_v47, %v1715_v27  ;;  %v1955_v1 = vmul.f32 %v1715_v27, %v1715_v27  ;;  %v1718_v43 = vadd.f32 %v3411_v18, %v1717_v58 }
 0x26a   : > { %v2387_v42 = vpack.c.bf16 %v1726_v10, %v1723_v61  ;;  %v1958_v22 = vmul.f32 %v1726_v10, %v1726_v10 }
 0x26b   : > { %v1986_v60 = vadd.f32 %v1985_v44, %v1955_v1  ;;  %v2382_v19 = vpack.c.bf16 %v1718_v43, %v1715_v27  ;;  %v1917_v63 = vadd.f32 %v1916_v5, %v1718_v43  ;;  %v1956_v4 = vmul.f32 %v1718_v43, %v1718_v43 }
 0x26c   : > { %2403 = vst [vmem:[%s3423_s28 + $0x78] sm:$0xff] %v2387_v42  }
 0x26d   : > { %2402 = vst [vmem:[%s3423_s28 + $0x70] sm:$0xff] %v2382_v19   ;;  %v1918_v24 = vadd.f32 %v1917_v63, %v1723_v61  ;;  %v1987_v28 = vadd.f32 %v1986_v60, %v1956_v4 }
 0x26f   : > { %v1919_v25 = vadd.f32 %v1918_v24, %v1726_v10  ;;  %v1988_v51 = vadd.f32 %v1987_v28, %v1957_v57 }
 0x271   : > { %v1920_v29 = vrot.slane %v1919_v25, 4  ;;  %v1989_v59 = vadd.f32 %v1988_v51, %v1958_v22 }
 0x273   : > { %v1921_v23 = vadd.f32 %v1920_v29, %v1919_v25  ;;  %v1990_v9 = vrot.slane %v1989_v59, 4 }
 0x275   : > { %v1922_v18 = vrot.slane %v1921_v23, 2  ;;  %v1991_v35 = vadd.f32 %v1990_v9, %v1989_v59 }
 0x277   : > { %v1923_v13 = vadd.f32 %v1922_v18, %v1921_v23  ;;  %v1992_v48 = vrot.slane %v1991_v35, 2 }
 0x279   : > { %v1924_v52 = vrot.slane %v1923_v13, 1  ;;  %v1993_v6 = vadd.f32 %v1992_v48, %v1991_v35 }
 0x27b   : > { %v1925_v15 = vadd.f32 %v1924_v52, %v1923_v13  ;;  %v1994_v16 = vrot.slane %v1993_v6, 1 }
 0x27d   : > { %1926 = vst [vmem:[%s473_s8] sm:$0x1] %v1925_v15  ;;  %v1995_v32 = vadd.f32 %v1994_v16, %v1993_v6 }
 0x27f   : > { %1996 = vst [vmem:[%s479_s11] sm:$0x1] %v1995_v32 }
 0x280 PF: > { %s18_s2 = sadd.s32 1, %s2527_s2   ;;  %s3497_s24 = smov %s2523_s1 }
 0x281   : > { %p15_p5 = scmp.ge.s32.totalorder %s18_s2, 4   ;;  %s3498_s1 = smov %s3500_s25 }
 0x283   :  { %17 = sbr.rel (!%p15_p5) target bundleno = 2 (0x2), region = 102 }

// kernel: double_conv.6
= control target key start
LH: loop header
LB: loop body
LE: loop exit
PB: predicated region body
PF: predicated region fallthrough
CT: control target
= control target key end

     0   :  { %s4374_s24 = smov 0   ;;  %s4376_s1 = smov 0   ;;  %s5783_s0 = inlined_call_operand.vmem [shape: f32[2,16,16,128], index: 0, kind: input, shape index: {}, may-alias: {0,1,2}]   ;;  %s5784_s1 = inlined_call_operand.vmem [shape: f32[2,16,16,128], index: 1, kind: input, shape index: {}, may-alias: {0,1,2}]   ;;  %s5785_s2 = inlined_call_operand.vmem [shape: f32[2,16,16,128], index: 2, kind: input, shape index: {}, may-alias: {0,1,2}]   ;;  %s5786_s3 = inlined_call_operand.vmem [shape: bf16[1152,128], index: 3, kind: input, shape index: {}]   ;;  %s5787_s4 = inlined_call_operand.vmem [shape: f32[1,128], index: 4, kind: input, shape index: {}]   ;;  %s5788_s5 = inlined_call_operand.vmem [shape: bf16[2,16,16,128], index: 5, kind: output, shape index: {0}]   ;;  %s5789_s6 = inlined_call_operand.vmem [shape: f32[2,1,1,128], index: 6, kind: output, shape index: {1}]   ;;  %s5790_s7 = inlined_call_operand.vmem [shape: f32[2,1,1,128], index: 7, kind: output, shape index: {2}]  }
   0x1   :  { %s4378_s2 = smov 0  }
   0x2 LB: > { %s30_s25 = sadd.s32 1, %s4325_s1  ;;  %p3038_p0 = scmp.ge.s32.totalorder %s4329_s2, 1  ;;  %s4329_s2 = sphi %s4378_s2, %s18_s2   ;;  %s4325_s1 = sphi %s4376_s1, %s5811_s1   ;;  %s4321_s24 = sphi %s4374_s24, %s5810_s24  }
   0x3   : > { %p32_p1 = scmp.ge.s32.totalorder %s30_s25, 2  ;;  %p332_p2 = scmp.lt.s32.totalorder %s4329_s2, 3 }
   0x5   : > { %s5813_s25 = smov (%p32_p1, %s30_s25), 0  ;;  %p333_p3 = pnand %p3038_p0, %p332_p2 }
   0x7   : > { %336 = sbr.rel (%p333_p3) target bundleno = 566 (0x236), region = 40 }
   0xe   : > { %v4235_v0 = vld [vmem:[%s5786_s3 + $0x40] sm:$0xff]   ;;  %v603_v1 = vlaneseq  ;;  %v5791_v3 = vmov 0.0|0.0   ;;  %v4237_v4 = vld [vmem:[%s5786_s3 + $0x48] sm:$0xff]   ;;  %p413_p4 = scmp.lt.s32.totalorder %s4321_s24, 1  ;;  %v4239_v7 = vld [vmem:[%s5786_s3 + $0x50] sm:$0xff]   ;;  %v4332_v24 = vmov 0.0  }
   0xf   : > { %v4236_v2 = vld [vmem:[%s5786_s3] sm:$0xff]   ;;  %1785 = vmatprep.mubr.bf16.mxu0 %v5791_v3  ;;  %3670 = vmatprep.subr.bf16.mxu0 %v4235_v0  ;;  %v4238_v6 = vld [vmem:[%s5786_s3 + $0x8] sm:$0xff]   ;;  %v4240_v8 = vld [vmem:[%s5786_s3 + $0x10] sm:$0xff]   ;;  %v608_v25 = vrot.slane %v4332_v24, 7  ;;  %vm4333_vm3 = vmmov 1  }
  0x10   : > { %4190 = vmatprep.subr.bf16.mxu1 %v4235_v0  ;;  %v4402_v5 = vshrl.u32 %v603_v1, 7  ;;  %3671 = vmatpush3.bf16.msra.mxu0 %v4236_v2  ;;  %s5815_s24 = smov (!%p413_p4, %s4321_s24), 1  ;;  %v4241_v9 = vld [vmem:[%s5786_s3 + $0x58] sm:$0xff]   ;;  %v4243_v11 = vld [vmem:[%s5786_s3 + $0x60] sm:$0xff]   ;;  %v4245_v14 = vld [vmem:[%s5786_s3 + $0x68] sm:$0xff]  }
  0x11   : > { %4198 = vmatpush3.bf16.msra.mxu1 %v4236_v2  ;;  %3672 = vmatprep.subr.bf16.mxu0 %v4237_v4  ;;  %v4242_v10 = vld [vmem:[%s5786_s3 + $0x18] sm:$0xff]   ;;  %s3154_s19 = sshll.u32 %s5815_s24, 8  ;;  %v4244_v13 = vld [vmem:[%s5786_s3 + $0x20] sm:$0xff]   ;;  %v4246_v18 = vld [vmem:[%s5786_s3 + $0x28] sm:$0xff]   ;;  %v4481_v37 = vpack.c.bf16 %v608_v25, %v608_v25  ;;  %s3158_s11 = sshll.u32 %s5815_s24, 7 }
  0x12   : > { %4191 = vmatprep.subr.bf16.mxu1 %v4237_v4  ;;  %v4426_v12 = vadd.s32 8, %v4402_v5  ;;  %s4431_s26 = scalar_lea.vmem %s5783_s0, %s3154_s19  ;;  %v4247_v19 = vld [vmem:[%s5786_s3 + $0x70] sm:$0xff]   ;;  %v4249_v23 = vld [vmem:[%s5786_s3 + $0x78] sm:$0xff]   ;;  %vm644_vm0 = vcmp.lt.s32.totalorder %v4402_v5, 1  ;;  %vm4206_vm1 = vcmp.ne.s32.totalorder %v4402_v5, 0  ;;  %v4251_v30 = vld [vmem:[%s5786_s3 + $0xc0] sm:$0xff]   ;;  %s5701_s14 = scalar_lea.vmem %s5788_s5, %s3158_s11 }
  0x13   : > { %v503_v15 = vld [vmem:[%s4431_s26 + $0xb0] sm:$0xff]  ;;  %v504_v16 = vld [vmem:[%s4431_s26 + $0xb8] sm:$0xff]  ;;  %v4462_v29 = vld [vmem:[%s4431_s26] sm:$0xff]  ;;  %vm755_vm2 = vcmp.lt.s32.totalorder %v4402_v5, 7  ;;  %5797 = vst [vmem:[#allocation4_spill] sm:$0xff] %v4481_v37  ;;  %s473_s16 = scalar_lea.vmem %s5789_s6, %s5815_s24  ;;  %s479_s19 = scalar_lea.vmem %s5790_s7, %s5815_s24 }
  0x14   : > { %3673 = vmatpush3.bf16.msra.mxu0 %v4238_v6  ;;  %v4441_v17 = vpack.c.bf16 %v504_v16, %v503_v15  ;;  %v4248_v20 = vld [vmem:[%s5786_s3 + $0x30] sm:$0xff]   ;;  %v620_v21 = vrot.slane %v503_v15, 7  ;;  %v638_v22 = vrot.slane %v504_v16, 7  ;;  %v4250_v26 = vld [vmem:[%s5786_s3 + $0x38] sm:$0xff]   ;;  %v731_v27 = vrot.slane %v503_v15, 1  ;;  %v4252_v31 = vld [vmem:[%s5786_s3 + $0x140] sm:$0xff]  }
  0x15   : > { %4199 = vmatpush3.bf16.msra.mxu1 %v4238_v6  ;;  %3674 = vmatprep.subr.bf16.mxu0 %v4239_v7  ;;  %v749_v28 = vrot.slane %v504_v16, 1  ;;  %v4472_v32 = vld [vmem:[%s4431_s26 + $0x8] sm:$0xff]  ;;  %v505_v33 = vld [vmem:[%s4431_s26 + $0xc0] sm:$0xff]  ;;  %vm4490_vm4 = vmpackc.low %vm4333_vm3, %vm4206_vm1  ;;  %v609_v42 = vrot.slane %v4462_v29, 7  ;;  %vm4207_vm5 = vcmp.ne.s32.totalorder %v4426_v12, 15 }
  0x16   : > { %4192 = vmatprep.subr.bf16.mxu1 %v4239_v7  ;;  %1881 = vmatprep.mubr.bf16.mxu1 %v4441_v17  ;;  %v657_v34 = vsel %vm644_vm0, %v620_v21, %v638_v22  ;;  %v675_v35 = vsel %vm644_vm0, %v638_v22, %v620_v21  ;;  %v506_v36 = vld [vmem:[%s4431_s26 + $0xc8] sm:$0xff]  ;;  %v627_v43 = vrot.slane %v4472_v32, 7  ;;  %v4253_v45 = vld [vmem:[%s5786_s3 + $0x80] sm:$0xff]   ;;  %v621_v47 = vrot.slane %v505_v33, 7  ;;  %v4525_v57 = vld [vmem:[%s4431_s26 + $0x10] sm:$0xff] }
  0x17   : > { %v768_v38 = vsel %vm755_vm2, %v731_v27, %v749_v28  ;;  %v786_v39 = vsel %vm755_vm2, %v749_v28, %v731_v27  ;;  %v4494_v41 = vpack.c.bf16 %v657_v34, %v675_v35  ;;  %v4254_v46 = vld [vmem:[%s5786_s3 + $0x100] sm:$0xff]   ;;  %v639_v48 = vrot.slane %v506_v36, 7  ;;  %v4255_v49 = vld [vmem:[%s5786_s3 + $0xc8] sm:$0xff]   ;;  %v4528_v58 = vld [vmem:[%s4431_s26 + $0x18] sm:$0xff] }
  0x18   : > { %3675 = vmatpush3.bf16.msra.mxu0 %v4240_v8  ;;  %v4498_v44 = vpack.c.bf16 %v786_v39, %v768_v38  ;;  %v4511_v50 = vpack.c.bf16 %v4472_v32, %v4462_v29  ;;  %v4260_v51 = vld [vmem:[%s5786_s3 + $0x148] sm:$0xff]   ;;  %v732_v53 = vrot.slane %v505_v33, 1  ;;  %v750_v54 = vrot.slane %v506_v36, 1  ;;  %v507_v61 = vld [vmem:[%s4431_s26 + $0xd0] sm:$0xff]  ;;  %v508_v62 = vld [vmem:[%s4431_s26 + $0xd8] sm:$0xff] }
  0x19   : > { %4200 = vmatpush3.bf16.msra.mxu1 %v4240_v8  ;;  %3676 = vmatprep.subr.bf16.mxu0 %v4241_v9  ;;  %v4256_v52 = vld [vmem:[%s5786_s3 + $0x88] sm:$0xff]   ;;  %v4519_v55 = vpack.c.bf16 %v506_v36, %v505_v33  ;;  %v646_v59 = vsel %vm644_vm0, %v609_v42, %v627_v43  ;;  %v664_v60 = vsel %vm644_vm0, %v627_v43, %v609_v42  ;;  %v4257_v1 = vld [vmem:[%s5786_s3 + $0xd0] sm:$0xff]   ;;  %v610_v4 = vrot.slane %v4525_v57, 7  ;;  %v4259_v15 = vld [vmem:[%s5786_s3 + $0xd8] sm:$0xff]  }
  0x1a   : > { %4193 = vmatprep.subr.bf16.mxu1 %v4241_v9  ;;  %v4262_v56 = vld [vmem:[%s5786_s3 + $0x108] sm:$0xff]   ;;  %v658_v63 = vsel %vm644_vm0, %v621_v47, %v639_v48  ;;  %v676_v0 = vsel %vm644_vm0, %v639_v48, %v621_v47  ;;  %v4551_v2 = vpack.c.bf16 %v646_v59, %v664_v60  ;;  %v628_v6 = vrot.slane %v4528_v58, 7  ;;  %v4261_v21 = vld [vmem:[%s5786_s3 + $0x98] sm:$0xff]   ;;  %v4270_v33 = vld [vmem:[%s5786_s3 + $0x110] sm:$0xff]  }
  0x1b   : > { %v769_v7 = vsel %vm755_vm2, %v732_v53, %v750_v54  ;;  %v4557_v8 = vpack.c.bf16 %v658_v63, %v676_v0  ;;  %v622_v9 = vrot.slane %v507_v61, 7  ;;  %v733_v16 = vrot.slane %v507_v61, 1  ;;  %v4585_v25 = vld [vmem:[%s4431_s26 + $0x28] sm:$0xff]  ;;  %v4263_v35 = vld [vmem:[%s5786_s3 + $0xe0] sm:$0xff]   ;;  %v4275_v59 = vld [vmem:[%s5786_s3 + $0x158] sm:$0xff]  }
  0x1c   : > { %3677 = vmatpush3.bf16.msra.mxu0 %v4242_v10  ;;  %v647_v22 = vsel %vm644_vm0, %v610_v4, %v628_v6  ;;  %v665_v27 = vsel %vm644_vm0, %v628_v6, %v610_v4  ;;  %v4264_v43 = vld [vmem:[%s5786_s3 + $0xa0] sm:$0xff]   ;;  %v629_v47 = vrot.slane %v4585_v25, 7  ;;  %v4276_v63 = vld [vmem:[%s5786_s3 + $0x118] sm:$0xff]   ;;  %v4266_v0 = vld [vmem:[%s5786_s3 + $0xa8] sm:$0xff]  }
  0x1d   : > { %4201 = vmatpush3.bf16.msra.mxu1 %v4242_v10  ;;  %3678 = vmatprep.subr.bf16.mxu0 %v4243_v11  ;;  %v640_v10 = vrot.slane %v508_v62, 7  ;;  %v4615_v39 = vpack.c.bf16 %v647_v22, %v665_v27  ;;  %v4267_v4 = vld [vmem:[%s5786_s3 + $0xf0] sm:$0xff]   ;;  %v4271_v22 = vld [vmem:[%s5786_s3 + $0xf8] sm:$0xff]   ;;  %vm4738_vm6 = vmpackc.low %vm4207_vm5, %vm4333_vm3 }
  0x1e   : > { %4194 = vmatprep.subr.bf16.mxu1 %v4243_v11  ;;  %v787_v11 = vsel %vm755_vm2, %v750_v54, %v732_v53  ;;  %v4265_v54 = vld [vmem:[%s5786_s3 + $0xe8] sm:$0xff]   ;;  %v4663_v6 = vld [vmem:[%s4431_s26 + $0x30] sm:$0xff] }
  0x1f   : > { %v659_v28 = vsel %vm644_vm0, %v622_v9, %v640_v10  ;;  %v4605_v34 = vpack.c.bf16 %v787_v11, %v769_v7  ;;  %v4277_v11 = vld [vmem:[%s5786_s3 + $0x160] sm:$0xff]  }
  0x20   : > { %3679 = vmatpush3.bf16.msra.mxu0 %v4244_v13 }
  0x21   : > { %4202 = vmatpush3.bf16.msra.mxu1 %v4244_v13  ;;  %3680 = vmatprep.subr.bf16.mxu0 %v4245_v14  ;;  %v4258_v13 = vld [vmem:[%s5786_s3 + $0x90] sm:$0xff]  }
  0x22   : > { %4195 = vmatprep.subr.bf16.mxu1 %v4245_v14  ;;  %v4566_v14 = vpack.c.bf16 %v4528_v58, %v4525_v57 }
  0x24   : > { %3681 = vmatpush3.bf16.msra.mxu0 %v4246_v18 }
  0x25   : > { %4203 = vmatpush3.bf16.msra.mxu1 %v4246_v18  ;;  %3682 = vmatprep.subr.bf16.mxu0 %v4247_v19  ;;  %v751_v18 = vrot.slane %v508_v62, 1 }
  0x26   : > { %4196 = vmatprep.subr.bf16.mxu1 %v4247_v19  ;;  %v4571_v19 = vpack.c.bf16 %v508_v62, %v507_v61 }
  0x27   : > { %v770_v36 = vsel %vm755_vm2, %v733_v16, %v751_v18  ;;  %v788_v38 = vsel %vm755_vm2, %v751_v18, %v733_v16  ;;  %v612_v18 = vrot.slane %v4663_v6, 7 }
  0x28   : > { %3683 = vmatpush3.bf16.msra.mxu0 %v4248_v20 }
  0x29   : > { %4204 = vmatpush3.bf16.msra.mxu1 %v4248_v20  ;;  %3684 = vmatprep.subr.bf16.mxu0 %v4249_v23  ;;  %v4268_v20 = vld [vmem:[%s5786_s3 + $0x150] sm:$0xff]  }
  0x2a   : > { %4197 = vmatprep.subr.bf16.mxu1 %v4249_v23  ;;  %v4582_v23 = vld [vmem:[%s4431_s26 + $0x20] sm:$0xff] }
  0x2c   : > { %3685 = vmatpush3.bf16.msra.mxu0 %v4250_v26 }
  0x2d   : > { %4205 = vmatpush3.bf16.msra.mxu1 %v4250_v26  ;;  %3894 = vmatprep.subr.bf16.mxu0 %v4252_v31  ;;  %v509_v26 = vld [vmem:[%s4431_s26 + $0xe0] sm:$0xff]  ;;  %v510_v31 = vld [vmem:[%s4431_s26 + $0xe8] sm:$0xff] }
  0x2e   : > { %3782 = vmatprep.subr.bf16.mxu1 %v4251_v30  ;;  %v677_v30 = vsel %vm644_vm0, %v640_v10, %v622_v9  ;;  %v623_v48 = vrot.slane %v509_v26, 7  ;;  %v752_v53 = vrot.slane %v510_v31, 1  ;;  %v4671_v10 = vld [vmem:[%s4431_s26 + $0x38] sm:$0xff] }
  0x2f   : > { %3289 = vmatmul.mubr.msk.bf16.vlgmr.msra.gmra.mrb[0].mxu0 %vm4490_vm4, %v4481_v37  ;;  %v4617_v42 = vpack.c.bf16 %v659_v28, %v677_v30  ;;  %v719_v28 = vrot.slane %v4332_v24, 1  ;;  %v4281_v30 = vld [vmem:[%s5786_s3 + $0x168] sm:$0xff]  }
  0x30   : > { %3337 = vmatmul.mubr.msk.bf16.vlgmr.msra.gmra.mrb[0].mxu1 %vm4490_vm4, %v4494_v41  ;;  %3895 = vmatpush3.bf16.msra.mxu0 %v4254_v46  ;;  %v611_v46 = vrot.slane %v4582_v23, 7 }
  0x31   : > { %3783 = vmatpush3.bf16.msra.mxu1 %v4253_v45  ;;  %1793 = vmatprep.mubr.bf16.mxu0 %v4511_v50  ;;  %v4622_v45 = vpack.c.bf16 %v788_v38, %v770_v36  ;;  %v4723_v36 = vld [vmem:[%s4431_s26 + $0x40] sm:$0xff]  ;;  %v4726_v38 = vld [vmem:[%s4431_s26 + $0x48] sm:$0xff] }
  0x32   : > { %3784 = vmatprep.subr.bf16.mxu1 %v4255_v49  ;;  %1889 = vmatprep.mubr.bf16.mxu1 %v4519_v55  ;;  %v641_v49 = vrot.slane %v510_v31, 7  ;;  %v648_v60 = vsel %vm644_vm0, %v611_v46, %v629_v47  ;;  %v666_v61 = vsel %vm644_vm0, %v629_v47, %v611_v46  ;;  %v4731_v46 = vpack.c.bf16 %v719_v28, %v719_v28 }
  0x33   : > { %3896 = vmatprep.subr.bf16.mxu0 %v4260_v51  ;;  %v4628_v51 = vpack.c.bf16 %v4585_v25, %v4582_v23  ;;  %v720_v47 = vrot.slane %v4462_v29, 1  ;;  %v631_v29 = vrot.slane %v4726_v38, 7 }
  0x34   : > { %3897 = vmatpush3.bf16.msra.mxu0 %v4262_v56  ;;  %v4633_v56 = vpack.c.bf16 %v510_v31, %v509_v26  ;;  %v660_v62 = vsel %vm644_vm0, %v623_v48, %v641_v49  ;;  %v4272_v31 = vld [vmem:[%s5786_s3 + $0xb8] sm:$0xff]   ;;  %5801 = vst [vmem:[#allocation6_spill] sm:$0xff] %v4731_v46 }
  0x35   : > { %3785 = vmatpush3.bf16.msra.mxu1 %v4256_v52  ;;  %3898 = vmatprep.subr.bf16.mxu0 %v4268_v20  ;;  %v734_v52 = vrot.slane %v509_v26, 1  ;;  %v630_v20 = vrot.slane %v4671_v10, 7  ;;  %v4279_v26 = vld [vmem:[%s5786_s3 + $0x120] sm:$0xff]  }
  0x36   : > { %3786 = vmatprep.subr.bf16.mxu1 %v4257_v1  ;;  %5800 = vst [vmem:[#allocation5_spill] sm:$0xff] %v4633_v56  ;;  %v678_v1 = vsel %vm644_vm0, %v641_v49, %v623_v48  ;;  %v738_v48 = vrot.slane %v4472_v32, 1  ;;  %v4749_v32 = vpack.c.bf16 %v4726_v38, %v4723_v36 }
  0x37   : > { %3293 = vmatmul.mubr.msk.bf16.gmra.mrb[4].mxu0 %vm4490_vm4, %v4551_v2  ;;  %v771_v7 = vsel %vm755_vm2, %v734_v52, %v752_v53  ;;  %v789_v9 = vsel %vm755_vm2, %v752_v53, %v734_v52  ;;  %v4681_v16 = vpack.c.bf16 %v660_v62, %v678_v1  ;;  %v649_v24 = vsel %vm644_vm0, %v612_v18, %v630_v20  ;;  %v4278_v53 = vld [vmem:[%s5786_s3 + $0x1c8] sm:$0xff]   ;;  %v4286_v62 = vld [vmem:[%s5786_s3 + $0x130] sm:$0xff]  }
  0x38   : > { %3341 = vmatmul.mubr.msk.bf16.gmra.mrb[4].mxu1 %vm4490_vm4, %v4557_v8  ;;  %1801 = vmatprep.mubr.bf16.mxu0 %v4566_v14  ;;  %v4695_v27 = vpack.c.bf16 %v789_v9, %v771_v7  ;;  %v613_v52 = vrot.slane %v4723_v36, 7  ;;  %v775_v1 = vsel %vm755_vm2, %v738_v48, %v720_v47  ;;  %v4283_v7 = vld [vmem:[%s5786_s3 + $0x1d0] sm:$0xff]   ;;  %v4289_v9 = vld [vmem:[%s5786_s3 + $0x178] sm:$0xff]  }
  0x39   : > { %3787 = vmatpush3.bf16.msra.mxu1 %v4258_v13  ;;  %1897 = vmatprep.mubr.bf16.mxu1 %v4571_v19  ;;  %v4269_v13 = vld [vmem:[%s5786_s3 + $0xb0] sm:$0xff]  }
  0x3a   : > { %3788 = vmatprep.subr.bf16.mxu1 %v4259_v15  ;;  %3899 = vmatpush3.bf16.msra.mxu0 %v4270_v33  ;;  %v4679_v15 = vpack.c.bf16 %v648_v60, %v666_v61  ;;  %v667_v33 = vsel %vm644_vm0, %v630_v20, %v612_v18  ;;  %v4766_v60 = vld [vmem:[%s4431_s26 + $0x50] sm:$0xff]  ;;  %v4769_v61 = vld [vmem:[%s4431_s26 + $0x58] sm:$0xff] }
  0x3b   : > { %3900 = vmatprep.subr.bf16.mxu0 %v4275_v59  ;;  %v4735_v49 = vpack.c.bf16 %v649_v24, %v667_v33  ;;  %v757_v59 = vsel %vm755_vm2, %v720_v47, %v738_v48  ;;  %v4803_v28 = vpack.c.bf16 %v4769_v61, %v4766_v60  ;;  %v4828_v33 = vld [vmem:[%s4431_s26 + $0x60] sm:$0xff]  ;;  %v4841_v48 = vld [vmem:[%s4431_s26 + $0x68] sm:$0xff] }
  0x3c   : > { %v4797_v20 = vpack.c.bf16 %v775_v1, %v757_v59 }
  0x3d   : > { %3789 = vmatpush3.bf16.msra.mxu1 %v4261_v21  ;;  %v4687_v21 = vpack.c.bf16 %v4671_v10, %v4663_v6  ;;  %v5805_v5 = vld [vmem:[#allocation5_spill] sm:$0xff] }
  0x3e   : > { %3790 = vmatprep.subr.bf16.mxu1 %v4263_v35  ;;  %3901 = vmatpush3.bf16.msra.mxu0 %v4276_v63  ;;  %v4273_v35 = vld [vmem:[%s5786_s3 + $0x1c0] sm:$0xff]   ;;  %v650_v63 = vsel %vm644_vm0, %v613_v52, %v631_v29 }
  0x3f   : > { %3297 = vmatmul.mubr.msk.bf16.gmra.mrb[8].mxu0 %vm4490_vm4, %v4615_v39  ;;  %3902 = vmatprep.subr.bf16.mxu0 %v4277_v11  ;;  %v721_v11 = vrot.slane %v4525_v57, 1  ;;  %v4284_v57 = vld [vmem:[%s5786_s3 + $0x190] sm:$0xff]  }
  0x40   : > { %3345 = vmatmul.mubr.msk.bf16.gmra.mrb[8].mxu1 %vm4490_vm4, %v4617_v42  ;;  %1809 = vmatprep.mubr.bf16.mxu0 %v4628_v51 }
  0x41   : > { %3791 = vmatpush3.bf16.msra.mxu1 %v4264_v43  ;;  %1905 = vmatprep.mubr.bf16.mxu1 %v4633_v56  ;;  %v4282_v43 = vld [vmem:[%s5786_s3 + $0x128] sm:$0xff]  }
  0x42   : > { %3792 = vmatprep.subr.bf16.mxu1 %v4265_v54  ;;  %3903 = vmatpush3.bf16.msra.mxu0 %v4279_v26  ;;  %v4285_v54 = vld [vmem:[%s5786_s3 + $0x170] sm:$0xff]   ;;  %v632_v26 = vrot.slane %v4769_v61, 7 }
  0x43   : > { %3904 = vmatprep.subr.bf16.mxu0 %v4281_v30  ;;  %v4290_v30 = vld [vmem:[%s5786_s3 + $0x138] sm:$0xff]  }
  0x45   : > { %3793 = vmatpush3.bf16.msra.mxu1 %v4266_v0  ;;  %v668_v0 = vsel %vm644_vm0, %v631_v29, %v613_v52  ;;  %v4291_v52 = vld [vmem:[%s5786_s3 + $0x1e0] sm:$0xff]   ;;  %v722_v29 = vrot.slane %v4582_v23, 1 }
  0x46   : > { %3794 = vmatprep.subr.bf16.mxu1 %v4267_v4  ;;  %3905 = vmatpush3.bf16.msra.mxu0 %v4282_v43  ;;  %v4280_v4 = vld [vmem:[%s5786_s3 + $0x188] sm:$0xff]   ;;  %v4795_v18 = vpack.c.bf16 %v650_v63, %v668_v0  ;;  %v633_v63 = vrot.slane %v4841_v48, 7  ;;  %v4860_v0 = vpack.c.bf16 %v4841_v48, %v4828_v33  ;;  %v4293_v23 = vld [vmem:[%s5786_s3 + $0x1a0] sm:$0xff]  }
  0x47   : > { %3301 = vmatmul.mubr.msk.bf16.gmra.mrb[12].mxu0 %vm4490_vm4, %v4679_v15  ;;  %3906 = vmatprep.subr.bf16.mxu0 %v4285_v54 }
  0x48   : > { %3349 = vmatmul.mubr.msk.bf16.gmra.mrb[12].mxu1 %vm4490_vm4, %v4681_v16  ;;  %1817 = vmatprep.mubr.bf16.mxu0 %v4687_v21 }
  0x49   : > { %3795 = vmatpush3.bf16.msra.mxu1 %v4269_v13  ;;  %3353 = vmatprep.mubr.msk.bf16.mxu1 %vm4490_vm4, %v4551_v2  ;;  %v4274_v2 = vld [vmem:[%s5786_s3 + $0x180] sm:$0xff]   ;;  %v739_v13 = vrot.slane %v4528_v58, 1  ;;  %v4287_v58 = vld [vmem:[%s5786_s3 + $0x1d8] sm:$0xff]  }
  0x4a   : > { %3796 = vmatprep.subr.bf16.mxu1 %v4271_v22  ;;  %3907 = vmatpush3.bf16.msra.mxu0 %v4286_v62  ;;  %v614_v22 = vrot.slane %v4766_v60, 7  ;;  %v615_v62 = vrot.slane %v4828_v33, 7 }
  0x4b   : > { %3908 = vmatprep.subr.bf16.mxu0 %v4289_v9  ;;  %v758_v24 = vsel %vm755_vm2, %v721_v11, %v739_v13  ;;  %v776_v47 = vsel %vm755_vm2, %v739_v13, %v721_v11  ;;  %v4887_v11 = vld [vmem:[%s4431_s26 + $0x70] sm:$0xff]  ;;  %v4890_v13 = vld [vmem:[%s4431_s26 + $0x78] sm:$0xff] }
  0x4c   : > { %v669_v43 = vsel %vm644_vm0, %v632_v26, %v614_v22  ;;  %v4854_v59 = vpack.c.bf16 %v776_v47, %v758_v24  ;;  %v4908_v47 = vpack.c.bf16 %v4890_v13, %v4887_v11 }
  0x4d   : > { %3797 = vmatpush3.bf16.msra.mxu1 %v4272_v31  ;;  %v4817_v31 = vld [vmem:[%s5786_s3 + $0x200] sm:$0xff]  }
  0x4e   : > { %4006 = vmatprep.subr.bf16.mxu1 %v4273_v35  ;;  %v651_v35 = vsel %vm644_vm0, %v614_v22, %v632_v26  ;;  %3909 = vmatpush3.bf16.msra.mxu0 %v4290_v30  ;;  %v4296_v22 = vld [vmem:[%s5786_s3 + $0x1a8] sm:$0xff]   ;;  %v4297_v26 = vld [vmem:[%s5786_s3 + $0x1f0] sm:$0xff]  }
  0x4f   : > { %3305 = vmatmul.mubr.msk.bf16.gmra.mrb[16].mxu0 %vm4490_vm4, %v4735_v49  ;;  %4142 = vmatprep.subr.bf16.mxu0 %v4817_v31  ;;  %v4852_v54 = vpack.c.bf16 %v651_v35, %v669_v43  ;;  %v616_v35 = vrot.slane %v4887_v11, 7  ;;  %v634_v43 = vrot.slane %v4890_v13, 7 }
  0x50   : > { %3357 = vmatmul.mubr.msk.bf16.vlgmr.msra.gmra.mrb[16].mxu1 %vm4738_vm6, %v4731_v46  ;;  %1825 = vmatprep.mubr.bf16.mxu0 %v4749_v32 }
  0x51   : > { %4007 = vmatpush3.bf16.msra.mxu1 %v4274_v2  ;;  %3361 = vmatprep.mubr.msk.bf16.mxu1 %vm4490_vm4, %v4615_v39  ;;  %v4288_v2 = vld [vmem:[%s5786_s3 + $0x198] sm:$0xff]  }
  0x52   : > { %4008 = vmatprep.subr.bf16.mxu1 %v4278_v53  ;;  %v740_v53 = vrot.slane %v4585_v25, 1  ;;  %v4294_v25 = vld [vmem:[%s5786_s3 + $0x1e8] sm:$0xff]  }
  0x54   : > { %v759_v1 = vsel %vm755_vm2, %v722_v29, %v740_v53  ;;  %v777_v9 = vsel %vm755_vm2, %v740_v53, %v722_v29  ;;  %v671_v29 = vsel %vm644_vm0, %v634_v43, %v616_v35 }
  0x55   : > { %4009 = vmatpush3.bf16.msra.mxu1 %v4280_v4  ;;  %v652_v4 = vsel %vm644_vm0, %v615_v62, %v633_v63  ;;  %v4902_v24 = vpack.c.bf16 %v777_v9, %v759_v1  ;;  %v742_v1 = vrot.slane %v4726_v38, 1 }
  0x56   : > { %4010 = vmatprep.subr.bf16.mxu1 %v4283_v7  ;;  %v670_v7 = vsel %vm644_vm0, %v633_v63, %v615_v62  ;;  %v4935_v62 = vld [vmem:[%s4431_s26 + $0x80] sm:$0xff]  ;;  %v4938_v63 = vld [vmem:[%s4431_s26 + $0x88] sm:$0xff] }
  0x57   : > { %3309 = vmatmul.mubr.msk.bf16.gmra.mrb[20].mxu0 %vm4490_vm4, %v4795_v18  ;;  %v4900_v30 = vpack.c.bf16 %v652_v4, %v670_v7  ;;  %v617_v9 = vrot.slane %v4935_v62, 7 }
  0x58   : > { %3365 = vmatmul.mubr.msk.bf16.gmra.mrb[20].mxu1 %vm4738_vm6, %v4797_v20  ;;  %1833 = vmatprep.mubr.bf16.mxu0 %v4803_v28 }
  0x59   : > { %3369 = vmatprep.mubr.msk.bf16.mxu1 %vm4490_vm4, %v4679_v15  ;;  %4011 = vmatpush3.bf16.msra.mxu1 %v4284_v57  ;;  %v723_v57 = vrot.slane %v4663_v6, 1  ;;  %v4299_v6 = vld [vmem:[%s5786_s3 + $0x1b0] sm:$0xff]  }
  0x5a   : > { %4012 = vmatprep.subr.bf16.mxu1 %v4287_v58  ;;  %v741_v58 = vrot.slane %v4671_v10, 1  ;;  %v4300_v10 = vld [vmem:[%s5786_s3 + $0x1f8] sm:$0xff]  }
  0x5c   : > { %v778_v53 = vsel %vm755_vm2, %v741_v58, %v723_v57 }
  0x5d   : > { %4013 = vmatpush3.bf16.msra.mxu1 %v4288_v2  ;;  %v760_v2 = vsel %vm755_vm2, %v723_v57, %v741_v58 }
  0x5e   : > { %4014 = vmatprep.subr.bf16.mxu1 %v4291_v52  ;;  %v653_v52 = vsel %vm644_vm0, %v616_v35, %v634_v43  ;;  %v4947_v7 = vpack.c.bf16 %v778_v53, %v760_v2  ;;  %v4974_v35 = vld [vmem:[%s4431_s26 + $0x90] sm:$0xff]  ;;  %v4977_v43 = vld [vmem:[%s4431_s26 + $0x98] sm:$0xff] }
  0x5f   : > { %3313 = vmatmul.mubr.msk.bf16.gmra.mrb[24].mxu0 %vm4490_vm4, %v4852_v54  ;;  %v4945_v4 = vpack.c.bf16 %v653_v52, %v671_v29  ;;  %v618_v29 = vrot.slane %v4974_v35, 7  ;;  %v636_v53 = vrot.slane %v4977_v43, 7 }
  0x60   : > { %3373 = vmatmul.mubr.msk.bf16.gmra.mrb[24].mxu1 %vm4738_vm6, %v4854_v59  ;;  %1841 = vmatprep.mubr.bf16.mxu0 %v4860_v0 }
  0x61   : > { %3377 = vmatprep.mubr.msk.bf16.mxu1 %vm4490_vm4, %v4735_v49  ;;  %4015 = vmatpush3.bf16.msra.mxu1 %v4293_v23  ;;  %v4302_v23 = vld [vmem:[%s5786_s3 + $0x1b8] sm:$0xff]   ;;  %5804 = vst [vmem:[#allocation7_spill] sm:$0xff] %v4945_v4 }
  0x62   : > { %4016 = vmatprep.subr.bf16.mxu1 %v4294_v25  ;;  %v724_v25 = vrot.slane %v4723_v36, 1 }
  0x64   : > { %v761_v36 = vsel %vm755_vm2, %v724_v25, %v742_v1  ;;  %v779_v58 = vsel %vm755_vm2, %v742_v1, %v724_v25  ;;  %v673_v25 = vsel %vm644_vm0, %v636_v53, %v618_v29 }
  0x65   : > { %4017 = vmatpush3.bf16.msra.mxu1 %v4296_v22  ;;  %v635_v22 = vrot.slane %v4938_v63, 7  ;;  %v4983_v52 = vpack.c.bf16 %v779_v58, %v761_v36  ;;  %v726_v36 = vrot.slane %v4828_v33, 1 }
  0x66   : > { %4018 = vmatprep.subr.bf16.mxu1 %v4297_v26  ;;  %v4953_v26 = vpack.c.bf16 %v4938_v63, %v4935_v62 }
  0x67   : > { %3317 = vmatmul.mubr.msk.bf16.gmra.mrb[28].mxu0 %vm4490_vm4, %v4900_v30  ;;  %v654_v38 = vsel %vm644_vm0, %v617_v9, %v635_v22  ;;  %v672_v57 = vsel %vm644_vm0, %v635_v22, %v617_v9  ;;  %v5010_v9 = vld [vmem:[%s4431_s26 + $0xa0] sm:$0xff]  ;;  %v5013_v22 = vld [vmem:[%s4431_s26 + $0xa8] sm:$0xff] }
  0x68   : > { %3381 = vmatmul.mubr.msk.bf16.gmra.mrb[28].mxu1 %vm4738_vm6, %v4902_v24  ;;  %1849 = vmatprep.mubr.bf16.mxu0 %v4908_v47  ;;  %v4981_v2 = vpack.c.bf16 %v654_v38, %v672_v57  ;;  %v744_v38 = vrot.slane %v4841_v48, 1  ;;  %v619_v3 = vrot.slane %v5010_v9, 7 }
  0x69   : > { %3385 = vmatprep.mubr.msk.bf16.mxu1 %vm4490_vm4, %v4795_v18  ;;  %4019 = vmatpush3.bf16.msra.mxu1 %v4299_v6  ;;  %v725_v6 = vrot.slane %v4766_v60, 1 }
  0x6a   : > { %4020 = vmatprep.subr.bf16.mxu1 %v4300_v10  ;;  %v743_v10 = vrot.slane %v4769_v61, 1  ;;  %v655_v61 = vsel %vm644_vm0, %v618_v29, %v636_v53  ;;  %v637_v29 = vrot.slane %v5013_v22, 7  ;;  %v763_v33 = vsel %vm755_vm2, %v726_v36, %v744_v38 }
  0x6b   : > { %v5017_v57 = vpack.c.bf16 %v655_v61, %v673_v25  ;;  %v781_v53 = vsel %vm755_vm2, %v744_v38, %v726_v36  ;;  %v5049_v61 = vld [vmem:[%s4431_s26 + $0xf8] sm:$0xff]  ;;  %v727_v36 = vrot.slane %v4887_v11, 1  ;;  %v745_v38 = vrot.slane %v4890_v13, 1 }
  0x6c   : > { %v762_v60 = vsel %vm755_vm2, %v725_v6, %v743_v10  ;;  %v780_v1 = vsel %vm755_vm2, %v743_v10, %v725_v6  ;;  %v5025_v6 = vpack.c.bf16 %v5013_v22, %v5010_v9  ;;  %v656_v48 = vsel %vm644_vm0, %v619_v3, %v637_v29 }
  0x6d   : > { %4021 = vmatpush3.bf16.msra.mxu1 %v4302_v23  ;;  %v4989_v23 = vpack.c.bf16 %v4977_v43, %v4974_v35  ;;  %v5019_v58 = vpack.c.bf16 %v780_v1, %v762_v60  ;;  %v674_v10 = vsel %vm644_vm0, %v637_v29, %v619_v3  ;;  %v5046_v60 = vld [vmem:[%s4431_s26 + $0xf0] sm:$0xff]  ;;  %v753_v1 = vrot.slane %v5049_v61, 1 }
  0x6e   : > { %v735_v25 = vrot.slane %v5046_v60, 1  ;;  %v5053_v46 = vpack.c.bf16 %v656_v48, %v674_v10  ;;  %v5055_v37 = vpack.c.bf16 %v781_v53, %v763_v33  ;;  %v5067_v56 = vpack.c.bf16 %v5049_v61, %v5046_v60  ;;  %v4295_v10 = vld [vmem:[%s5786_s3 + $0x208] sm:$0xff]  }
  0x6f   : > { %3321 = vmatmul.mubr.msk.bf16.gmra.mrb[32].mxu0 %vm4490_vm4, %v4945_v4  ;;  %v764_v11 = vsel %vm755_vm2, %v727_v36, %v745_v38  ;;  %v782_v13 = vsel %vm755_vm2, %v745_v38, %v727_v36  ;;  %v728_v33 = vrot.slane %v4935_v62, 1  ;;  %v746_v48 = vrot.slane %v4938_v63, 1 }
  0x70   : > { %3389 = vmatmul.mubr.msk.bf16.gmra.mrb[32].mxu1 %vm4738_vm6, %v4947_v7  ;;  %1857 = vmatprep.mubr.bf16.mxu0 %v4953_v26  ;;  %v790_v3 = vsel %vm755_vm2, %v753_v1, %v735_v25  ;;  %v729_v63 = vrot.slane %v4974_v35, 1  ;;  %v747_v53 = vrot.slane %v4977_v43, 1  ;;  %v730_v36 = vrot.slane %v5010_v9, 1 }
  0x71   : > { %3393 = vmatprep.mubr.msk.bf16.mxu1 %vm4490_vm4, %v4852_v54  ;;  %v783_v62 = vsel %vm755_vm2, %v746_v48, %v728_v33  ;;  %v748_v38 = vrot.slane %v5013_v22, 1 }
  0x72   : > { %v766_v35 = vsel %vm755_vm2, %v729_v63, %v747_v53  ;;  %v784_v43 = vsel %vm755_vm2, %v747_v53, %v729_v63 }
  0x73   : > { %v767_v9 = vsel %vm755_vm2, %v730_v36, %v748_v38  ;;  %v785_v22 = vsel %vm755_vm2, %v748_v38, %v730_v36 }
  0x77   : > { %3325 = vmatmul.mubr.msk.bf16.gmra.mrb[36].mxu0 %vm4490_vm4, %v4981_v2 }
  0x78   : > { %3397 = vmatmul.mubr.msk.bf16.gmra.mrb[36].mxu1 %vm4738_vm6, %v4983_v52  ;;  %1865 = vmatprep.mubr.bf16.mxu0 %v4989_v23 }
  0x79   : > { %3401 = vmatprep.mubr.msk.bf16.mxu1 %vm4490_vm4, %v4900_v30 }
  0x7f   : > { %3329 = vmatmul.mubr.msk.bf16.gmra.mrb[40].mxu0 %vm4490_vm4, %v5017_v57 }
  0x80   : > { %3405 = vmatmul.mubr.msk.bf16.gmra.mrb[40].mxu1 %vm4738_vm6, %v5019_v58  ;;  %1873 = vmatprep.mubr.bf16.mxu0 %v5025_v6 }
  0x81   : > { %3409 = vmatprep.mubr.msk.bf16.mxu1 %vm4490_vm4, %v4945_v4  ;;  %v772_v4 = vsel %vm755_vm2, %v735_v25, %v753_v1  ;;  %v4301_v25 = vld [vmem:[%s5786_s3 + $0x218] sm:$0xff]   ;;  %v4303_v1 = vld [vmem:[%s5786_s3 + $0x220] sm:$0xff]  }
  0x82   : > { %v5063_v29 = vpack.c.bf16 %v790_v3, %v772_v4  ;;  %v5085_v4 = vpack.c.bf16 %v782_v13, %v764_v11  ;;  %v5134_v3 = vpack.c.bf16 %v784_v43, %v766_v35  ;;  %v4304_v11 = vld [vmem:[%s5786_s3 + $0x228] sm:$0xff]   ;;  %v4305_v13 = vld [vmem:[%s5786_s3 + $0x230] sm:$0xff]  }
  0x87   : > { %3333 = vmatmul.mubr.msk.bf16.gmra.mrb[44].mxu0 %vm4490_vm4, %v5053_v46 }
  0x88   : > { %3413 = vmatmul.mubr.msk.bf16.gmra.mrb[44].mxu1 %vm4738_vm6, %v5055_v37  ;;  %3481 = vmatprep.mubr.msk.bf16.mxu0 %vm4738_vm6, %v4797_v20  ;;  %v765_v20 = vsel %vm755_vm2, %v728_v33, %v746_v48  ;;  %v5158_v33 = vpack.c.bf16 %v785_v22, %v767_v9  ;;  %v4306_v48 = vld [vmem:[%s5786_s3 + $0x238] sm:$0xff]  }
  0x89   : > { %3417 = vmatprep.mubr.msk.bf16.mxu1 %vm4490_vm4, %v4981_v2 }
  0x8f   : > { %2108 = vmatmul.mubr.bf16.vlgmr.msra.gmra.mrb[48].mxu0 %v4511_v50  ;;  %v4298_v50 = vld [vmem:[%s5786_s3 + $0x210] sm:$0xff]  }
  0x90   : > { %3421 = vmatmul.mubr.msk.bf16.gmra.mrb[48].mxu1 %vm4738_vm6, %v5085_v4  ;;  %4143 = vmatpush3.bf16.msra.mxu0 %v4817_v31  ;;  %v5110_v31 = vpack.c.bf16 %v783_v62, %v765_v20  ;;  %v642_v20 = vrot.slane %v5049_v61, 7 }
  0x91   : > { %3425 = vmatprep.mubr.msk.bf16.mxu1 %vm4490_vm4, %v5017_v57  ;;  %3485 = vmatprep.mubr.msk.bf16.mxu0 %vm4738_vm6, %v4854_v59 }
  0x92   : > { %4144 = vmatprep.subr.bf16.mxu0 %v4295_v10 }
  0x94   : > { %4145 = vmatpush3.bf16.msra.mxu0 %v4295_v10  ;;  %v624_v10 = vrot.slane %v5046_v60, 7 }
  0x95   : > { %4146 = vmatprep.subr.bf16.mxu0 %v4298_v50 }
  0x96   : > { %v661_v62 = vsel %vm644_vm0, %v624_v10, %v642_v20  ;;  %v679_v60 = vsel %vm644_vm0, %v642_v20, %v624_v10 }
  0x97   : > { %2116 = vmatmul.mubr.bf16.gmra.mrb[52].mxu0 %v4566_v14  ;;  %v5199_v61 = vpack.c.bf16 %v661_v62, %v679_v60 }
  0x98   : > { %3429 = vmatmul.mubr.msk.bf16.gmra.mrb[52].mxu1 %vm4738_vm6, %v5110_v31  ;;  %3489 = vmatprep.mubr.msk.bf16.mxu0 %vm4738_vm6, %v4902_v24 }
  0x99   : > { %3433 = vmatprep.mubr.msk.bf16.mxu1 %vm4490_vm4, %v5053_v46  ;;  %4147 = vmatpush3.bf16.msra.mxu0 %v4298_v50 }
  0x9a   : > { %4148 = vmatprep.subr.bf16.mxu0 %v4301_v25 }
  0x9d   : > { %4149 = vmatpush3.bf16.msra.mxu0 %v4301_v25 }
  0x9e   : > { %4150 = vmatprep.subr.bf16.mxu0 %v4303_v1 }
  0x9f   : > { %2124 = vmatmul.mubr.bf16.gmra.mrb[56].mxu0 %v4628_v51 }
  0xa0   : > { %3437 = vmatmul.mubr.msk.bf16.gmra.mrb[56].mxu1 %vm4738_vm6, %v5134_v3  ;;  %3493 = vmatprep.mubr.msk.bf16.mxu0 %vm4738_vm6, %v4947_v7 }
  0xa1   : > { %3441 = vmatprep.mubr.msk.bf16.mxu1 %vm4490_vm4, %v4494_v41  ;;  %4151 = vmatpush3.bf16.msra.mxu0 %v4303_v1 }
  0xa2   : > { %4152 = vmatprep.subr.bf16.mxu0 %v4304_v11 }
  0xa5   : > { %4153 = vmatpush3.bf16.msra.mxu0 %v4304_v11 }
  0xa6   : > { %4154 = vmatprep.subr.bf16.mxu0 %v4305_v13 }
  0xa7   : > { %2132 = vmatmul.mubr.bf16.gmra.mrb[60].mxu0 %v4687_v21 }
  0xa8   : > { %3445 = vmatmul.mubr.msk.bf16.gmra.mrb[60].mxu1 %vm4738_vm6, %v5158_v33  ;;  %3497 = vmatprep.mubr.msk.bf16.mxu0 %vm4738_vm6, %v4983_v52 }
  0xa9   : > { %3449 = vmatprep.mubr.msk.bf16.mxu1 %vm4490_vm4, %v4557_v8  ;;  %4155 = vmatpush3.bf16.msra.mxu0 %v4305_v13 }
  0xaa   : > { %4156 = vmatprep.subr.bf16.mxu0 %v4306_v48 }
  0xad   : > { %4157 = vmatpush3.bf16.msra.mxu0 %v4306_v48 }
  0xaf   : > { %2140 = vmatmul.mubr.bf16.gmra.mrb[64].mxu0 %v4749_v32 }
  0xb0   : > { %3453 = vmatmul.mubr.msk.bf16.gmra.mrb[64].mxu1 %vm4738_vm6, %v4498_v44  ;;  %3501 = vmatprep.mubr.msk.bf16.mxu0 %vm4738_vm6, %v5019_v58 }
  0xb1   : > { %3457 = vmatprep.mubr.msk.bf16.mxu1 %vm4490_vm4, %v4617_v42 }
  0xb7   : > { %2148 = vmatmul.mubr.bf16.gmra.mrb[68].mxu0 %v4803_v28 }
  0xb8   : > { %3461 = vmatmul.mubr.msk.bf16.gmra.mrb[68].mxu1 %vm4738_vm6, %v4605_v34  ;;  %3505 = vmatprep.mubr.msk.bf16.mxu0 %vm4738_vm6, %v5055_v37 }
  0xb9   : > { %3465 = vmatprep.mubr.msk.bf16.mxu1 %vm4490_vm4, %v4681_v16 }
  0xbf   : > { %2156 = vmatmul.mubr.bf16.gmra.mrb[72].mxu0 %v4860_v0 }
  0xc0   : > { %3469 = vmatmul.mubr.msk.bf16.gmra.mrb[72].mxu1 %vm4738_vm6, %v4622_v45  ;;  %3509 = vmatprep.mubr.msk.bf16.mxu0 %vm4738_vm6, %v5085_v4 }
  0xc1   : > { %3473 = vmatprep.mubr.msk.bf16.mxu1 %vm4490_vm4, %v5199_v61 }
  0xc7   : > { %2164 = vmatmul.mubr.bf16.gmra.mrb[76].mxu0 %v4908_v47 }
  0xc8   : > { %3477 = vmatmul.mubr.msk.bf16.gmra.mrb[76].mxu1 %vm4738_vm6, %v4695_v27  ;;  %3513 = vmatprep.mubr.msk.bf16.mxu0 %vm4738_vm6, %v5110_v31 }
  0xc9   : > { %2268 = vmatprep.mubr.bf16.mxu1 %v4566_v14  ;;  %v5806_v14 = vld [vmem:[#allocation7_spill] sm:$0xff] }
  0xcf   : > { %2172 = vmatmul.mubr.bf16.gmra.mrb[80].mxu0 %v4953_v26 }
  0xd0   : > { %3545 = vmatmul.mubr.msk.bf16.vlgmr.msra.gmra.mrb[80].mxu1 %vm4490_vm4, %v4615_v39  ;;  %3517 = vmatprep.mubr.msk.bf16.mxu0 %vm4738_vm6, %v5134_v3 }
  0xd1   : > { %2276 = vmatprep.mubr.bf16.mxu1 %v4628_v51 }
  0xd7   : > { %2180 = vmatmul.mubr.bf16.gmra.mrb[84].mxu0 %v4989_v23 }
  0xd8   : > { %3549 = vmatmul.mubr.msk.bf16.gmra.mrb[84].mxu1 %vm4490_vm4, %v4679_v15  ;;  %3521 = vmatprep.mubr.msk.bf16.mxu0 %vm4738_vm6, %v5158_v33 }
  0xd9   : > { %2284 = vmatprep.mubr.bf16.mxu1 %v4687_v21 }
  0xdf   : > { %2188 = vmatmul.mubr.bf16.gmra.mrb[88].mxu0 %v5025_v6 }
  0xe0   : > { %3553 = vmatmul.mubr.msk.bf16.gmra.mrb[88].mxu1 %vm4490_vm4, %v4735_v49  ;;  %3525 = vmatprep.mubr.msk.bf16.mxu0 %vm4738_vm6, %v4498_v44 }
  0xe1   : > { %2292 = vmatprep.mubr.bf16.mxu1 %v4749_v32 }
  0xe7   : > { %2196 = vmatmul.mubr.bf16.gmra.mrb[92].mxu0 %v4441_v17 }
  0xe8   : > { %3557 = vmatmul.mubr.msk.bf16.gmra.mrb[92].mxu1 %vm4490_vm4, %v4795_v18  ;;  %3529 = vmatprep.mubr.msk.bf16.mxu0 %vm4738_vm6, %v4605_v34 }
  0xe9   : > { %2300 = vmatprep.mubr.bf16.mxu1 %v4803_v28 }
  0xef   : > { %2204 = vmatmul.mubr.bf16.gmra.mrb[96].mxu0 %v4519_v55 }
  0xf0   : > { %3561 = vmatmul.mubr.msk.bf16.gmra.mrb[96].mxu1 %vm4490_vm4, %v4852_v54  ;;  %3533 = vmatprep.mubr.msk.bf16.mxu0 %vm4738_vm6, %v4622_v45 }
  0xf1   : > { %2308 = vmatprep.mubr.bf16.mxu1 %v4860_v0 }
  0xf7   : > { %2212 = vmatmul.mubr.bf16.gmra.mrb[100].mxu0 %v4571_v19 }
  0xf8   : > { %3565 = vmatmul.mubr.msk.bf16.gmra.mrb[100].mxu1 %vm4490_vm4, %v4900_v30  ;;  %3537 = vmatprep.mubr.msk.bf16.mxu0 %vm4738_vm6, %v4695_v27 }
  0xf9   : > { %2316 = vmatprep.mubr.bf16.mxu1 %v4908_v47 }
  0xff   : > { %2220 = vmatmul.mubr.bf16.gmra.mrb[104].mxu0 %v5805_v5 }
 0x100   : > { %3569 = vmatmul.mubr.msk.bf16.gmra.mrb[104].mxu1 %vm4490_vm4, %v5806_v14  ;;  %3541 = vmatprep.mubr.msk.bf16.mxu0 %vm4738_vm6, %v5063_v29 }
 0x101   : > { %2324 = vmatprep.mubr.bf16.mxu1 %v4953_v26 }
 0x102   : > { %v3686_v39 = vpop.f32.mrb[0].mxu0 }
 0x103   : > { %v3758_v51 = vpop.f32.mrb[0].mxu1  ;;  %v3687_v15 = vpop.f32.mrb[1].mxu0 }
 0x104   : > { %v3759_v21 = vpop.f32.mrb[1].mxu1  ;;  %v5275_v49 = vadd.f32 %v3687_v15, %v3686_v39  ;;  %v3689_v18 = vpop.f32.mrb[2].mxu0 }
 0x105   : > { %v5277_v32 = vadd.f32 %v3759_v21, %v3758_v51  ;;  %v3761_v28 = vpop.f32.mrb[2].mxu1  ;;  %v3690_v54 = vpop.f32.mrb[3].mxu0 }
 0x106   : > { %v3762_v0 = vpop.f32.mrb[3].mxu1  ;;  %v5279_v30 = vadd.f32 %v3690_v54, %v3689_v18 }
 0x107   : > { %v5281_v47 = vadd.f32 %v3762_v0, %v3761_v28  ;;  %2228 = vmatmul.mubr.bf16.gmra.mrb[108].mxu0 %v5067_v56 }
 0x108   : > { %3573 = vmatmul.mubr.msk.bf16.gmra.mrb[108].mxu1 %vm4490_vm4, %v4981_v2  ;;  %4158 = vmatprep.mubr.msk.bf16.mxu0 %vm4738_vm6, %v4854_v59 }
 0x109   : > { %2332 = vmatprep.mubr.bf16.mxu1 %v4989_v23 }
 0x10a   : > { %v3692_v26 = vpop.f32.mrb[4].mxu0 }
 0x10b   : > { %v3764_v50 = vpop.f32.mrb[4].mxu1  ;;  %v3693_v63 = vpop.f32.mrb[5].mxu0 }
 0x10c   : > { %v3765_v53 = vpop.f32.mrb[5].mxu1  ;;  %v5291_v25 = vadd.f32 %v3693_v63, %v3692_v26  ;;  %v3695_v43 = vpop.f32.mrb[6].mxu0 }
 0x10d   : > { %v5293_v35 = vadd.f32 %v3765_v53, %v3764_v50  ;;  %v3767_v1 = vpop.f32.mrb[6].mxu1  ;;  %v3696_v36 = vpop.f32.mrb[7].mxu0 }
 0x10e   : > { %v3768_v38 = vpop.f32.mrb[7].mxu1  ;;  %v5295_v11 = vadd.f32 %v3696_v36, %v3695_v43 }
 0x10f   : > { %v5297_v2 = vadd.f32 %v3768_v38, %v3767_v1  ;;  %4159 = vmatmul.mubr.msk.bf16.vlgmr.msra.gmra.mrb[112].mxu0 %vm4738_vm6, %v4902_v24 }
 0x110   : > { %3577 = vmatmul.mubr.msk.bf16.gmra.mrb[112].mxu1 %vm4490_vm4, %v5017_v57  ;;  %4162 = vmatprep.mubr.msk.bf16.mxu0 %vm4738_vm6, %v4947_v7 }
 0x111   : > { %2340 = vmatprep.mubr.bf16.mxu1 %v5025_v6 }
 0x112   : > { %v3698_v59 = vpop.f32.mrb[8].mxu0 }
 0x113   : > { %v3770_v23 = vpop.f32.mrb[8].mxu1  ;;  %v3699_v9 = vpop.f32.mrb[9].mxu0 }
 0x114   : > { %v3771_v22 = vpop.f32.mrb[9].mxu1  ;;  %v5309_v13 = vadd.f32 %v3699_v9, %v3698_v59  ;;  %v3701_v10 = vpop.f32.mrb[10].mxu0 }
 0x115   : > { %v5311_v48 = vadd.f32 %v3771_v22, %v3770_v23  ;;  %v3773_v57 = vpop.f32.mrb[10].mxu1  ;;  %v3702_v20 = vpop.f32.mrb[11].mxu0 }
 0x116   : > { %v3774_v62 = vpop.f32.mrb[11].mxu1  ;;  %v5313_v60 = vadd.f32 %v3702_v20, %v3701_v10 }
 0x117   : > { %v5315_v24 = vadd.f32 %v3774_v62, %v3773_v57  ;;  %4163 = vmatmul.mubr.msk.bf16.gmra.mrb[116].mxu0 %vm4738_vm6, %v4983_v52 }
 0x118   : > { %3581 = vmatmul.mubr.msk.bf16.gmra.mrb[116].mxu1 %vm4490_vm4, %v5053_v46  ;;  %4166 = vmatprep.mubr.msk.bf16.mxu0 %vm4738_vm6, %v5019_v58 }
 0x119   : > { %2348 = vmatprep.mubr.bf16.mxu1 %v4441_v17  ;;  %v5348_v17 = vld [vmem:[%s5787_s4] ss:$0 sm:$0xff] }
 0x11a   : > { %v3704_v7 = vpop.f32.mrb[12].mxu0  ;;  %v1796_v10 = vadd.f32 %v5291_v25, %v5348_v17 }
 0x11b   : > { %v3776_v6 = vpop.f32.mrb[12].mxu1  ;;  %v3705_v14 = vpop.f32.mrb[13].mxu0 }
 0x11c   : > { %v3777_v39 = vpop.f32.mrb[13].mxu1  ;;  %v5327_v51 = vadd.f32 %v3705_v14, %v3704_v7  ;;  %v3707_v21 = vpop.f32.mrb[14].mxu0 }
 0x11d   : > { %v5329_v15 = vadd.f32 %v3777_v39, %v3776_v6  ;;  %v3779_v46 = vpop.f32.mrb[14].mxu1  ;;  %v3708_v18 = vpop.f32.mrb[15].mxu0 }
 0x11e   : > { %v3780_v28 = vpop.f32.mrb[15].mxu1  ;;  %v5331_v54 = vadd.f32 %v3708_v18, %v3707_v21  ;;  %v1804_v18 = vadd.f32 %v5309_v13, %v5348_v17 }
 0x11f   : > { %v5333_v52 = vadd.f32 %v3780_v28, %v3779_v46  ;;  %4167 = vmatmul.mubr.msk.bf16.gmra.mrb[120].mxu0 %vm4738_vm6, %v5055_v37 }
 0x120   : > { %3585 = vmatmul.mubr.msk.bf16.gmra.mrb[120].mxu1 %vm4490_vm4, %v4494_v41  ;;  %4170 = vmatprep.mubr.msk.bf16.mxu0 %vm4738_vm6, %v5085_v4  ;;  %v1788_v41 = vadd.f32 %v5275_v49, %v5348_v17  ;;  %v1791_v4 = vadd.f32 %v5279_v30, %v5348_v17 }
 0x121   : > { %2356 = vmatprep.mubr.bf16.mxu1 %v4519_v55 }
 0x122   : > { %v3710_v58 = vpop.f32.mrb[16].mxu0 }
 0x123   : > { %v3798_v0 = vpop.f32.mrb[16].mxu1  ;;  %v3711_v26 = vpop.f32.mrb[17].mxu0 }
 0x124   : > { %v3799_v50 = vpop.f32.mrb[17].mxu1  ;;  %v5352_v63 = vadd.f32 %v3711_v26, %v3710_v58  ;;  %v3713_v55 = vpop.f32.mrb[18].mxu0 }
 0x125   : > { %v3800_v37 = vadd.f32 %v3799_v50, %v3798_v0  ;;  %v3801_v53 = vpop.f32.mrb[18].mxu1  ;;  %v3714_v43 = vpop.f32.mrb[19].mxu0 }
 0x126   : > { %v3802_v1 = vpop.f32.mrb[19].mxu1  ;;  %v5358_v38 = vadd.f32 %v3714_v43, %v3713_v55  ;;  %v1812_v43 = vadd.f32 %v5327_v51, %v5348_v17 }
 0x127   : > { %v5356_v36 = vadd.f32 %v3800_v37, %v1788_v41  ;;  %v3803_v59 = vadd.f32 %v3802_v1, %v3801_v53  ;;  %4171 = vmatmul.mubr.msk.bf16.gmra.mrb[124].mxu0 %vm4738_vm6, %v5110_v31 }
 0x128   : > { %3589 = vmatmul.mubr.msk.bf16.gmra.mrb[124].mxu1 %vm4490_vm4, %v4557_v8  ;;  %4174 = vmatprep.mubr.msk.bf16.mxu0 %vm4738_vm6, %v5134_v3 }
 0x129   : > { %v5366_v49 = vadd.f32 %v3803_v59, %v1791_v4  ;;  %2364 = vmatprep.mubr.bf16.mxu1 %v4571_v19  ;;  %v1799_v19 = vadd.f32 %v5295_v11, %v5348_v17 }
 0x12a   : > { %v3716_v30 = vpop.f32.mrb[20].mxu0 }
 0x12b   : > { %v3804_v23 = vpop.f32.mrb[20].mxu1  ;;  %v3717_v9 = vpop.f32.mrb[21].mxu0 }
 0x12c   : > { %v3805_v22 = vpop.f32.mrb[21].mxu1  ;;  %v5374_v8 = vadd.f32 %v3717_v9, %v3716_v30  ;;  %v3719_v20 = vpop.f32.mrb[22].mxu0 }
 0x12d   : > { %v3806_v57 = vadd.f32 %v3805_v22, %v3804_v23  ;;  %v3807_v31 = vpop.f32.mrb[22].mxu1  ;;  %v3720_v62 = vpop.f32.mrb[23].mxu0  ;;  %v5807_v22 = vmov 0.0|0.0  }
 0x12e   : > { %v3808_v7 = vpop.f32.mrb[23].mxu1  ;;  %v5380_v3 = vadd.f32 %v3720_v62, %v3719_v20 }
 0x12f   : > { %v5378_v6 = vadd.f32 %v3806_v57, %v1796_v10  ;;  %v3809_v14 = vadd.f32 %v3808_v7, %v3807_v31  ;;  %4175 = vmatmul.mubr.msk.bf16.gmra.mrb[128].mxu0 %vm4738_vm6, %v5158_v33  ;;  %v1820_v31 = vadd.f32 %v5352_v63, %v5348_v17 }
 0x130   : > { %3593 = vmatmul.mubr.msk.bf16.gmra.mrb[128].mxu1 %vm4490_vm4, %v4617_v42  ;;  %4178 = vmatprep.mubr.msk.bf16.mxu0 %vm4738_vm6, %v4498_v44  ;;  %v1831_v12 = vadd.f32 %v5380_v3, %v5348_v17 }
 0x131   : > { %v5388_v25 = vadd.f32 %v3809_v14, %v1799_v19  ;;  %2372 = vmatprep.mubr.bf16.mxu1 %v5805_v5  ;;  %v1807_v5 = vadd.f32 %v5313_v60, %v5348_v17 }
 0x132   : > { %v3722_v11 = vpop.f32.mrb[24].mxu0 }
 0x133   : > { %v3810_v39 = vpop.f32.mrb[24].mxu1  ;;  %v3723_v21 = vpop.f32.mrb[25].mxu0 }
 0x134   : > { %v3811_v46 = vpop.f32.mrb[25].mxu1  ;;  %v5396_v42 = vadd.f32 %v3723_v21, %v3722_v11  ;;  %v3725_v58 = vpop.f32.mrb[26].mxu0  ;;  %v1823_v11 = vadd.f32 %v5358_v38, %v5348_v17  ;;  %v1828_v38 = vadd.f32 %v5374_v8, %v5348_v17 }
 0x135   : > { %v3812_v28 = vadd.f32 %v3811_v46, %v3810_v39  ;;  %v3813_v33 = vpop.f32.mrb[26].mxu1  ;;  %v3726_v0 = vpop.f32.mrb[27].mxu0  ;;  %v5808_v46 = vld [vmem:[#allocation4_spill] sm:$0xff] }
 0x136   : > { %v3814_v26 = vpop.f32.mrb[27].mxu1  ;;  %v5402_v44 = vadd.f32 %v3726_v0, %v3725_v58 }
 0x137   : > { %v5400_v50 = vadd.f32 %v3812_v28, %v1804_v18  ;;  %v3815_v41 = vadd.f32 %v3814_v26, %v3813_v33  ;;  %4179 = vmatmul.mubr.msk.bf16.gmra.mrb[132].mxu0 %vm4738_vm6, %v4605_v34  ;;  %v5809_v18 = vld [vmem:[#allocation6_spill] sm:$0xff] }
 0x138   : > { %3597 = vmatmul.mubr.msk.bf16.gmra.mrb[132].mxu1 %vm4490_vm4, %v4681_v16  ;;  %4182 = vmatprep.mubr.msk.bf16.mxu0 %vm4738_vm6, %v4622_v45 }
 0x139   : > { %v5410_v13 = vadd.f32 %v3815_v41, %v1807_v5  ;;  %2380 = vmatprep.mubr.bf16.mxu1 %v5067_v56  ;;  %v1815_v56 = vadd.f32 %v5331_v54, %v5348_v17 }
 0x13a   : > { %v3728_v60 = vpop.f32.mrb[28].mxu0 }
 0x13b   : > { %v3816_v37 = vpop.f32.mrb[28].mxu1  ;;  %v3729_v55 = vpop.f32.mrb[29].mxu0 }
 0x13c   : > { %v3817_v53 = vpop.f32.mrb[29].mxu1  ;;  %v5418_v16 = vadd.f32 %v3729_v55, %v3728_v60  ;;  %v3731_v4 = vpop.f32.mrb[30].mxu0 }
 0x13d   : > { %v3818_v1 = vadd.f32 %v3817_v53, %v3816_v37  ;;  %v3819_v34 = vpop.f32.mrb[30].mxu1  ;;  %v3732_v59 = vpop.f32.mrb[31].mxu0 }
 0x13e   : > { %v3820_v30 = vpop.f32.mrb[31].mxu1  ;;  %v5424_v45 = vadd.f32 %v3732_v59, %v3731_v4 }
 0x13f   : > { %v5422_v23 = vadd.f32 %v3818_v1, %v1812_v43  ;;  %v3821_v9 = vadd.f32 %v3820_v30, %v3819_v34  ;;  %4183 = vmatmul.mubr.msk.bf16.gmra.mrb[136].mxu0 %vm4738_vm6, %v4695_v27  ;;  %v1836_v30 = vadd.f32 %v5396_v42, %v5348_v17 }
 0x140   : > { %3601 = vmatmul.mubr.msk.bf16.gmra.mrb[136].mxu1 %vm4490_vm4, %v5199_v61  ;;  %4186 = vmatprep.mubr.msk.bf16.mxu0 %vm4738_vm6, %v5063_v29 }
 0x141   : > { %v5432_v51 = vadd.f32 %v3821_v9, %v1815_v56  ;;  %2388 = vmatprep.mubr.bf16.mxu1 %v5807_v22 }
 0x142   : > { %v3734_v54 = vpop.f32.mrb[32].mxu0 }
 0x143   : > { %v3822_v10 = vpop.f32.mrb[32].mxu1  ;;  %v3735_v57 = vpop.f32.mrb[33].mxu0 }
 0x144   : > { %v3823_v20 = vpop.f32.mrb[33].mxu1  ;;  %v5440_v61 = vadd.f32 %v3735_v57, %v3734_v54  ;;  %v3737_v7 = vpop.f32.mrb[34].mxu0  ;;  %v1839_v57 = vadd.f32 %v5402_v44, %v5348_v17 }
 0x145   : > { %v3824_v62 = vadd.f32 %v3823_v20, %v3822_v10  ;;  %v3825_v27 = vpop.f32.mrb[34].mxu1  ;;  %v3738_v19 = vpop.f32.mrb[35].mxu0 }
 0x146   : > { %v3826_v14 = vpop.f32.mrb[35].mxu1  ;;  %v3739_v29 = vadd.f32 %v3738_v19, %v3737_v7 }
 0x147   : > { %v5444_v39 = vadd.f32 %v3824_v62, %v1820_v31  ;;  %v3827_v21 = vadd.f32 %v3826_v14, %v3825_v27  ;;  %4187 = vmatmul.mubr.msk.bf16.gmra.mrb[140].mxu0 %vm4738_vm6, %v5809_v18 }
 0x148   : > { %3605 = vmatmul.mubr.msk.bf16.gmra.mrb[140].mxu1 %vm4490_vm4, %v5808_v46 }
 0x149   : > { %v5452_v63 = vadd.f32 %v3827_v21, %v1823_v11  ;;  %v1844_v11 = vadd.f32 %v5418_v16, %v5348_v17 }
 0x14a   : > { %v3740_v28 = vpop.f32.mrb[36].mxu0 }
 0x14b   : > { %v3828_v58 = vpop.f32.mrb[36].mxu1  ;;  %v3741_v33 = vpop.f32.mrb[37].mxu0 }
 0x14c   : > { %v3829_v0 = vpop.f32.mrb[37].mxu1  ;;  %v5456_v26 = vadd.f32 %v3741_v33, %v3740_v28  ;;  %v3743_v41 = vpop.f32.mrb[38].mxu0  ;;  %v1847_v33 = vadd.f32 %v5424_v45, %v5348_v17  ;;  %v1855_v45 = vadd.f32 %v3739_v29, %v5348_v17 }
 0x14d   : > { %v3830_v5 = vadd.f32 %v3829_v0, %v3828_v58  ;;  %v3831_v60 = vpop.f32.mrb[38].mxu1  ;;  %v3744_v40 = vpop.f32.mrb[39].mxu0 }
 0x14e   : > { %v3832_v37 = vpop.f32.mrb[39].mxu1  ;;  %v3745_v53 = vadd.f32 %v3744_v40, %v3743_v41  ;;  %v1860_v29 = vadd.f32 %v5456_v26, %v5348_v17 }
 0x14f   : > { %v5460_v55 = vadd.f32 %v3830_v5, %v1828_v38  ;;  %v3833_v43 = vadd.f32 %v3832_v37, %v3831_v60 }
 0x151   : > { %v5462_v1 = vadd.f32 %v3833_v43, %v1831_v12  ;;  %v1852_v12 = vadd.f32 %v5440_v61, %v5348_v17 }
 0x152   : > { %v3746_v4 = vpop.f32.mrb[40].mxu0 }
 0x153   : > { %v3834_v34 = vpop.f32.mrb[40].mxu1  ;;  %v3747_v59 = vpop.f32.mrb[41].mxu0 }
 0x154   : > { %v3835_v8 = vpop.f32.mrb[41].mxu1  ;;  %v5466_v56 = vadd.f32 %v3747_v59, %v3746_v4  ;;  %v3749_v22 = vpop.f32.mrb[42].mxu0 }
 0x155   : > { %v3836_v9 = vadd.f32 %v3835_v8, %v3834_v34  ;;  %v3837_v54 = vpop.f32.mrb[42].mxu1  ;;  %v3750_v10 = vpop.f32.mrb[43].mxu0 }
 0x156   : > { %v3838_v3 = vpop.f32.mrb[43].mxu1  ;;  %v5472_v31 = vadd.f32 %v3750_v10, %v3749_v22 }
 0x157   : > { %v5470_v20 = vadd.f32 %v3836_v9, %v1836_v30  ;;  %v3839_v62 = vadd.f32 %v3838_v3, %v3837_v54 }
 0x159   : > { %v5474_v7 = vadd.f32 %v3839_v62, %v1839_v57 }
 0x15a   : > { %v3752_v27 = vpop.f32.mrb[44].mxu0 }
 0x15b   : > { %v3840_v19 = vpop.f32.mrb[44].mxu1  ;;  %v3753_v42 = vpop.f32.mrb[45].mxu0 }
 0x15c   : > { %v3841_v14 = vpop.f32.mrb[45].mxu1  ;;  %v5478_v21 = vadd.f32 %v3753_v42, %v3752_v27  ;;  %v3755_v18 = vpop.f32.mrb[46].mxu0 }
 0x15d   : > { %v3842_v46 = vadd.f32 %v3841_v14, %v3840_v19  ;;  %v3843_v28 = vpop.f32.mrb[46].mxu1  ;;  %v3756_v44 = vpop.f32.mrb[47].mxu0 }
 0x15e   : > { %v3844_v58 = vpop.f32.mrb[47].mxu1  ;;  %v5484_v38 = vadd.f32 %v3756_v44, %v3755_v18 }
 0x15f   : > { %v5482_v0 = vadd.f32 %v3842_v46, %v1844_v11  ;;  %v3845_v5 = vadd.f32 %v3844_v58, %v3843_v28 }
 0x161   : > { %v5486_v41 = vadd.f32 %v3845_v5, %v1847_v33 }
 0x162   : > { %v3910_v40 = vpop.f32.mrb[48].mxu0 }
 0x163   : > { %v3846_v60 = vpop.f32.mrb[48].mxu1  ;;  %v3911_v37 = vpop.f32.mrb[49].mxu0 }
 0x164   : > { %v3847_v16 = vpop.f32.mrb[49].mxu1  ;;  %v3912_v4 = vadd.f32 %v3911_v37, %v3910_v40  ;;  %v3913_v59 = vpop.f32.mrb[50].mxu0 }
 0x165   : > { %v3848_v43 = vadd.f32 %v3847_v16, %v3846_v60  ;;  %v3849_v34 = vpop.f32.mrb[50].mxu1  ;;  %v3914_v30 = vpop.f32.mrb[51].mxu0 }
 0x166   : > { %v3850_v8 = vpop.f32.mrb[51].mxu1  ;;  %v5494_v22 = vadd.f32 %v3912_v4, %v5356_v36  ;;  %v3915_v10 = vadd.f32 %v3914_v30, %v3913_v59  ;;  %v1863_v36 = vadd.f32 %v3745_v53, %v5348_v17  ;;  %v1868_v53 = vadd.f32 %v5466_v56, %v5348_v17 }
 0x167   : > { %v5491_v9 = vadd.f32 %v3848_v43, %v1852_v12  ;;  %v3851_v54 = vadd.f32 %v3850_v8, %v3849_v34 }
 0x168   : > { %v5499_v57 = vadd.f32 %v3915_v10, %v5366_v49 }
 0x169   : > { %v5496_v3 = vadd.f32 %v3851_v54, %v1855_v45 }
 0x16a   : > { %v3916_v62 = vpop.f32.mrb[52].mxu0 }
 0x16b   : > { %v3852_v61 = vpop.f32.mrb[52].mxu1  ;;  %v3917_v19 = vpop.f32.mrb[53].mxu0 }
 0x16c   : > { %v3853_v27 = vpop.f32.mrb[53].mxu1  ;;  %v3918_v14 = vadd.f32 %v3917_v19, %v3916_v62  ;;  %v3919_v46 = vpop.f32.mrb[54].mxu0 }
 0x16d   : > { %v3854_v42 = vadd.f32 %v3853_v27, %v3852_v61  ;;  %v3855_v11 = vpop.f32.mrb[54].mxu1  ;;  %v3920_v28 = vpop.f32.mrb[55].mxu0 }
 0x16e   : > { %v3856_v18 = vpop.f32.mrb[55].mxu1  ;;  %v5507_v49 = vadd.f32 %v3918_v14, %v5378_v6  ;;  %v3921_v33 = vadd.f32 %v3920_v28, %v3919_v46  ;;  %v1871_v6 = vadd.f32 %v5472_v31, %v5348_v17  ;;  %v1876_v31 = vadd.f32 %v5478_v21, %v5348_v17 }
 0x16f   : > { %v5504_v44 = vadd.f32 %v3854_v42, %v1860_v29  ;;  %v3857_v58 = vadd.f32 %v3856_v18, %v3855_v11 }
 0x170   : > { %v5512_v60 = vadd.f32 %v3921_v33, %v5388_v25 }
 0x171   : > { %v5509_v5 = vadd.f32 %v3857_v58, %v1863_v36 }
 0x172   : > { %v3922_v40 = vpop.f32.mrb[56].mxu0 }
 0x173   : > { %v3858_v26 = vpop.f32.mrb[56].mxu1  ;;  %v3923_v37 = vpop.f32.mrb[57].mxu0 }
 0x174   : > { %v3859_v16 = vpop.f32.mrb[57].mxu1  ;;  %v3924_v43 = vadd.f32 %v3923_v37, %v3922_v40  ;;  %v3925_v34 = vpop.f32.mrb[58].mxu0 }
 0x175   : > { %v3860_v12 = vadd.f32 %v3859_v16, %v3858_v26  ;;  %v3861_v4 = vpop.f32.mrb[58].mxu1  ;;  %v3926_v45 = vpop.f32.mrb[59].mxu0 }
 0x176   : > { %v3862_v59 = vpop.f32.mrb[59].mxu1  ;;  %v5521_v25 = vadd.f32 %v3924_v43, %v5400_v50  ;;  %v3927_v54 = vadd.f32 %v3926_v45, %v3925_v34  ;;  %v1879_v50 = vadd.f32 %v5484_v38, %v5348_v17  ;;  %v1884_v38 = vadd.f32 %v5277_v32, %v5348_v17 }
 0x177   : > { %v5518_v8 = vadd.f32 %v3860_v12, %v1868_v53  ;;  %v3863_v30 = vadd.f32 %v3862_v59, %v3861_v4 }
 0x178   : > { %v5526_v56 = vadd.f32 %v3927_v54, %v5410_v13 }
 0x179   : > { %v5523_v10 = vadd.f32 %v3863_v30, %v1871_v6 }
 0x17a   : > { %v3928_v62 = vpop.f32.mrb[60].mxu0 }
 0x17b   : > { %v3864_v61 = vpop.f32.mrb[60].mxu1  ;;  %v3929_v19 = vpop.f32.mrb[61].mxu0 }
 0x17c   : > { %v3865_v27 = vpop.f32.mrb[61].mxu1  ;;  %v3930_v42 = vadd.f32 %v3929_v19, %v3928_v62  ;;  %v3931_v11 = vpop.f32.mrb[62].mxu0 }
 0x17d   : > { %v3866_v29 = vadd.f32 %v3865_v27, %v3864_v61  ;;  %v3867_v14 = vpop.f32.mrb[62].mxu1  ;;  %v3932_v36 = vpop.f32.mrb[63].mxu0 }
 0x17e   : > { %v3868_v46 = vpop.f32.mrb[63].mxu1  ;;  %v5535_v13 = vadd.f32 %v3930_v42, %v5422_v23  ;;  %v3933_v58 = vadd.f32 %v3932_v36, %v3931_v11  ;;  %v1887_v23 = vadd.f32 %v5281_v47, %v5348_v17  ;;  %v1892_v47 = vadd.f32 %v5293_v35, %v5348_v17 }
 0x17f   : > { %v5532_v18 = vadd.f32 %v3866_v29, %v1876_v31  ;;  %v3869_v28 = vadd.f32 %v3868_v46, %v3867_v14 }
 0x180   : > { %v5540_v21 = vadd.f32 %v3933_v58, %v5432_v51 }
 0x181   : > { %v5537_v33 = vadd.f32 %v3869_v28, %v1879_v50 }
 0x182   : > { %v3934_v40 = vpop.f32.mrb[64].mxu0 }
 0x183   : > { %v3870_v26 = vpop.f32.mrb[64].mxu1  ;;  %v3935_v37 = vpop.f32.mrb[65].mxu0 }
 0x184   : > { %v3871_v16 = vpop.f32.mrb[65].mxu1  ;;  %v3936_v12 = vadd.f32 %v3935_v37, %v3934_v40  ;;  %v3937_v4 = vpop.f32.mrb[66].mxu0 }
 0x185   : > { %v3872_v53 = vadd.f32 %v3871_v16, %v3870_v26  ;;  %v3873_v43 = vpop.f32.mrb[66].mxu1  ;;  %v3938_v6 = vpop.f32.mrb[67].mxu0 }
 0x186   : > { %v3874_v34 = vpop.f32.mrb[67].mxu1  ;;  %v5549_v51 = vadd.f32 %v3936_v12, %v5444_v39  ;;  %v3939_v30 = vadd.f32 %v3938_v6, %v3937_v4  ;;  %v1895_v39 = vadd.f32 %v5297_v2, %v5348_v17  ;;  %v1900_v2 = vadd.f32 %v5311_v48, %v5348_v17 }
 0x187   : > { %v5546_v59 = vadd.f32 %v3872_v53, %v1884_v38  ;;  %v3875_v45 = vadd.f32 %v3874_v34, %v3873_v43 }
 0x188   : > { %v5554_v32 = vadd.f32 %v3939_v30, %v5452_v63 }
 0x189   : > { %v5551_v54 = vadd.f32 %v3875_v45, %v1887_v23 }
 0x18a   : > { %v3940_v62 = vpop.f32.mrb[68].mxu0 }
 0x18b   : > { %v3876_v61 = vpop.f32.mrb[68].mxu1  ;;  %v3941_v19 = vpop.f32.mrb[69].mxu0 }
 0x18c   : > { %v3877_v27 = vpop.f32.mrb[69].mxu1  ;;  %v3942_v29 = vadd.f32 %v3941_v19, %v3940_v62  ;;  %v3943_v14 = vpop.f32.mrb[70].mxu0 }
 0x18d   : > { %v3878_v31 = vadd.f32 %v3877_v27, %v3876_v61  ;;  %v3879_v42 = vpop.f32.mrb[70].mxu1  ;;  %v3944_v50 = vpop.f32.mrb[71].mxu0 }
 0x18e   : > { %v3880_v11 = vpop.f32.mrb[71].mxu1  ;;  %v5563_v63 = vadd.f32 %v3942_v29, %v5460_v55  ;;  %v3945_v28 = vadd.f32 %v3944_v50, %v3943_v14  ;;  %v1903_v55 = vadd.f32 %v5315_v24, %v5348_v17  ;;  %v1908_v24 = vadd.f32 %v5329_v15, %v5348_v17 }
 0x18f   : > { %v5560_v46 = vadd.f32 %v3878_v31, %v1892_v47  ;;  %v3881_v36 = vadd.f32 %v3880_v11, %v3879_v42 }
 0x190   : > { %v5568_v35 = vadd.f32 %v3945_v28, %v5462_v1 }
 0x191   : > { %v5565_v58 = vadd.f32 %v3881_v36, %v1895_v39 }
 0x192   : > { %v3946_v40 = vpop.f32.mrb[72].mxu0 }
 0x193   : > { %v3882_v26 = vpop.f32.mrb[72].mxu1  ;;  %v3947_v37 = vpop.f32.mrb[73].mxu0 }
 0x194   : > { %v3883_v16 = vpop.f32.mrb[73].mxu1  ;;  %v3948_v53 = vadd.f32 %v3947_v37, %v3946_v40  ;;  %v3949_v43 = vpop.f32.mrb[74].mxu0 }
 0x195   : > { %v3884_v38 = vadd.f32 %v3883_v16, %v3882_v26  ;;  %v3885_v12 = vpop.f32.mrb[74].mxu1  ;;  %v3950_v23 = vpop.f32.mrb[75].mxu0 }
 0x196   : > { %v3886_v4 = vpop.f32.mrb[75].mxu1  ;;  %v5577_v1 = vadd.f32 %v3948_v53, %v5470_v20  ;;  %v3951_v45 = vadd.f32 %v3950_v23, %v3949_v43  ;;  %v1911_v20 = vadd.f32 %v5333_v52, %v5348_v17 }
 0x197   : > { %v5574_v34 = vadd.f32 %v3884_v38, %v1900_v2  ;;  %v3887_v6 = vadd.f32 %v3886_v4, %v3885_v12 }
 0x198   : > { %v5582_v48 = vadd.f32 %v3951_v45, %v5474_v7 }
 0x199   : > { %v5579_v30 = vadd.f32 %v3887_v6, %v1903_v55 }
 0x19a   : > { %v3952_v62 = vpop.f32.mrb[76].mxu0 }
 0x19b   : > { %v3888_v61 = vpop.f32.mrb[76].mxu1  ;;  %v3953_v19 = vpop.f32.mrb[77].mxu0 }
 0x19c   : > { %v3889_v27 = vpop.f32.mrb[77].mxu1  ;;  %v3954_v31 = vadd.f32 %v3953_v19, %v3952_v62  ;;  %v3955_v42 = vpop.f32.mrb[78].mxu0 }
 0x19d   : > { %v3890_v47 = vadd.f32 %v3889_v27, %v3888_v61  ;;  %v3891_v29 = vpop.f32.mrb[78].mxu1  ;;  %v3956_v39 = vpop.f32.mrb[79].mxu0 }
 0x19e   : > { %v3892_v14 = vpop.f32.mrb[79].mxu1  ;;  %v5591_v7 = vadd.f32 %v3954_v31, %v5482_v0  ;;  %v3957_v36 = vadd.f32 %v3956_v39, %v3955_v42 }
 0x19f   : > { %v5588_v11 = vadd.f32 %v3890_v47, %v1908_v24  ;;  %v3893_v50 = vadd.f32 %v3892_v14, %v3891_v29 }
 0x1a0   : > { %v5596_v15 = vadd.f32 %v3957_v36, %v5486_v41 }
 0x1a1   : > { %v5593_v28 = vadd.f32 %v3893_v50, %v1911_v20 }
 0x1a2   : > { %v3958_v26 = vpop.f32.mrb[80].mxu0 }
 0x1a3   : > { %v4022_v40 = vpop.f32.mrb[80].mxu1  ;;  %v3959_v16 = vpop.f32.mrb[81].mxu0 }
 0x1a4   : > { %v4023_v37 = vpop.f32.mrb[81].mxu1  ;;  %v3960_v2 = vadd.f32 %v3959_v16, %v3958_v26  ;;  %v3961_v17 = vpop.f32.mrb[82].mxu0 }
 0x1a5   : > { %v4024_v52 = vadd.f32 %v4023_v37, %v4022_v40  ;;  %v4025_v38 = vpop.f32.mrb[82].mxu1  ;;  %v3962_v53 = vpop.f32.mrb[83].mxu0 }
 0x1a6   : > { %v4026_v12 = vpop.f32.mrb[83].mxu1  ;;  %v5599_v0 = vadd.f32 %v3960_v2, %v5491_v9  ;;  %v3963_v43 = vadd.f32 %v3962_v53, %v3961_v17 }
 0x1a7   : > { %v4027_v55 = vadd.f32 %v4026_v12, %v4025_v38  ;;  %v5602_v4 = vadd.f32 %v4024_v52, %v5494_v22 }
 0x1a8   : > { %v5605_v41 = vadd.f32 %v3963_v43, %v5496_v3 }
 0x1a9   : > { %v5608_v23 = vadd.f32 %v4027_v55, %v5499_v57 }
 0x1aa   : > { %v3964_v6 = vpop.f32.mrb[84].mxu0 }
 0x1ab   : > { %v4028_v45 = vpop.f32.mrb[84].mxu1  ;;  %v3965_v61 = vpop.f32.mrb[85].mxu0 }
 0x1ac   : > { %v4029_v62 = vpop.f32.mrb[85].mxu1  ;;  %v3966_v27 = vadd.f32 %v3965_v61, %v3964_v6  ;;  %v3967_v24 = vpop.f32.mrb[86].mxu0 }
 0x1ad   : > { %v4030_v19 = vadd.f32 %v4029_v62, %v4028_v45  ;;  %v4031_v9 = vpop.f32.mrb[86].mxu1  ;;  %v3968_v47 = vpop.f32.mrb[87].mxu0 }
 0x1ae   : > { %v4032_v31 = vpop.f32.mrb[87].mxu1  ;;  %v5611_v29 = vadd.f32 %v3966_v27, %v5504_v44  ;;  %v3969_v22 = vadd.f32 %v3968_v47, %v3967_v24 }
 0x1af   : > { %v4033_v42 = vadd.f32 %v4032_v31, %v4031_v9  ;;  %v5614_v3 = vadd.f32 %v4030_v19, %v5507_v49 }
 0x1b0   : > { %v5617_v57 = vadd.f32 %v3969_v22, %v5509_v5 }
 0x1b1   : > { %v5620_v20 = vadd.f32 %v4033_v42, %v5512_v60 }
 0x1b2   : > { %v3970_v14 = vpop.f32.mrb[88].mxu0 }
 0x1b3   : > { %v4034_v39 = vpop.f32.mrb[88].mxu1  ;;  %v3971_v50 = vpop.f32.mrb[89].mxu0 }
 0x1b4   : > { %v4035_v36 = vpop.f32.mrb[89].mxu1  ;;  %v3972_v26 = vadd.f32 %v3971_v50, %v3970_v14  ;;  %v3973_v16 = vpop.f32.mrb[90].mxu0 }
 0x1b5   : > { %v4036_v40 = vadd.f32 %v4035_v36, %v4034_v39  ;;  %v4037_v44 = vpop.f32.mrb[90].mxu1  ;;  %v3974_v37 = vpop.f32.mrb[91].mxu0 }
 0x1b6   : > { %v4038_v2 = vpop.f32.mrb[91].mxu1  ;;  %v5623_v52 = vadd.f32 %v3972_v26, %v5518_v8  ;;  %v3975_v49 = vadd.f32 %v3974_v37, %v3973_v16 }
 0x1b7   : > { %v4039_v17 = vadd.f32 %v4038_v2, %v4037_v44  ;;  %v5626_v5 = vadd.f32 %v4036_v40, %v5521_v25 }
 0x1b8   : > { %v5629_v60 = vadd.f32 %v3975_v49, %v5523_v10 }
 0x1b9   : > { %v5632_v38 = vadd.f32 %v4039_v17, %v5526_v56 }
 0x1ba   : > { %v3976_v53 = vpop.f32.mrb[92].mxu0 }
 0x1bb   : > { %v4040_v12 = vpop.f32.mrb[92].mxu1  ;;  %v3977_v43 = vpop.f32.mrb[93].mxu0 }
 0x1bc   : > { %v4041_v55 = vpop.f32.mrb[93].mxu1  ;;  %v3978_v6 = vadd.f32 %v3977_v43, %v3976_v53  ;;  %v3979_v61 = vpop.f32.mrb[94].mxu0 }
 0x1bd   : > { %v4042_v45 = vadd.f32 %v4041_v55, %v4040_v12  ;;  %v4043_v8 = vpop.f32.mrb[94].mxu1  ;;  %v3980_v62 = vpop.f32.mrb[95].mxu0 }
 0x1be   : > { %v4044_v27 = vpop.f32.mrb[95].mxu1  ;;  %v5635_v19 = vadd.f32 %v3978_v6, %v5532_v18  ;;  %v3981_v25 = vadd.f32 %v3980_v62, %v3979_v61 }
 0x1bf   : > { %v4045_v24 = vadd.f32 %v4044_v27, %v4043_v8  ;;  %v5638_v10 = vadd.f32 %v4042_v45, %v5535_v13 }
 0x1c0   : > { %v5641_v56 = vadd.f32 %v3981_v25, %v5537_v33 }
 0x1c1   : > { %v5644_v9 = vadd.f32 %v4045_v24, %v5540_v21 }
 0x1c2   : > { %v3982_v47 = vpop.f32.mrb[96].mxu0 }
 0x1c3   : > { %v4046_v31 = vpop.f32.mrb[96].mxu1  ;;  %v3983_v22 = vpop.f32.mrb[97].mxu0 }
 0x1c4   : > { %v4047_v42 = vpop.f32.mrb[97].mxu1  ;;  %v3984_v14 = vadd.f32 %v3983_v22, %v3982_v47  ;;  %v3985_v50 = vpop.f32.mrb[98].mxu0 }
 0x1c5   : > { %v4048_v39 = vadd.f32 %v4047_v42, %v4046_v31  ;;  %v4049_v18 = vpop.f32.mrb[98].mxu1  ;;  %v3986_v36 = vpop.f32.mrb[99].mxu0 }
 0x1c6   : > { %v4050_v26 = vpop.f32.mrb[99].mxu1  ;;  %v5647_v40 = vadd.f32 %v3984_v14, %v5546_v59  ;;  %v3987_v13 = vadd.f32 %v3986_v36, %v3985_v50 }
 0x1c7   : > { %v4051_v16 = vadd.f32 %v4050_v26, %v4049_v18  ;;  %v5650_v33 = vadd.f32 %v4048_v39, %v5549_v51 }
 0x1c8   : > { %v5653_v21 = vadd.f32 %v3987_v13, %v5551_v54 }
 0x1c9   : > { %v5656_v44 = vadd.f32 %v4051_v16, %v5554_v32 }
 0x1ca   : > { %v3988_v37 = vpop.f32.mrb[100].mxu0 }
 0x1cb   : > { %v4052_v2 = vpop.f32.mrb[100].mxu1  ;;  %v3989_v49 = vpop.f32.mrb[101].mxu0 }
 0x1cc   : > { %v4053_v17 = vpop.f32.mrb[101].mxu1  ;;  %v3990_v53 = vadd.f32 %v3989_v49, %v3988_v37  ;;  %v3991_v43 = vpop.f32.mrb[102].mxu0 }
 0x1cd   : > { %v4054_v12 = vadd.f32 %v4053_v17, %v4052_v2  ;;  %v4055_v59 = vpop.f32.mrb[102].mxu1  ;;  %v3992_v55 = vpop.f32.mrb[103].mxu0 }
 0x1ce   : > { %v4056_v6 = vpop.f32.mrb[103].mxu1  ;;  %v5659_v45 = vadd.f32 %v3990_v53, %v5560_v46  ;;  %v3993_v51 = vadd.f32 %v3992_v55, %v3991_v43 }
 0x1cf   : > { %v4057_v61 = vadd.f32 %v4056_v6, %v4055_v59  ;;  %v5662_v54 = vadd.f32 %v4054_v12, %v5563_v63 }
 0x1d0   : > { %v5665_v32 = vadd.f32 %v3993_v51, %v5565_v58 }
 0x1d1   : > { %v5668_v8 = vadd.f32 %v4057_v61, %v5568_v35 }
 0x1d2   : > { %v3994_v62 = vpop.f32.mrb[104].mxu0 }
 0x1d3   : > { %v4058_v27 = vpop.f32.mrb[104].mxu1  ;;  %v3995_v25 = vpop.f32.mrb[105].mxu0 }
 0x1d4   : > { %v4059_v24 = vpop.f32.mrb[105].mxu1  ;;  %v3996_v47 = vadd.f32 %v3995_v25, %v3994_v62  ;;  %v3997_v22 = vpop.f32.mrb[106].mxu0 }
 0x1d5   : > { %v4060_v31 = vadd.f32 %v4059_v24, %v4058_v27  ;;  %v4061_v46 = vpop.f32.mrb[106].mxu1  ;;  %v3998_v42 = vpop.f32.mrb[107].mxu0 }
 0x1d6   : > { %v4062_v14 = vpop.f32.mrb[107].mxu1  ;;  %v5671_v39 = vadd.f32 %v3996_v47, %v5574_v34  ;;  %v3999_v63 = vadd.f32 %v3998_v42, %v3997_v22 }
 0x1d7   : > { %v4063_v50 = vadd.f32 %v4062_v14, %v4061_v46  ;;  %v5674_v58 = vadd.f32 %v4060_v31, %v5577_v1 }
 0x1d8   : > { %v5677_v35 = vadd.f32 %v3999_v63, %v5579_v30 }
 0x1d9   : > { %v5680_v18 = vadd.f32 %v4063_v50, %v5582_v48 }
 0x1da   : > { %v4000_v36 = vpop.f32.mrb[108].mxu0 }
 0x1db   : > { %v4064_v26 = vpop.f32.mrb[108].mxu1  ;;  %v4001_v13 = vpop.f32.mrb[109].mxu0 }
 0x1dc   : > { %v4065_v16 = vpop.f32.mrb[109].mxu1  ;;  %v4002_v37 = vadd.f32 %v4001_v13, %v4000_v36  ;;  %v4003_v34 = vpop.f32.mrb[110].mxu0 }
 0x1dd   : > { %v4066_v2 = vadd.f32 %v4065_v16, %v4064_v26  ;;  %v4067_v49 = vpop.f32.mrb[110].mxu1  ;;  %v4004_v17 = vpop.f32.mrb[111].mxu0 }
 0x1de   : > { %v4068_v53 = vpop.f32.mrb[111].mxu1  ;;  %v5683_v1 = vadd.f32 %v4002_v37, %v5588_v11  ;;  %v4005_v12 = vadd.f32 %v4004_v17, %v4003_v34 }
 0x1df   : > { %v4069_v30 = vadd.f32 %v4068_v53, %v4067_v49  ;;  %v5686_v43 = vadd.f32 %v4066_v2, %v5591_v7 }
 0x1e0   : > { %v5689_v48 = vadd.f32 %v4005_v12, %v5593_v28 }
 0x1e1   : > { %v5692_v59 = vadd.f32 %v4069_v30, %v5596_v15 }
 0x1e2   : > { %v4160_v6 = vpop.f32.mrb[112].mxu0 }
 0x1e3   : > { %v4070_v55 = vpop.f32.mrb[112].mxu1  ;;  %v2440_v51 = vadd.f32 %v4160_v6, %v5614_v3  ;;  %v2431_v62 = vpop.f32.mrb[113].mxu0 }
 0x1e4   : > { %v4071_v61 = vpop.f32.mrb[113].mxu1  ;;  %v2432_v27 = vadd.f32 %v2431_v62, %v5602_v4  ;;  %v4161_v24 = vpop.f32.mrb[114].mxu0 }
 0x1e5   : > { %v4072_v11 = vadd.f32 %v4071_v61, %v4070_v55  ;;  %v4073_v25 = vpop.f32.mrb[114].mxu1  ;;  %v2443_v7 = vadd.f32 %v4161_v24, %v5620_v20  ;;  %v2434_v28 = vpop.f32.mrb[115].mxu0  ;;  %v2758_v63 = vmul.f32 %v2440_v51, %v2440_v51 }
 0x1e6   : > { %v4074_v47 = vpop.f32.mrb[115].mxu1  ;;  %v2435_v3 = vadd.f32 %v2434_v28, %v5608_v23  ;;  %v2756_v4 = vmul.f32 %v2432_v27, %v2432_v27 }
 0x1e7   : > { %v4075_v15 = vadd.f32 %v4074_v47, %v4073_v25  ;;  %v5705_v31 = vadd.f32 %v4072_v11, %v5599_v0  ;;  %v3199_v22 = vpack.c.bf16 %v2443_v7, %v2440_v51  ;;  %v2759_v16 = vmul.f32 %v2443_v7, %v2443_v7 }
 0x1e8   : > { %v3194_v46 = vpack.c.bf16 %v2435_v3, %v2432_v27  ;;  %v2718_v42 = vadd.f32 %v2435_v3, %v2432_v27  ;;  %v2757_v20 = vmul.f32 %v2435_v3, %v2435_v3 }
 0x1e9   : > { %v5708_v14 = vadd.f32 %v4075_v15, %v5605_v41  ;;  %3271 = vst [vmem:[%s5701_s14 + $0x8] sm:$0xff] %v3199_v22  }
 0x1ea   : > { %3195 = vst [vmem:[%s5701_s14] sm:$0xff] %v3194_v46   ;;  %v2719_v50 = vadd.f32 %v2718_v42, %v2440_v51  ;;  %v2788_v36 = vadd.f32 %v2757_v20, %v2756_v4  ;;  %v4164_v13 = vpop.f32.mrb[116].mxu0 }
 0x1eb   : > { %v4076_v26 = vpop.f32.mrb[116].mxu1  ;;  %v2456_v23 = vadd.f32 %v4164_v13, %v5638_v10  ;;  %v2447_v37 = vpop.f32.mrb[117].mxu0 }
 0x1ec   : > { %v4077_v0 = vpop.f32.mrb[117].mxu1  ;;  %v2789_v2 = vadd.f32 %v2788_v36, %v2758_v63  ;;  %v2448_v49 = vadd.f32 %v2447_v37, %v5626_v5  ;;  %v2720_v17 = vadd.f32 %v2719_v50, %v2443_v7  ;;  %v4165_v53 = vpop.f32.mrb[118].mxu0 }
 0x1ed   : > { %v4078_v34 = vadd.f32 %v4077_v0, %v4076_v26  ;;  %v4079_v41 = vpop.f32.mrb[118].mxu1  ;;  %v2459_v12 = vadd.f32 %v4165_v53, %v5644_v9  ;;  %v2450_v55 = vpop.f32.mrb[119].mxu0  ;;  %v2762_v15 = vmul.f32 %v2456_v23, %v2456_v23 }
 0x1ee   : > { %v4080_v30 = vpop.f32.mrb[119].mxu1  ;;  %v2721_v6 = vadd.f32 %v2720_v17, %v2448_v49  ;;  %v2760_v51 = vmul.f32 %v2448_v49, %v2448_v49  ;;  %v2790_v61 = vadd.f32 %v2789_v2, %v2759_v16  ;;  %v2451_v11 = vadd.f32 %v2450_v55, %v5632_v38 }
 0x1ef   : > { %v4081_v62 = vadd.f32 %v4080_v30, %v4079_v41  ;;  %v3209_v10 = vpack.c.bf16 %v2459_v12, %v2456_v23  ;;  %v5717_v27 = vadd.f32 %v4078_v34, %v5611_v29  ;;  %v2763_v63 = vmul.f32 %v2459_v12, %v2459_v12 }
 0x1f0   : > { %v2791_v5 = vadd.f32 %v2790_v61, %v2760_v51  ;;  %v3204_v24 = vpack.c.bf16 %v2451_v11, %v2448_v49  ;;  %v2722_v9 = vadd.f32 %v2721_v6, %v2451_v11  ;;  %v2761_v7 = vmul.f32 %v2451_v11, %v2451_v11 }
 0x1f1   : > { %v5720_v25 = vadd.f32 %v4081_v62, %v5617_v57  ;;  %3273 = vst [vmem:[%s5701_s14 + $0x18] sm:$0xff] %v3209_v10  }
 0x1f2   : > { %v4168_v28 = vpop.f32.mrb[120].mxu0  ;;  %3272 = vst [vmem:[%s5701_s14 + $0x10] sm:$0xff] %v3204_v24   ;;  %v2723_v3 = vadd.f32 %v2722_v9, %v2456_v23  ;;  %v2792_v4 = vadd.f32 %v2791_v5, %v2761_v7 }
 0x1f3   : > { %v4082_v47 = vpop.f32.mrb[120].mxu1  ;;  %v2472_v22 = vadd.f32 %v4168_v28, %v5662_v54  ;;  %v2463_v46 = vpop.f32.mrb[121].mxu0 }
 0x1f4   : > { %v4083_v38 = vpop.f32.mrb[121].mxu1  ;;  %v2464_v42 = vadd.f32 %v2463_v46, %v5650_v33  ;;  %v4169_v57 = vpop.f32.mrb[122].mxu0  ;;  %v2793_v50 = vadd.f32 %v2792_v4, %v2762_v15  ;;  %v2724_v36 = vadd.f32 %v2723_v3, %v2459_v12 }
 0x1f5   : > { %v4084_v29 = vadd.f32 %v4083_v38, %v4082_v47  ;;  %v4085_v20 = vpop.f32.mrb[122].mxu1  ;;  %v2475_v26 = vadd.f32 %v4169_v57, %v5668_v8  ;;  %v2466_v16 = vpop.f32.mrb[123].mxu0  ;;  %v2766_v55 = vmul.f32 %v2472_v22, %v2472_v22 }
 0x1f6   : > { %v4086_v13 = vpop.f32.mrb[123].mxu1  ;;  %v2764_v23 = vmul.f32 %v2464_v42, %v2464_v42  ;;  %v2467_v54 = vadd.f32 %v2466_v16, %v5656_v44  ;;  %v2725_v2 = vadd.f32 %v2724_v36, %v2464_v42  ;;  %v2794_v33 = vadd.f32 %v2793_v50, %v2763_v63 }
 0x1f7   : > { %v4087_v0 = vadd.f32 %v4086_v13, %v4085_v20  ;;  %v5729_v37 = vadd.f32 %v4084_v29, %v5623_v52  ;;  %v3219_v34 = vpack.c.bf16 %v2475_v26, %v2472_v22 }
 0x1f8   : > { %v3214_v49 = vpack.c.bf16 %v2467_v54, %v2464_v42  ;;  %v2765_v17 = vmul.f32 %v2467_v54, %v2467_v54  ;;  %v2795_v53 = vadd.f32 %v2794_v33, %v2764_v23  ;;  %v2726_v8 = vadd.f32 %v2725_v2, %v2467_v54 }
 0x1f9   : > { %v5732_v41 = vadd.f32 %v4087_v0, %v5629_v60  ;;  %3275 = vst [vmem:[%s5701_s14 + $0x28] sm:$0xff] %v3219_v34   ;;  %v2767_v60 = vmul.f32 %v2475_v26, %v2475_v26 }
 0x1fa   : > { %3274 = vst [vmem:[%s5701_s14 + $0x20] sm:$0xff] %v3214_v49   ;;  %v4172_v30 = vpop.f32.mrb[124].mxu0  ;;  %v2727_v6 = vadd.f32 %v2726_v8, %v2472_v22  ;;  %v2796_v44 = vadd.f32 %v2795_v53, %v2765_v17 }
 0x1fb   : > { %v4088_v12 = vpop.f32.mrb[124].mxu1  ;;  %v2488_v52 = vadd.f32 %v4172_v30, %v5686_v43  ;;  %v2479_v61 = vpop.f32.mrb[125].mxu0 }
 0x1fc   : > { %v4089_v51 = vpop.f32.mrb[125].mxu1  ;;  %v2480_v10 = vadd.f32 %v2479_v61, %v5674_v58  ;;  %v4173_v5 = vpop.f32.mrb[126].mxu0  ;;  %v2797_v24 = vadd.f32 %v2796_v44, %v2766_v55  ;;  %v2728_v9 = vadd.f32 %v2727_v6, %v2475_v26 }
 0x1fd   : > { %v4090_v62 = vadd.f32 %v4089_v51, %v4088_v12  ;;  %v4091_v11 = vpop.f32.mrb[126].mxu1  ;;  %v2491_v7 = vadd.f32 %v4173_v5, %v5692_v59  ;;  %v2482_v28 = vpop.f32.mrb[127].mxu0  ;;  %v2770_v50 = vmul.f32 %v2488_v52, %v2488_v52 }
 0x1fe   : > { %v4092_v47 = vpop.f32.mrb[127].mxu1  ;;  %v2768_v15 = vmul.f32 %v2480_v10, %v2480_v10  ;;  %v2483_v43 = vadd.f32 %v2482_v28, %v5680_v18  ;;  %v2729_v22 = vadd.f32 %v2728_v9, %v2480_v10  ;;  %v2798_v38 = vadd.f32 %v2797_v24, %v2767_v60 }
 0x1ff   : > { %v4093_v3 = vadd.f32 %v4092_v47, %v4091_v11  ;;  %v2359_v4 = vadd.f32 %v4090_v62, %v5635_v19  ;;  %v3229_v58 = vpack.c.bf16 %v2491_v7, %v2488_v52  ;;  %v2771_v2 = vmul.f32 %v2491_v7, %v2491_v7 }
 0x200   : > { %v3224_v46 = vpack.c.bf16 %v2483_v43, %v2480_v10  ;;  %v2769_v29 = vmul.f32 %v2483_v43, %v2483_v43  ;;  %v2799_v20 = vadd.f32 %v2798_v38, %v2768_v15  ;;  %v2730_v57 = vadd.f32 %v2729_v22, %v2483_v43 }
 0x201   : > { %v2362_v42 = vadd.f32 %v4093_v3, %v5641_v56  ;;  %3277 = vst [vmem:[%s5701_s14 + $0x38] sm:$0xff] %v3229_v58  }
 0x202   : > { %3276 = vst [vmem:[%s5701_s14 + $0x30] sm:$0xff] %v3224_v46   ;;  %v4176_v63 = vpop.f32.mrb[128].mxu0  ;;  %v2731_v36 = vadd.f32 %v2730_v57, %v2488_v52  ;;  %v2800_v26 = vadd.f32 %v2799_v20, %v2769_v29 }
 0x203   : > { %v4094_v59 = vpop.f32.mrb[128].mxu1  ;;  %v2504_v18 = vadd.f32 %v4176_v63, %v5717_v27  ;;  %v2495_v19 = vpop.f32.mrb[129].mxu0 }
 0x204   : > { %v4095_v13 = vpop.f32.mrb[129].mxu1  ;;  %v2496_v23 = vadd.f32 %v2495_v19, %v5705_v31  ;;  %v4177_v54 = vpop.f32.mrb[130].mxu0  ;;  %v2801_v56 = vadd.f32 %v2800_v26, %v2770_v50  ;;  %v2732_v33 = vadd.f32 %v2731_v36, %v2491_v7 }
 0x205   : > { %v4096_v16 = vadd.f32 %v4095_v13, %v4094_v59  ;;  %v4097_v0 = vpop.f32.mrb[130].mxu1  ;;  %v2507_v34 = vadd.f32 %v4177_v54, %v5720_v25  ;;  %v2498_v17 = vpop.f32.mrb[131].mxu0  ;;  %v2774_v10 = vmul.f32 %v2504_v18, %v2504_v18 }
 0x206   : > { %v4098_v49 = vpop.f32.mrb[131].mxu1  ;;  %v2772_v53 = vmul.f32 %v2496_v23, %v2496_v23  ;;  %v2499_v27 = vadd.f32 %v2498_v17, %v5708_v14  ;;  %v2733_v30 = vadd.f32 %v2732_v33, %v2496_v23  ;;  %v2802_v55 = vadd.f32 %v2801_v56, %v2771_v2 }
 0x207   : > { %v4099_v8 = vadd.f32 %v4098_v49, %v4097_v0  ;;  %v2367_v12 = vadd.f32 %v4096_v16, %v5647_v40  ;;  %v3239_v31 = vpack.c.bf16 %v2507_v34, %v2504_v18  ;;  %v2775_v28 = vmul.f32 %v2507_v34, %v2507_v34 }
 0x208   : > { %v3234_v6 = vpack.c.bf16 %v2499_v27, %v2496_v23  ;;  %v2773_v44 = vmul.f32 %v2499_v27, %v2499_v27  ;;  %v2803_v51 = vadd.f32 %v2802_v55, %v2772_v53  ;;  %v2734_v61 = vadd.f32 %v2733_v30, %v2499_v27 }
 0x209   : > { %v2370_v52 = vadd.f32 %v4099_v8, %v5653_v21  ;;  %3279 = vst [vmem:[%s5701_s14 + $0x48] sm:$0xff] %v3239_v31  }
 0x20a   : > { %3278 = vst [vmem:[%s5701_s14 + $0x40] sm:$0xff] %v3234_v6   ;;  %v4180_v62 = vpop.f32.mrb[132].mxu0  ;;  %v2735_v11 = vadd.f32 %v2734_v61, %v2504_v18  ;;  %v2804_v5 = vadd.f32 %v2803_v51, %v2773_v44 }
 0x20b   : > { %v4100_v25 = vpop.f32.mrb[132].mxu1  ;;  %v2520_v60 = vadd.f32 %v4180_v62, %v2359_v4  ;;  %v2511_v24 = vpop.f32.mrb[133].mxu0 }
 0x20c   : > { %v4101_v14 = vpop.f32.mrb[133].mxu1  ;;  %v2512_v9 = vadd.f32 %v2511_v24, %v5729_v37  ;;  %v4181_v47 = vpop.f32.mrb[134].mxu0  ;;  %v2805_v15 = vadd.f32 %v2804_v5, %v2774_v10  ;;  %v2736_v21 = vadd.f32 %v2735_v11, %v2507_v34 }
 0x20d   : > { %v4102_v40 = vadd.f32 %v4101_v14, %v4100_v25  ;;  %v4103_v7 = vpop.f32.mrb[134].mxu1  ;;  %v2523_v3 = vadd.f32 %v4181_v47, %v2362_v42  ;;  %v2514_v22 = vpop.f32.mrb[135].mxu0  ;;  %v2778_v18 = vmul.f32 %v2520_v60, %v2520_v60 }
 0x20e   : > { %v4104_v43 = vpop.f32.mrb[135].mxu1  ;;  %v2776_v38 = vmul.f32 %v2512_v9, %v2512_v9  ;;  %v2515_v46 = vadd.f32 %v2514_v22, %v5732_v41  ;;  %v2737_v29 = vadd.f32 %v2736_v21, %v2512_v9  ;;  %v2806_v20 = vadd.f32 %v2805_v15, %v2775_v28 }
 0x20f   : > { %v4105_v58 = vadd.f32 %v4104_v43, %v4103_v7  ;;  %v2375_v4 = vadd.f32 %v4102_v40, %v5659_v45  ;;  %v3249_v57 = vpack.c.bf16 %v2523_v3, %v2520_v60  ;;  %v2779_v56 = vmul.f32 %v2523_v3, %v2523_v3 }
 0x210   : > { %v3244_v37 = vpack.c.bf16 %v2515_v46, %v2512_v9  ;;  %v2777_v59 = vmul.f32 %v2515_v46, %v2515_v46  ;;  %v2807_v50 = vadd.f32 %v2806_v20, %v2776_v38  ;;  %v2738_v36 = vadd.f32 %v2737_v29, %v2515_v46 }
 0x211   : > { %v2378_v63 = vadd.f32 %v4105_v58, %v5665_v32  ;;  %3281 = vst [vmem:[%s5701_s14 + $0x58] sm:$0xff] %v3249_v57  }
 0x212   : > { %3280 = vst [vmem:[%s5701_s14 + $0x50] sm:$0xff] %v3244_v37   ;;  %v4184_v26 = vpop.f32.mrb[136].mxu0  ;;  %v2739_v13 = vadd.f32 %v2738_v36, %v2520_v60  ;;  %v2808_v19 = vadd.f32 %v2807_v50, %v2777_v59 }
 0x213   : > { %v4106_v42 = vpop.f32.mrb[136].mxu1  ;;  %v2536_v16 = vadd.f32 %v4184_v26, %v2375_v4  ;;  %v2527_v23 = vpop.f32.mrb[137].mxu0 }
 0x214   : > { %v4107_v41 = vpop.f32.mrb[137].mxu1  ;;  %v2528_v0 = vadd.f32 %v2527_v23, %v2367_v12  ;;  %v4185_v2 = vpop.f32.mrb[138].mxu0  ;;  %v2809_v33 = vadd.f32 %v2808_v19, %v2778_v18  ;;  %v2740_v32 = vadd.f32 %v2739_v13, %v2523_v3 }
 0x215   : > { %v4108_v45 = vadd.f32 %v4107_v41, %v4106_v42  ;;  %v4109_v54 = vpop.f32.mrb[138].mxu1  ;;  %v2539_v34 = vadd.f32 %v4185_v2, %v2378_v63  ;;  %v2530_v17 = vpop.f32.mrb[139].mxu0  ;;  %v2782_v11 = vmul.f32 %v2536_v16, %v2536_v16 }
 0x216   : > { %v4110_v49 = vpop.f32.mrb[139].mxu1  ;;  %v2780_v53 = vmul.f32 %v2528_v0, %v2528_v0  ;;  %v2531_v27 = vadd.f32 %v2530_v17, %v2370_v52  ;;  %v2741_v55 = vadd.f32 %v2740_v32, %v2528_v0  ;;  %v2810_v31 = vadd.f32 %v2809_v33, %v2779_v56 }
 0x217   : > { %v4111_v8 = vadd.f32 %v4110_v49, %v4109_v54  ;;  %v2383_v30 = vadd.f32 %v4108_v45, %v5671_v39  ;;  %v3259_v6 = vpack.c.bf16 %v2539_v34, %v2536_v16  ;;  %v2783_v7 = vmul.f32 %v2539_v34, %v2539_v34 }
 0x218   : > { %v3254_v44 = vpack.c.bf16 %v2531_v27, %v2528_v0  ;;  %v2781_v12 = vmul.f32 %v2531_v27, %v2531_v27  ;;  %v2811_v61 = vadd.f32 %v2810_v31, %v2780_v53  ;;  %v2742_v25 = vadd.f32 %v2741_v55, %v2531_v27 }
 0x219   : > { %v2386_v51 = vadd.f32 %v4111_v8, %v5677_v35  ;;  %3283 = vst [vmem:[%s5701_s14 + $0x68] sm:$0xff] %v3259_v6  }
 0x21a   : > { %3282 = vst [vmem:[%s5701_s14 + $0x60] sm:$0xff] %v3254_v44   ;;  %v4188_v10 = vpop.f32.mrb[140].mxu0  ;;  %v2743_v5 = vadd.f32 %v2742_v25, %v2536_v16  ;;  %v2812_v60 = vadd.f32 %v2811_v61, %v2781_v12 }
 0x21b   : > { %v4112_v62 = vpop.f32.mrb[140].mxu1  ;;  %v2543_v52 = vpop.f32.mrb[141].mxu0 }
 0x21c   : > { %v4113_v14 = vpop.f32.mrb[141].mxu1  ;;  %v2544_v39 = vadd.f32 %v2543_v52, %v2383_v30  ;;  %v4189_v9 = vpop.f32.mrb[142].mxu0  ;;  %v2813_v47 = vadd.f32 %v2812_v60, %v2782_v11  ;;  %v2744_v28 = vadd.f32 %v2743_v5, %v2539_v34 }
 0x21d   : > { %v4114_v24 = vadd.f32 %v4113_v14, %v4112_v62  ;;  %v4115_v40 = vpop.f32.mrb[142].mxu1  ;;  %v2546_v35 = vpop.f32.mrb[143].mxu0 }
 0x21e   : > { %v4116_v15 = vpop.f32.mrb[143].mxu1  ;;  %v2784_v3 = vmul.f32 %v2544_v39, %v2544_v39  ;;  %v2547_v22 = vadd.f32 %v2546_v35, %v2386_v51  ;;  %v2745_v38 = vadd.f32 %v2744_v28, %v2544_v39  ;;  %v2814_v58 = vadd.f32 %v2813_v47, %v2783_v7 }
 0x21f   : > { %v2391_v21 = vadd.f32 %v4114_v24, %v5683_v1  ;;  %v4117_v43 = vadd.f32 %v4116_v15, %v4115_v40 }
 0x220   : > { %v3264_v29 = vpack.c.bf16 %v2547_v22, %v2544_v39  ;;  %v2785_v20 = vmul.f32 %v2547_v22, %v2547_v22  ;;  %v2815_v57 = vadd.f32 %v2814_v58, %v2784_v3  ;;  %v2746_v37 = vadd.f32 %v2745_v38, %v2547_v22 }
 0x221   : > { %v2552_v46 = vadd.f32 %v4188_v10, %v2391_v21  ;;  %v2394_v4 = vadd.f32 %v4117_v43, %v5689_v48 }
 0x222   : > { %3284 = vst [vmem:[%s5701_s14 + $0x70] sm:$0xff] %v3264_v29   ;;  %v2816_v36 = vadd.f32 %v2815_v57, %v2785_v20 }
 0x223   : > { %v2786_v59 = vmul.f32 %v2552_v46, %v2552_v46  ;;  %v2555_v63 = vadd.f32 %v4189_v9, %v2394_v4  ;;  %v2747_v50 = vadd.f32 %v2746_v37, %v2552_v46 }
 0x225   : > { %v3269_v1 = vpack.c.bf16 %v2555_v63, %v2552_v46  ;;  %v2787_v42 = vmul.f32 %v2555_v63, %v2555_v63  ;;  %v2748_v26 = vadd.f32 %v2747_v50, %v2555_v63  ;;  %v2817_v18 = vadd.f32 %v2816_v36, %v2786_v59 }
 0x227   : > { %3285 = vst [vmem:[%s5701_s14 + $0x78] sm:$0xff] %v3269_v1   ;;  %v2749_v13 = vrot.slane %v2748_v26, 4  ;;  %v2818_v19 = vadd.f32 %v2817_v18, %v2787_v42 }
 0x229   : > { %v2750_v16 = vadd.f32 %v2749_v13, %v2748_v26  ;;  %v2819_v48 = vrot.slane %v2818_v19, 4 }
 0x22b   : > { %v2751_v41 = vrot.slane %v2750_v16, 2  ;;  %v2820_v23 = vadd.f32 %v2819_v48, %v2818_v19 }
 0x22d   : > { %v2752_v45 = vadd.f32 %v2751_v41, %v2750_v16  ;;  %v2821_v0 = vrot.slane %v2820_v23, 2 }
 0x22f   : > { %v2753_v54 = vrot.slane %v2752_v45, 1  ;;  %v2822_v2 = vadd.f32 %v2821_v0, %v2820_v23 }
 0x231   : > { %v2754_v56 = vadd.f32 %v2753_v54, %v2752_v45  ;;  %v2823_v33 = vrot.slane %v2822_v2, 1 }
 0x233   : > { %2755 = vst [vmem:[%s473_s16] sm:$0x1] %v2754_v56  ;;  %v2824_v32 = vadd.f32 %v2823_v33, %v2822_v2 }
 0x235   : > { %2825 = vst [vmem:[%s479_s19] sm:$0x1] %v2824_v32 }
 0x236 PF: > { %s18_s2 = sadd.s32 1, %s4329_s2   ;;  %s5810_s24 = smov %s4325_s1 }
 0x237   : > { %p15_p5 = scmp.ge.s32.totalorder %s18_s2, 4   ;;  %s5811_s1 = smov %s5813_s25 }
 0x239   :  { %17 = sbr.rel (!%p15_p5) target bundleno = 2 (0x2), region = 102 }

</bundles_post_ra>
